<compile_context>
chip_gen: v7x
topology: tpu7x:2x2x1
jax: 0.10.0
libtpu: 0.0.40
codegen_flags: <defaults>
</compile_context>

<pallas_src>
import math

import jax
import jax.numpy as jnp
from jax import lax
from jax.experimental import pallas as pl
from jax.experimental.pallas import tpu as pltpu

HIDDEN_SIZE = 256   # tutorial's hidden_size (multiple of 128 -> lane-dense)
INPUT_SIZE = 24     # vocabulary size
SEQ_LEN = 8         # tokens processed per kernel launch


def _encoder_gru_kernel(tok_ref,            # SMEM (T,) int32  -- scalar prefetch
                        emb_ref,            # VMEM (V, H) f32  -- resident
                        h0_ref,             # VMEM (1, H) f32
                        wi_ref, wh_ref,     # VMEM (H, 3H) bf16, gate cols [r|z|n]
                        bi_ref, bh_ref,     # VMEM (1, 3H) f32
                        out_ref,            # VMEM (T, H) f32  -- dense output tile
                        x_scratch,          # VMEM (T, H) f32  -- gathered embeddings
                        gi_scratch):        # VMEM (T, 3H) f32 -- hoisted input projection
    T, H = out_ref.shape
    f32 = jnp.float32
    bf16 = jnp.bfloat16

    # 1) Gather all T embedding rows (token ids from SMEM) into VMEM scratch.
    def gather_row(t, carry):
        x_scratch[pl.ds(t, 1), :] = emb_ref[pl.ds(tok_ref[t], 1), :]
        return carry

    lax.fori_loop(0, T, gather_row, 0, unroll=True)

    # 2) Hoisted input projection: one (T,H)@(H,3H) matmul (fills a full
    #    sublane group instead of 8 separate M=1 matmuls).
    gi_scratch[...] = (
        jnp.dot(x_scratch[...].astype(bf16), wi_ref[...],
                preferred_element_type=f32)
        + bi_ref[...]
    )

    # 3) Sequential recurrence; h is a loop-carried value (vreg-resident).
    def step(t, h):
        gi = gi_scratch[pl.ds(t, 1), :]                                 # (1, 3H)
        gh = jnp.dot(h.astype(bf16), wh_ref[...],
                     preferred_element_type=f32) + bh_ref[...]          # (1, 3H)
        r = jax.nn.sigmoid(gi[:, 0 * H:1 * H] + gh[:, 0 * H:1 * H])
        z = jax.nn.sigmoid(gi[:, 1 * H:2 * H] + gh[:, 1 * H:2 * H])
        n = jnp.tanh(gi[:, 2 * H:3 * H] + r * gh[:, 2 * H:3 * H])
        h_new = (1.0 - z) * n + z * h
        out_ref[pl.ds(t, 1), :] = h_new
        return h_new

    lax.fori_loop(0, T, step, h0_ref[...].astype(f32), unroll=True)


def init_params(key, input_size=INPUT_SIZE, hidden_size=HIDDEN_SIZE):
    """Deterministic synthetic parameters in the fused (H, 3H) layout."""
    keys = jax.random.split(key, 5)
    k = 1.0 / math.sqrt(hidden_size)

    def u(kk, shape):
        return jax.random.uniform(kk, shape, jnp.float32, minval=-k, maxval=k)

    return {
        # Embedding table stays f32 (tiny; gather-friendly sublane slices).
        "embedding": jax.random.normal(keys[0], (input_size, hidden_size), jnp.float32),
        # GRU weights stored (in_features, 3H) for row @ W, gate columns [r|z|n].
        # bf16 MXU operands; accumulation stays f32 via preferred_element_type.
        "W_i": u(keys[1], (hidden_size, 3 * hidden_size)).astype(jnp.bfloat16),
        "W_h": u(keys[2], (hidden_size, 3 * hidden_size)).astype(jnp.bfloat16),
        # GRU biases as (1, 3H) f32 rows, gate order [r | z | n].
        "b_i": u(keys[3], (1, 3 * hidden_size)),
        "b_h": u(keys[4], (1, 3 * hidden_size)),
    }


def encoder_rnn_forward(tokens, hidden, params, hidden_size=HIDDEN_SIZE):
    """tokens: int32 (T,) or (T, 1); hidden: f32 (1, 1, H).

    Runs the encoder over the whole token sequence in ONE pallas_call
    (single grid step, time loop fully inside the kernel).  Returns
    (outputs (T, 1, H), hidden (1, 1, H)); for T == 1 this matches the
    PyTorch module's single-step forward exactly.
    """
    vocab = params["embedding"].shape[0]
    H = hidden_size
    H3 = 3 * H

    tokens = jnp.clip(tokens.reshape(-1).astype(jnp.int32), 0, vocab - 1)
    T = int(tokens.shape[0])
    h0 = hidden.reshape(1, H).astype(jnp.float32)

    grid_spec = pltpu.PrefetchScalarGridSpec(
        num_scalar_prefetch=1,                      # tokens -> SMEM
        grid=(1,),                                  # single invocation
        in_specs=[
            pl.BlockSpec((vocab, H), lambda i, toks: (0, 0)),   # embedding
            pl.BlockSpec((1, H), lambda i, toks: (0, 0)),       # h0
            pl.BlockSpec((H, H3), lambda i, toks: (0, 0)),      # W_i (bf16)
            pl.BlockSpec((H, H3), lambda i, toks: (0, 0)),      # W_h (bf16)
            pl.BlockSpec((1, H3), lambda i, toks: (0, 0)),      # b_i
            pl.BlockSpec((1, H3), lambda i, toks: (0, 0)),      # b_h
        ],
        out_specs=pl.BlockSpec((T, H), lambda i, toks: (0, 0)),
        scratch_shapes=[
            pltpu.VMEM((T, H), jnp.float32),     # gathered embedding rows
            pltpu.VMEM((T, H3), jnp.float32),    # hoisted input projection
        ],
    )

    outputs = pl.pallas_call(
        _encoder_gru_kernel,
        out_shape=jax.ShapeDtypeStruct((T, H), jnp.float32),
        grid_spec=grid_spec,
        compiler_params=pltpu.CompilerParams(
            dimension_semantics=("arbitrary",)),    # recurrence is sequential
    )(tokens, params["embedding"], h0,
      params["W_i"], params["W_h"], params["b_i"], params["b_h"])

    outputs = outputs.reshape(T, 1, H)
    new_hidden = outputs[-1:].reshape(1, 1, H)
    return outputs, new_hidden


def encoder_rnn_reference(tokens, hidden, params, hidden_size=HIDDEN_SIZE):
    """Pure-JAX reference mirroring the kernel's bf16-operand / f32-accumulate math."""
    H = hidden_size
    f32, bf16 = jnp.float32, jnp.bfloat16
    tokens = tokens.reshape(-1)
    h = hidden.reshape(1, H).astype(f32)
    Wi = params["W_i"].astype(f32)
    Wh = params["W_h"].astype(f32)
    outs = []
    for t in range(int(tokens.shape[0])):
        x = params["embedding"][tokens[t]].reshape(1, H)
        gi = x.astype(bf16).astype(f32) @ Wi + params["b_i"]
        gh = h.astype(bf16).astype(f32) @ Wh + params["b_h"]
        r = jax.nn.sigmoid(gi[:, :H] + gh[:, :H])
        z = jax.nn.sigmoid(gi[:, H:2 * H] + gh[:, H:2 * H])
        n = jnp.tanh(gi[:, 2 * H:] + r * gh[:, 2 * H:])
        h = (1.0 - z) * n + z * h
        outs.append(h)
    return jnp.stack(outs).reshape(-1, 1, H), h.reshape(1, 1, H)


if __name__ == "__main__":
    key = jax.random.PRNGKey(0)
    params = init_params(key)

    tokens = jax.random.randint(jax.random.PRNGKey(1), (SEQ_LEN,), 0, INPUT_SIZE,
                                dtype=jnp.int32)
    hidden = jnp.zeros((1, 1, HIDDEN_SIZE), jnp.float32)   # initHidden()

    outputs, new_hidden = encoder_rnn_forward(tokens, hidden, params)
    jax.block_until_ready((outputs, new_hidden))

    assert outputs.shape == (SEQ_LEN, 1, HIDDEN_SIZE)
    assert new_hidden.shape == (1, 1, HIDDEN_SIZE)

    ref_out, ref_h = encoder_rnn_reference(tokens, hidden, params)
    assert jnp.allclose(outputs, ref_out, atol=2e-3, rtol=2e-3)
    assert jnp.allclose(new_hidden, ref_h, atol=2e-3, rtol=2e-3)

    print("KERNEL_OK")
</pallas_src>

<mosaic_0001>
module attributes {stable_mosaic.version = 11 : i64} {
  func.func @_encoder_gru_kernel(%arg0: i32, %arg1: memref<8xi32, #tpu.memory_space<smem>>, %arg2: memref<24x256xf32, #tpu.memory_space<vmem>>, %arg3: memref<1x256xf32, #tpu.memory_space<vmem>>, %arg4: memref<256x768xbf16, #tpu.memory_space<vmem>>, %arg5: memref<256x768xbf16, #tpu.memory_space<vmem>>, %arg6: memref<1x768xf32, #tpu.memory_space<vmem>>, %arg7: memref<1x768xf32, #tpu.memory_space<vmem>>, %arg8: memref<8x256xf32, #tpu.memory_space<vmem>>, %arg9: memref<8x256xf32, #tpu.memory_space<vmem>>, %arg10: memref<8x768xf32, #tpu.memory_space<vmem>>) attributes {dimension_semantics = [#tpu.dimension_semantics<arbitrary>], iteration_bounds = array<i64: 1>, scalar_prefetch = 1 : i64, scratch_operands = 2 : i64, tpu.core_type = #tpu.core_type<tc>, window_params = [{pipeline_mode = #tpu.pipeline_mode<synchronous>, transform_indices = @transform_0, window_bounds = array<i64: 24, 256>}, {pipeline_mode = #tpu.pipeline_mode<synchronous>, transform_indices = @transform_1, window_bounds = array<i64: 1, 256>}, {pipeline_mode = #tpu.pipeline_mode<synchronous>, transform_indices = @transform_2, window_bounds = array<i64: 256, 768>}, {pipeline_mode = #tpu.pipeline_mode<synchronous>, transform_indices = @transform_3, window_bounds = array<i64: 256, 768>}, {pipeline_mode = #tpu.pipeline_mode<synchronous>, transform_indices = @transform_4, window_bounds = array<i64: 1, 768>}, {pipeline_mode = #tpu.pipeline_mode<synchronous>, transform_indices = @transform_5, window_bounds = array<i64: 1, 768>}, {pipeline_mode = #tpu.pipeline_mode<synchronous>, transform_indices = @transform_6, window_bounds = array<i64: 8, 256>}]} {
    %c0_i32 = arith.constant 0 : i32
    %0 = arith.index_cast %c0_i32 : i32 to index
    %1 = memref.load %arg1[%0] : memref<8xi32, #tpu.memory_space<smem>>
    %2 = arith.index_cast %1 : i32 to index
    %c0 = arith.constant 0 : index
    %3 = vector.load %arg2[%2, %c0] : memref<24x256xf32, #tpu.memory_space<vmem>>, vector<1x256xf32>
    %4 = arith.index_cast %c0_i32 : i32 to index
    %c0_0 = arith.constant 0 : index
    %5 = vector.load %arg9[%4, %c0_0] : memref<8x256xf32, #tpu.memory_space<vmem>>, vector<1x256xf32>
    tpu.vector_store %arg9[%4, %c0_0], %3 {strides = array<i32>} : memref<8x256xf32, #tpu.memory_space<vmem>>, vector<1x256xf32>,
    %c1_i32 = arith.constant 1 : i32
    %6 = arith.index_cast %c1_i32 : i32 to index
    %7 = memref.load %arg1[%6] : memref<8xi32, #tpu.memory_space<smem>>
    %8 = arith.index_cast %7 : i32 to index
    %c0_1 = arith.constant 0 : index
    %9 = vector.load %arg2[%8, %c0_1] : memref<24x256xf32, #tpu.memory_space<vmem>>, vector<1x256xf32>
    %10 = arith.index_cast %c1_i32 : i32 to index
    %c0_2 = arith.constant 0 : index
    %11 = vector.load %arg9[%10, %c0_2] : memref<8x256xf32, #tpu.memory_space<vmem>>, vector<1x256xf32>
    tpu.vector_store %arg9[%10, %c0_2], %9 {strides = array<i32>} : memref<8x256xf32, #tpu.memory_space<vmem>>, vector<1x256xf32>,
    %c2_i32 = arith.constant 2 : i32
    %12 = arith.index_cast %c2_i32 : i32 to index
    %13 = memref.load %arg1[%12] : memref<8xi32, #tpu.memory_space<smem>>
    %14 = arith.index_cast %13 : i32 to index
    %c0_3 = arith.constant 0 : index
    %15 = vector.load %arg2[%14, %c0_3] : memref<24x256xf32, #tpu.memory_space<vmem>>, vector<1x256xf32>
    %16 = arith.index_cast %c2_i32 : i32 to index
    %c0_4 = arith.constant 0 : index
    %17 = vector.load %arg9[%16, %c0_4] : memref<8x256xf32, #tpu.memory_space<vmem>>, vector<1x256xf32>
    tpu.vector_store %arg9[%16, %c0_4], %15 {strides = array<i32>} : memref<8x256xf32, #tpu.memory_space<vmem>>, vector<1x256xf32>,
    %c3_i32 = arith.constant 3 : i32
    %18 = arith.index_cast %c3_i32 : i32 to index
    %19 = memref.load %arg1[%18] : memref<8xi32, #tpu.memory_space<smem>>
    %20 = arith.index_cast %19 : i32 to index
    %c0_5 = arith.constant 0 : index
    %21 = vector.load %arg2[%20, %c0_5] : memref<24x256xf32, #tpu.memory_space<vmem>>, vector<1x256xf32>
    %22 = arith.index_cast %c3_i32 : i32 to index
    %c0_6 = arith.constant 0 : index
    %23 = vector.load %arg9[%22, %c0_6] : memref<8x256xf32, #tpu.memory_space<vmem>>, vector<1x256xf32>
    tpu.vector_store %arg9[%22, %c0_6], %21 {strides = array<i32>} : memref<8x256xf32, #tpu.memory_space<vmem>>, vector<1x256xf32>,
    %c4_i32 = arith.constant 4 : i32
    %24 = arith.index_cast %c4_i32 : i32 to index
    %25 = memref.load %arg1[%24] : memref<8xi32, #tpu.memory_space<smem>>
    %26 = arith.index_cast %25 : i32 to index
    %c0_7 = arith.constant 0 : index
    %27 = vector.load %arg2[%26, %c0_7] : memref<24x256xf32, #tpu.memory_space<vmem>>, vector<1x256xf32>
    %28 = arith.index_cast %c4_i32 : i32 to index
    %c0_8 = arith.constant 0 : index
    %29 = vector.load %arg9[%28, %c0_8] : memref<8x256xf32, #tpu.memory_space<vmem>>, vector<1x256xf32>
    tpu.vector_store %arg9[%28, %c0_8], %27 {strides = array<i32>} : memref<8x256xf32, #tpu.memory_space<vmem>>, vector<1x256xf32>,
    %c5_i32 = arith.constant 5 : i32
    %30 = arith.index_cast %c5_i32 : i32 to index
    %31 = memref.load %arg1[%30] : memref<8xi32, #tpu.memory_space<smem>>
    %32 = arith.index_cast %31 : i32 to index
    %c0_9 = arith.constant 0 : index
    %33 = vector.load %arg2[%32, %c0_9] : memref<24x256xf32, #tpu.memory_space<vmem>>, vector<1x256xf32>
    %34 = arith.index_cast %c5_i32 : i32 to index
    %c0_10 = arith.constant 0 : index
    %35 = vector.load %arg9[%34, %c0_10] : memref<8x256xf32, #tpu.memory_space<vmem>>, vector<1x256xf32>
    tpu.vector_store %arg9[%34, %c0_10], %33 {strides = array<i32>} : memref<8x256xf32, #tpu.memory_space<vmem>>, vector<1x256xf32>,
    %c6_i32 = arith.constant 6 : i32
    %36 = arith.index_cast %c6_i32 : i32 to index
    %37 = memref.load %arg1[%36] : memref<8xi32, #tpu.memory_space<smem>>
    %38 = arith.index_cast %37 : i32 to index
    %c0_11 = arith.constant 0 : index
    %39 = vector.load %arg2[%38, %c0_11] : memref<24x256xf32, #tpu.memory_space<vmem>>, vector<1x256xf32>
    %40 = arith.index_cast %c6_i32 : i32 to index
    %c0_12 = arith.constant 0 : index
    %41 = vector.load %arg9[%40, %c0_12] : memref<8x256xf32, #tpu.memory_space<vmem>>, vector<1x256xf32>
    tpu.vector_store %arg9[%40, %c0_12], %39 {strides = array<i32>} : memref<8x256xf32, #tpu.memory_space<vmem>>, vector<1x256xf32>,
    %c7_i32 = arith.constant 7 : i32
    %42 = arith.index_cast %c7_i32 : i32 to index
    %43 = memref.load %arg1[%42] : memref<8xi32, #tpu.memory_space<smem>>
    %44 = arith.index_cast %43 : i32 to index
    %c0_13 = arith.constant 0 : index
    %45 = vector.load %arg2[%44, %c0_13] : memref<24x256xf32, #tpu.memory_space<vmem>>, vector<1x256xf32>
    %46 = arith.index_cast %c7_i32 : i32 to index
    %c0_14 = arith.constant 0 : index
    %47 = vector.load %arg9[%46, %c0_14] : memref<8x256xf32, #tpu.memory_space<vmem>>, vector<1x256xf32>
    tpu.vector_store %arg9[%46, %c0_14], %45 {strides = array<i32>} : memref<8x256xf32, #tpu.memory_space<vmem>>, vector<1x256xf32>,
    %c8_i32 = arith.constant 8 : i32
    %c0_15 = arith.constant 0 : index
    %c0_16 = arith.constant 0 : index
    %48 = vector.load %arg9[%c0_15, %c0_16] : memref<8x256xf32, #tpu.memory_space<vmem>>, vector<8x256xf32>
    %49 = arith.truncf %48 : vector<8x256xf32> to vector<8x256xbf16>
    %c0_17 = arith.constant 0 : index
    %c0_18 = arith.constant 0 : index
    %50 = vector.load %arg4[%c0_17, %c0_18] : memref<256x768xbf16, #tpu.memory_space<vmem>>, vector<256x768xbf16>
    %cst = arith.constant dense<0.000000e+00> : vector<8x768xf32>
    %51 = tpu.matmul %49, %50, %cst {dimension_numbers = #tpu.dot_dimension_numbers<[1], [0], [0], [1], [0, 0, 1, 1], [], []>} : vector<8x256xbf16>, vector<256x768xbf16>, vector<8x768xf32> -> vector<8x768xf32>
    %c0_19 = arith.constant 0 : index
    %c0_20 = arith.constant 0 : index
    %52 = vector.load %arg6[%c0_19, %c0_20] : memref<1x768xf32, #tpu.memory_space<vmem>>, vector<1x768xf32>
    %53 = vector.broadcast %52 : vector<1x768xf32> to vector<8x768xf32>
    %54 = arith.addf %51, %53 : vector<8x768xf32>
    %c0_21 = arith.constant 0 : index
    %c0_22 = arith.constant 0 : index
    %55 = vector.load %arg10[%c0_21, %c0_22] : memref<8x768xf32, #tpu.memory_space<vmem>>, vector<8x768xf32>
    tpu.vector_store %arg10[%c0_21, %c0_22], %54 {strides = array<i32>} : memref<8x768xf32, #tpu.memory_space<vmem>>, vector<8x768xf32>,
    %c0_23 = arith.constant 0 : index
    %c0_24 = arith.constant 0 : index
    %56 = vector.load %arg3[%c0_23, %c0_24] : memref<1x256xf32, #tpu.memory_space<vmem>>, vector<1x256xf32>
    %c0_i32_25 = arith.constant 0 : i32
    %57 = arith.index_cast %c0_i32_25 : i32 to index
    %c0_26 = arith.constant 0 : index
    %58 = vector.load %arg10[%57, %c0_26] : memref<8x768xf32, #tpu.memory_space<vmem>>, vector<1x768xf32>
    %59 = arith.truncf %56 : vector<1x256xf32> to vector<1x256xbf16>
    %c0_27 = arith.constant 0 : index
    %c0_28 = arith.constant 0 : index
    %60 = vector.load %arg5[%c0_27, %c0_28] : memref<256x768xbf16, #tpu.memory_space<vmem>>, vector<256x768xbf16>
    %cst_29 = arith.constant dense<0.000000e+00> : vector<1x768xf32>
    %61 = tpu.matmul %59, %60, %cst_29 {dimension_numbers = #tpu.dot_dimension_numbers<[1], [0], [0], [1], [0, 0, 1, 1], [], []>} : vector<1x256xbf16>, vector<256x768xbf16>, vector<1x768xf32> -> vector<1x768xf32>
    %c0_30 = arith.constant 0 : index
    %c0_31 = arith.constant 0 : index
    %62 = vector.load %arg7[%c0_30, %c0_31] : memref<1x768xf32, #tpu.memory_space<vmem>>, vector<1x768xf32>
    %63 = arith.addf %61, %62 : vector<1x768xf32>
    %64 = vector.extract_strided_slice %58 {offsets = [0, 0], sizes = [1, 256], strides = [1, 1]} : vector<1x768xf32> to vector<1x256xf32>
    %65 = vector.extract_strided_slice %63 {offsets = [0, 0], sizes = [1, 256], strides = [1, 1]} : vector<1x768xf32> to vector<1x256xf32>
    %66 = arith.addf %64, %65 : vector<1x256xf32>
    %67 = arith.negf %66 : vector<1x256xf32>
    %68 = math.exp %67 : vector<1x256xf32>
    %cst_32 = arith.constant 1.000000e+00 : f32
    %69 = vector.broadcast %cst_32 : f32 to vector<1x256xf32>
    %70 = arith.addf %69, %68 : vector<1x256xf32>
    %71 = arith.divf %69, %70 : vector<1x256xf32>
    %72 = vector.extract_strided_slice %58 {offsets = [0, 256], sizes = [1, 256], strides = [1, 1]} : vector<1x768xf32> to vector<1x256xf32>
    %73 = vector.extract_strided_slice %63 {offsets = [0, 256], sizes = [1, 256], strides = [1, 1]} : vector<1x768xf32> to vector<1x256xf32>
    %74 = arith.addf %72, %73 : vector<1x256xf32>
    %75 = arith.negf %74 : vector<1x256xf32>
    %76 = math.exp %75 : vector<1x256xf32>
    %cst_33 = arith.constant 1.000000e+00 : f32
    %77 = vector.broadcast %cst_33 : f32 to vector<1x256xf32>
    %78 = arith.addf %77, %76 : vector<1x256xf32>
    %79 = arith.divf %77, %78 : vector<1x256xf32>
    %80 = vector.extract_strided_slice %58 {offsets = [0, 512], sizes = [1, 256], strides = [1, 1]} : vector<1x768xf32> to vector<1x256xf32>
    %81 = vector.extract_strided_slice %63 {offsets = [0, 512], sizes = [1, 256], strides = [1, 1]} : vector<1x768xf32> to vector<1x256xf32>
    %82 = arith.mulf %71, %81 : vector<1x256xf32>
    %83 = arith.addf %80, %82 : vector<1x256xf32>
    %84 = math.tanh %83 : vector<1x256xf32>
    %cst_34 = arith.constant 1.000000e+00 : f32
    %85 = vector.broadcast %cst_34 : f32 to vector<1x256xf32>
    %86 = arith.subf %85, %79 : vector<1x256xf32>
    %87 = arith.mulf %86, %84 : vector<1x256xf32>
    %88 = arith.mulf %79, %56 : vector<1x256xf32>
    %89 = arith.addf %87, %88 : vector<1x256xf32>
    %90 = arith.index_cast %c0_i32_25 : i32 to index
    %c0_35 = arith.constant 0 : index
    %91 = vector.load %arg8[%90, %c0_35] : memref<8x256xf32, #tpu.memory_space<vmem>>, vector<1x256xf32>
    tpu.vector_store %arg8[%90, %c0_35], %89 {strides = array<i32>} : memref<8x256xf32, #tpu.memory_space<vmem>>, vector<1x256xf32>,
    %c1_i32_36 = arith.constant 1 : i32
    %92 = arith.index_cast %c1_i32_36 : i32 to index
    %c0_37 = arith.constant 0 : index
    %93 = vector.load %arg10[%92, %c0_37] : memref<8x768xf32, #tpu.memory_space<vmem>>, vector<1x768xf32>
    %94 = arith.truncf %89 : vector<1x256xf32> to vector<1x256xbf16>
    %c0_38 = arith.constant 0 : index
    %c0_39 = arith.constant 0 : index
    %95 = vector.load %arg5[%c0_38, %c0_39] : memref<256x768xbf16, #tpu.memory_space<vmem>>, vector<256x768xbf16>
    %cst_40 = arith.constant dense<0.000000e+00> : vector<1x768xf32>
    %96 = tpu.matmul %94, %95, %cst_40 {dimension_numbers = #tpu.dot_dimension_numbers<[1], [0], [0], [1], [0, 0, 1, 1], [], []>} : vector<1x256xbf16>, vector<256x768xbf16>, vector<1x768xf32> -> vector<1x768xf32>
    %c0_41 = arith.constant 0 : index
    %c0_42 = arith.constant 0 : index
    %97 = vector.load %arg7[%c0_41, %c0_42] : memref<1x768xf32, #tpu.memory_space<vmem>>, vector<1x768xf32>
    %98 = arith.addf %96, %97 : vector<1x768xf32>
    %99 = vector.extract_strided_slice %93 {offsets = [0, 0], sizes = [1, 256], strides = [1, 1]} : vector<1x768xf32> to vector<1x256xf32>
    %100 = vector.extract_strided_slice %98 {offsets = [0, 0], sizes = [1, 256], strides = [1, 1]} : vector<1x768xf32> to vector<1x256xf32>
    %101 = arith.addf %99, %100 : vector<1x256xf32>
    %102 = arith.negf %101 : vector<1x256xf32>
    %103 = math.exp %102 : vector<1x256xf32>
    %cst_43 = arith.constant 1.000000e+00 : f32
    %104 = vector.broadcast %cst_43 : f32 to vector<1x256xf32>
    %105 = arith.addf %104, %103 : vector<1x256xf32>
    %106 = arith.divf %104, %105 : vector<1x256xf32>
    %107 = vector.extract_strided_slice %93 {offsets = [0, 256], sizes = [1, 256], strides = [1, 1]} : vector<1x768xf32> to vector<1x256xf32>
    %108 = vector.extract_strided_slice %98 {offsets = [0, 256], sizes = [1, 256], strides = [1, 1]} : vector<1x768xf32> to vector<1x256xf32>
    %109 = arith.addf %107, %108 : vector<1x256xf32>
    %110 = arith.negf %109 : vector<1x256xf32>
    %111 = math.exp %110 : vector<1x256xf32>
    %cst_44 = arith.constant 1.000000e+00 : f32
    %112 = vector.broadcast %cst_44 : f32 to vector<1x256xf32>
    %113 = arith.addf %112, %111 : vector<1x256xf32>
    %114 = arith.divf %112, %113 : vector<1x256xf32>
    %115 = vector.extract_strided_slice %93 {offsets = [0, 512], sizes = [1, 256], strides = [1, 1]} : vector<1x768xf32> to vector<1x256xf32>
    %116 = vector.extract_strided_slice %98 {offsets = [0, 512], sizes = [1, 256], strides = [1, 1]} : vector<1x768xf32> to vector<1x256xf32>
    %117 = arith.mulf %106, %116 : vector<1x256xf32>
    %118 = arith.addf %115, %117 : vector<1x256xf32>
    %119 = math.tanh %118 : vector<1x256xf32>
    %cst_45 = arith.constant 1.000000e+00 : f32
    %120 = vector.broadcast %cst_45 : f32 to vector<1x256xf32>
    %121 = arith.subf %120, %114 : vector<1x256xf32>
    %122 = arith.mulf %121, %119 : vector<1x256xf32>
    %123 = arith.mulf %114, %89 : vector<1x256xf32>
    %124 = arith.addf %122, %123 : vector<1x256xf32>
    %125 = arith.index_cast %c1_i32_36 : i32 to index
    %c0_46 = arith.constant 0 : index
    %126 = vector.load %arg8[%125, %c0_46] : memref<8x256xf32, #tpu.memory_space<vmem>>, vector<1x256xf32>
    tpu.vector_store %arg8[%125, %c0_46], %124 {strides = array<i32>} : memref<8x256xf32, #tpu.memory_space<vmem>>, vector<1x256xf32>,
    %c2_i32_47 = arith.constant 2 : i32
    %127 = arith.index_cast %c2_i32_47 : i32 to index
    %c0_48 = arith.constant 0 : index
    %128 = vector.load %arg10[%127, %c0_48] : memref<8x768xf32, #tpu.memory_space<vmem>>, vector<1x768xf32>
    %129 = arith.truncf %124 : vector<1x256xf32> to vector<1x256xbf16>
    %c0_49 = arith.constant 0 : index
    %c0_50 = arith.constant 0 : index
    %130 = vector.load %arg5[%c0_49, %c0_50] : memref<256x768xbf16, #tpu.memory_space<vmem>>, vector<256x768xbf16>
    %cst_51 = arith.constant dense<0.000000e+00> : vector<1x768xf32>
    %131 = tpu.matmul %129, %130, %cst_51 {dimension_numbers = #tpu.dot_dimension_numbers<[1], [0], [0], [1], [0, 0, 1, 1], [], []>} : vector<1x256xbf16>, vector<256x768xbf16>, vector<1x768xf32> -> vector<1x768xf32>
    %c0_52 = arith.constant 0 : index
    %c0_53 = arith.constant 0 : index
    %132 = vector.load %arg7[%c0_52, %c0_53] : memref<1x768xf32, #tpu.memory_space<vmem>>, vector<1x768xf32>
    %133 = arith.addf %131, %132 : vector<1x768xf32>
    %134 = vector.extract_strided_slice %128 {offsets = [0, 0], sizes = [1, 256], strides = [1, 1]} : vector<1x768xf32> to vector<1x256xf32>
    %135 = vector.extract_strided_slice %133 {offsets = [0, 0], sizes = [1, 256], strides = [1, 1]} : vector<1x768xf32> to vector<1x256xf32>
    %136 = arith.addf %134, %135 : vector<1x256xf32>
    %137 = arith.negf %136 : vector<1x256xf32>
    %138 = math.exp %137 : vector<1x256xf32>
    %cst_54 = arith.constant 1.000000e+00 : f32
    %139 = vector.broadcast %cst_54 : f32 to vector<1x256xf32>
    %140 = arith.addf %139, %138 : vector<1x256xf32>
    %141 = arith.divf %139, %140 : vector<1x256xf32>
    %142 = vector.extract_strided_slice %128 {offsets = [0, 256], sizes = [1, 256], strides = [1, 1]} : vector<1x768xf32> to vector<1x256xf32>
    %143 = vector.extract_strided_slice %133 {offsets = [0, 256], sizes = [1, 256], strides = [1, 1]} : vector<1x768xf32> to vector<1x256xf32>
    %144 = arith.addf %142, %143 : vector<1x256xf32>
    %145 = arith.negf %144 : vector<1x256xf32>
    %146 = math.exp %145 : vector<1x256xf32>
    %cst_55 = arith.constant 1.000000e+00 : f32
    %147 = vector.broadcast %cst_55 : f32 to vector<1x256xf32>
    %148 = arith.addf %147, %146 : vector<1x256xf32>
    %149 = arith.divf %147, %148 : vector<1x256xf32>
    %150 = vector.extract_strided_slice %128 {offsets = [0, 512], sizes = [1, 256], strides = [1, 1]} : vector<1x768xf32> to vector<1x256xf32>
    %151 = vector.extract_strided_slice %133 {offsets = [0, 512], sizes = [1, 256], strides = [1, 1]} : vector<1x768xf32> to vector<1x256xf32>
    %152 = arith.mulf %141, %151 : vector<1x256xf32>
    %153 = arith.addf %150, %152 : vector<1x256xf32>
    %154 = math.tanh %153 : vector<1x256xf32>
    %cst_56 = arith.constant 1.000000e+00 : f32
    %155 = vector.broadcast %cst_56 : f32 to vector<1x256xf32>
    %156 = arith.subf %155, %149 : vector<1x256xf32>
    %157 = arith.mulf %156, %154 : vector<1x256xf32>
    %158 = arith.mulf %149, %124 : vector<1x256xf32>
    %159 = arith.addf %157, %158 : vector<1x256xf32>
    %160 = arith.index_cast %c2_i32_47 : i32 to index
    %c0_57 = arith.constant 0 : index
    %161 = vector.load %arg8[%160, %c0_57] : memref<8x256xf32, #tpu.memory_space<vmem>>, vector<1x256xf32>
    tpu.vector_store %arg8[%160, %c0_57], %159 {strides = array<i32>} : memref<8x256xf32, #tpu.memory_space<vmem>>, vector<1x256xf32>,
    %c3_i32_58 = arith.constant 3 : i32
    %162 = arith.index_cast %c3_i32_58 : i32 to index
    %c0_59 = arith.constant 0 : index
    %163 = vector.load %arg10[%162, %c0_59] : memref<8x768xf32, #tpu.memory_space<vmem>>, vector<1x768xf32>
    %164 = arith.truncf %159 : vector<1x256xf32> to vector<1x256xbf16>
    %c0_60 = arith.constant 0 : index
    %c0_61 = arith.constant 0 : index
    %165 = vector.load %arg5[%c0_60, %c0_61] : memref<256x768xbf16, #tpu.memory_space<vmem>>, vector<256x768xbf16>
    %cst_62 = arith.constant dense<0.000000e+00> : vector<1x768xf32>
    %166 = tpu.matmul %164, %165, %cst_62 {dimension_numbers = #tpu.dot_dimension_numbers<[1], [0], [0], [1], [0, 0, 1, 1], [], []>} : vector<1x256xbf16>, vector<256x768xbf16>, vector<1x768xf32> -> vector<1x768xf32>
    %c0_63 = arith.constant 0 : index
    %c0_64 = arith.constant 0 : index
    %167 = vector.load %arg7[%c0_63, %c0_64] : memref<1x768xf32, #tpu.memory_space<vmem>>, vector<1x768xf32>
    %168 = arith.addf %166, %167 : vector<1x768xf32>
    %169 = vector.extract_strided_slice %163 {offsets = [0, 0], sizes = [1, 256], strides = [1, 1]} : vector<1x768xf32> to vector<1x256xf32>
    %170 = vector.extract_strided_slice %168 {offsets = [0, 0], sizes = [1, 256], strides = [1, 1]} : vector<1x768xf32> to vector<1x256xf32>
    %171 = arith.addf %169, %170 : vector<1x256xf32>
    %172 = arith.negf %171 : vector<1x256xf32>
    %173 = math.exp %172 : vector<1x256xf32>
    %cst_65 = arith.constant 1.000000e+00 : f32
    %174 = vector.broadcast %cst_65 : f32 to vector<1x256xf32>
    %175 = arith.addf %174, %173 : vector<1x256xf32>
    %176 = arith.divf %174, %175 : vector<1x256xf32>
    %177 = vector.extract_strided_slice %163 {offsets = [0, 256], sizes = [1, 256], strides = [1, 1]} : vector<1x768xf32> to vector<1x256xf32>
    %178 = vector.extract_strided_slice %168 {offsets = [0, 256], sizes = [1, 256], strides = [1, 1]} : vector<1x768xf32> to vector<1x256xf32>
    %179 = arith.addf %177, %178 : vector<1x256xf32>
    %180 = arith.negf %179 : vector<1x256xf32>
    %181 = math.exp %180 : vector<1x256xf32>
    %cst_66 = arith.constant 1.000000e+00 : f32
    %182 = vector.broadcast %cst_66 : f32 to vector<1x256xf32>
    %183 = arith.addf %182, %181 : vector<1x256xf32>
    %184 = arith.divf %182, %183 : vector<1x256xf32>
    %185 = vector.extract_strided_slice %163 {offsets = [0, 512], sizes = [1, 256], strides = [1, 1]} : vector<1x768xf32> to vector<1x256xf32>
    %186 = vector.extract_strided_slice %168 {offsets = [0, 512], sizes = [1, 256], strides = [1, 1]} : vector<1x768xf32> to vector<1x256xf32>
    %187 = arith.mulf %176, %186 : vector<1x256xf32>
    %188 = arith.addf %185, %187 : vector<1x256xf32>
    %189 = math.tanh %188 : vector<1x256xf32>
    %cst_67 = arith.constant 1.000000e+00 : f32
    %190 = vector.broadcast %cst_67 : f32 to vector<1x256xf32>
    %191 = arith.subf %190, %184 : vector<1x256xf32>
    %192 = arith.mulf %191, %189 : vector<1x256xf32>
    %193 = arith.mulf %184, %159 : vector<1x256xf32>
    %194 = arith.addf %192, %193 : vector<1x256xf32>
    %195 = arith.index_cast %c3_i32_58 : i32 to index
    %c0_68 = arith.constant 0 : index
    %196 = vector.load %arg8[%195, %c0_68] : memref<8x256xf32, #tpu.memory_space<vmem>>, vector<1x256xf32>
    tpu.vector_store %arg8[%195, %c0_68], %194 {strides = array<i32>} : memref<8x256xf32, #tpu.memory_space<vmem>>, vector<1x256xf32>,
    %c4_i32_69 = arith.constant 4 : i32
    %197 = arith.index_cast %c4_i32_69 : i32 to index
    %c0_70 = arith.constant 0 : index
    %198 = vector.load %arg10[%197, %c0_70] : memref<8x768xf32, #tpu.memory_space<vmem>>, vector<1x768xf32>
    %199 = arith.truncf %194 : vector<1x256xf32> to vector<1x256xbf16>
    %c0_71 = arith.constant 0 : index
    %c0_72 = arith.constant 0 : index
    %200 = vector.load %arg5[%c0_71, %c0_72] : memref<256x768xbf16, #tpu.memory_space<vmem>>, vector<256x768xbf16>
    %cst_73 = arith.constant dense<0.000000e+00> : vector<1x768xf32>
    %201 = tpu.matmul %199, %200, %cst_73 {dimension_numbers = #tpu.dot_dimension_numbers<[1], [0], [0], [1], [0, 0, 1, 1], [], []>} : vector<1x256xbf16>, vector<256x768xbf16>, vector<1x768xf32> -> vector<1x768xf32>
    %c0_74 = arith.constant 0 : index
    %c0_75 = arith.constant 0 : index
    %202 = vector.load %arg7[%c0_74, %c0_75] : memref<1x768xf32, #tpu.memory_space<vmem>>, vector<1x768xf32>
    %203 = arith.addf %201, %202 : vector<1x768xf32>
    %204 = vector.extract_strided_slice %198 {offsets = [0, 0], sizes = [1, 256], strides = [1, 1]} : vector<1x768xf32> to vector<1x256xf32>
    %205 = vector.extract_strided_slice %203 {offsets = [0, 0], sizes = [1, 256], strides = [1, 1]} : vector<1x768xf32> to vector<1x256xf32>
    %206 = arith.addf %204, %205 : vector<1x256xf32>
    %207 = arith.negf %206 : vector<1x256xf32>
    %208 = math.exp %207 : vector<1x256xf32>
    %cst_76 = arith.constant 1.000000e+00 : f32
    %209 = vector.broadcast %cst_76 : f32 to vector<1x256xf32>
    %210 = arith.addf %209, %208 : vector<1x256xf32>
    %211 = arith.divf %209, %210 : vector<1x256xf32>
    %212 = vector.extract_strided_slice %198 {offsets = [0, 256], sizes = [1, 256], strides = [1, 1]} : vector<1x768xf32> to vector<1x256xf32>
    %213 = vector.extract_strided_slice %203 {offsets = [0, 256], sizes = [1, 256], strides = [1, 1]} : vector<1x768xf32> to vector<1x256xf32>
    %214 = arith.addf %212, %213 : vector<1x256xf32>
    %215 = arith.negf %214 : vector<1x256xf32>
    %216 = math.exp %215 : vector<1x256xf32>
    %cst_77 = arith.constant 1.000000e+00 : f32
    %217 = vector.broadcast %cst_77 : f32 to vector<1x256xf32>
    %218 = arith.addf %217, %216 : vector<1x256xf32>
    %219 = arith.divf %217, %218 : vector<1x256xf32>
    %220 = vector.extract_strided_slice %198 {offsets = [0, 512], sizes = [1, 256], strides = [1, 1]} : vector<1x768xf32> to vector<1x256xf32>
    %221 = vector.extract_strided_slice %203 {offsets = [0, 512], sizes = [1, 256], strides = [1, 1]} : vector<1x768xf32> to vector<1x256xf32>
    %222 = arith.mulf %211, %221 : vector<1x256xf32>
    %223 = arith.addf %220, %222 : vector<1x256xf32>
    %224 = math.tanh %223 : vector<1x256xf32>
    %cst_78 = arith.constant 1.000000e+00 : f32
    %225 = vector.broadcast %cst_78 : f32 to vector<1x256xf32>
    %226 = arith.subf %225, %219 : vector<1x256xf32>
    %227 = arith.mulf %226, %224 : vector<1x256xf32>
    %228 = arith.mulf %219, %194 : vector<1x256xf32>
    %229 = arith.addf %227, %228 : vector<1x256xf32>
    %230 = arith.index_cast %c4_i32_69 : i32 to index
    %c0_79 = arith.constant 0 : index
    %231 = vector.load %arg8[%230, %c0_79] : memref<8x256xf32, #tpu.memory_space<vmem>>, vector<1x256xf32>
    tpu.vector_store %arg8[%230, %c0_79], %229 {strides = array<i32>} : memref<8x256xf32, #tpu.memory_space<vmem>>, vector<1x256xf32>,
    %c5_i32_80 = arith.constant 5 : i32
    %232 = arith.index_cast %c5_i32_80 : i32 to index
    %c0_81 = arith.constant 0 : index
    %233 = vector.load %arg10[%232, %c0_81] : memref<8x768xf32, #tpu.memory_space<vmem>>, vector<1x768xf32>
    %234 = arith.truncf %229 : vector<1x256xf32> to vector<1x256xbf16>
    %c0_82 = arith.constant 0 : index
    %c0_83 = arith.constant 0 : index
    %235 = vector.load %arg5[%c0_82, %c0_83] : memref<256x768xbf16, #tpu.memory_space<vmem>>, vector<256x768xbf16>
    %cst_84 = arith.constant dense<0.000000e+00> : vector<1x768xf32>
    %236 = tpu.matmul %234, %235, %cst_84 {dimension_numbers = #tpu.dot_dimension_numbers<[1], [0], [0], [1], [0, 0, 1, 1], [], []>} : vector<1x256xbf16>, vector<256x768xbf16>, vector<1x768xf32> -> vector<1x768xf32>
    %c0_85 = arith.constant 0 : index
    %c0_86 = arith.constant 0 : index
    %237 = vector.load %arg7[%c0_85, %c0_86] : memref<1x768xf32, #tpu.memory_space<vmem>>, vector<1x768xf32>
    %238 = arith.addf %236, %237 : vector<1x768xf32>
    %239 = vector.extract_strided_slice %233 {offsets = [0, 0], sizes = [1, 256], strides = [1, 1]} : vector<1x768xf32> to vector<1x256xf32>
    %240 = vector.extract_strided_slice %238 {offsets = [0, 0], sizes = [1, 256], strides = [1, 1]} : vector<1x768xf32> to vector<1x256xf32>
    %241 = arith.addf %239, %240 : vector<1x256xf32>
    %242 = arith.negf %241 : vector<1x256xf32>
    %243 = math.exp %242 : vector<1x256xf32>
    %cst_87 = arith.constant 1.000000e+00 : f32
    %244 = vector.broadcast %cst_87 : f32 to vector<1x256xf32>
    %245 = arith.addf %244, %243 : vector<1x256xf32>
    %246 = arith.divf %244, %245 : vector<1x256xf32>
    %247 = vector.extract_strided_slice %233 {offsets = [0, 256], sizes = [1, 256], strides = [1, 1]} : vector<1x768xf32> to vector<1x256xf32>
    %248 = vector.extract_strided_slice %238 {offsets = [0, 256], sizes = [1, 256], strides = [1, 1]} : vector<1x768xf32> to vector<1x256xf32>
    %249 = arith.addf %247, %248 : vector<1x256xf32>
    %250 = arith.negf %249 : vector<1x256xf32>
    %251 = math.exp %250 : vector<1x256xf32>
    %cst_88 = arith.constant 1.000000e+00 : f32
    %252 = vector.broadcast %cst_88 : f32 to vector<1x256xf32>
    %253 = arith.addf %252, %251 : vector<1x256xf32>
    %254 = arith.divf %252, %253 : vector<1x256xf32>
    %255 = vector.extract_strided_slice %233 {offsets = [0, 512], sizes = [1, 256], strides = [1, 1]} : vector<1x768xf32> to vector<1x256xf32>
    %256 = vector.extract_strided_slice %238 {offsets = [0, 512], sizes = [1, 256], strides = [1, 1]} : vector<1x768xf32> to vector<1x256xf32>
    %257 = arith.mulf %246, %256 : vector<1x256xf32>
    %258 = arith.addf %255, %257 : vector<1x256xf32>
    %259 = math.tanh %258 : vector<1x256xf32>
    %cst_89 = arith.constant 1.000000e+00 : f32
    %260 = vector.broadcast %cst_89 : f32 to vector<1x256xf32>
    %261 = arith.subf %260, %254 : vector<1x256xf32>
    %262 = arith.mulf %261, %259 : vector<1x256xf32>
    %263 = arith.mulf %254, %229 : vector<1x256xf32>
    %264 = arith.addf %262, %263 : vector<1x256xf32>
    %265 = arith.index_cast %c5_i32_80 : i32 to index
    %c0_90 = arith.constant 0 : index
    %266 = vector.load %arg8[%265, %c0_90] : memref<8x256xf32, #tpu.memory_space<vmem>>, vector<1x256xf32>
    tpu.vector_store %arg8[%265, %c0_90], %264 {strides = array<i32>} : memref<8x256xf32, #tpu.memory_space<vmem>>, vector<1x256xf32>,
    %c6_i32_91 = arith.constant 6 : i32
    %267 = arith.index_cast %c6_i32_91 : i32 to index
    %c0_92 = arith.constant 0 : index
    %268 = vector.load %arg10[%267, %c0_92] : memref<8x768xf32, #tpu.memory_space<vmem>>, vector<1x768xf32>
    %269 = arith.truncf %264 : vector<1x256xf32> to vector<1x256xbf16>
    %c0_93 = arith.constant 0 : index
    %c0_94 = arith.constant 0 : index
    %270 = vector.load %arg5[%c0_93, %c0_94] : memref<256x768xbf16, #tpu.memory_space<vmem>>, vector<256x768xbf16>
    %cst_95 = arith.constant dense<0.000000e+00> : vector<1x768xf32>
    %271 = tpu.matmul %269, %270, %cst_95 {dimension_numbers = #tpu.dot_dimension_numbers<[1], [0], [0], [1], [0, 0, 1, 1], [], []>} : vector<1x256xbf16>, vector<256x768xbf16>, vector<1x768xf32> -> vector<1x768xf32>
    %c0_96 = arith.constant 0 : index
    %c0_97 = arith.constant 0 : index
    %272 = vector.load %arg7[%c0_96, %c0_97] : memref<1x768xf32, #tpu.memory_space<vmem>>, vector<1x768xf32>
    %273 = arith.addf %271, %272 : vector<1x768xf32>
    %274 = vector.extract_strided_slice %268 {offsets = [0, 0], sizes = [1, 256], strides = [1, 1]} : vector<1x768xf32> to vector<1x256xf32>
    %275 = vector.extract_strided_slice %273 {offsets = [0, 0], sizes = [1, 256], strides = [1, 1]} : vector<1x768xf32> to vector<1x256xf32>
    %276 = arith.addf %274, %275 : vector<1x256xf32>
    %277 = arith.negf %276 : vector<1x256xf32>
    %278 = math.exp %277 : vector<1x256xf32>
    %cst_98 = arith.constant 1.000000e+00 : f32
    %279 = vector.broadcast %cst_98 : f32 to vector<1x256xf32>
    %280 = arith.addf %279, %278 : vector<1x256xf32>
    %281 = arith.divf %279, %280 : vector<1x256xf32>
    %282 = vector.extract_strided_slice %268 {offsets = [0, 256], sizes = [1, 256], strides = [1, 1]} : vector<1x768xf32> to vector<1x256xf32>
    %283 = vector.extract_strided_slice %273 {offsets = [0, 256], sizes = [1, 256], strides = [1, 1]} : vector<1x768xf32> to vector<1x256xf32>
    %284 = arith.addf %282, %283 : vector<1x256xf32>
    %285 = arith.negf %284 : vector<1x256xf32>
    %286 = math.exp %285 : vector<1x256xf32>
    %cst_99 = arith.constant 1.000000e+00 : f32
    %287 = vector.broadcast %cst_99 : f32 to vector<1x256xf32>
    %288 = arith.addf %287, %286 : vector<1x256xf32>
    %289 = arith.divf %287, %288 : vector<1x256xf32>
    %290 = vector.extract_strided_slice %268 {offsets = [0, 512], sizes = [1, 256], strides = [1, 1]} : vector<1x768xf32> to vector<1x256xf32>
    %291 = vector.extract_strided_slice %273 {offsets = [0, 512], sizes = [1, 256], strides = [1, 1]} : vector<1x768xf32> to vector<1x256xf32>
    %292 = arith.mulf %281, %291 : vector<1x256xf32>
    %293 = arith.addf %290, %292 : vector<1x256xf32>
    %294 = math.tanh %293 : vector<1x256xf32>
    %cst_100 = arith.constant 1.000000e+00 : f32
    %295 = vector.broadcast %cst_100 : f32 to vector<1x256xf32>
    %296 = arith.subf %295, %289 : vector<1x256xf32>
    %297 = arith.mulf %296, %294 : vector<1x256xf32>
    %298 = arith.mulf %289, %264 : vector<1x256xf32>
    %299 = arith.addf %297, %298 : vector<1x256xf32>
    %300 = arith.index_cast %c6_i32_91 : i32 to index
    %c0_101 = arith.constant 0 : index
    %301 = vector.load %arg8[%300, %c0_101] : memref<8x256xf32, #tpu.memory_space<vmem>>, vector<1x256xf32>
    tpu.vector_store %arg8[%300, %c0_101], %299 {strides = array<i32>} : memref<8x256xf32, #tpu.memory_space<vmem>>, vector<1x256xf32>,
    %c7_i32_102 = arith.constant 7 : i32
    %302 = arith.index_cast %c7_i32_102 : i32 to index
    %c0_103 = arith.constant 0 : index
    %303 = vector.load %arg10[%302, %c0_103] : memref<8x768xf32, #tpu.memory_space<vmem>>, vector<1x768xf32>
    %304 = arith.truncf %299 : vector<1x256xf32> to vector<1x256xbf16>
    %c0_104 = arith.constant 0 : index
    %c0_105 = arith.constant 0 : index
    %305 = vector.load %arg5[%c0_104, %c0_105] : memref<256x768xbf16, #tpu.memory_space<vmem>>, vector<256x768xbf16>
    %cst_106 = arith.constant dense<0.000000e+00> : vector<1x768xf32>
    %306 = tpu.matmul %304, %305, %cst_106 {dimension_numbers = #tpu.dot_dimension_numbers<[1], [0], [0], [1], [0, 0, 1, 1], [], []>} : vector<1x256xbf16>, vector<256x768xbf16>, vector<1x768xf32> -> vector<1x768xf32>
    %c0_107 = arith.constant 0 : index
    %c0_108 = arith.constant 0 : index
    %307 = vector.load %arg7[%c0_107, %c0_108] : memref<1x768xf32, #tpu.memory_space<vmem>>, vector<1x768xf32>
    %308 = arith.addf %306, %307 : vector<1x768xf32>
    %309 = vector.extract_strided_slice %303 {offsets = [0, 0], sizes = [1, 256], strides = [1, 1]} : vector<1x768xf32> to vector<1x256xf32>
    %310 = vector.extract_strided_slice %308 {offsets = [0, 0], sizes = [1, 256], strides = [1, 1]} : vector<1x768xf32> to vector<1x256xf32>
    %311 = arith.addf %309, %310 : vector<1x256xf32>
    %312 = arith.negf %311 : vector<1x256xf32>
    %313 = math.exp %312 : vector<1x256xf32>
    %cst_109 = arith.constant 1.000000e+00 : f32
    %314 = vector.broadcast %cst_109 : f32 to vector<1x256xf32>
    %315 = arith.addf %314, %313 : vector<1x256xf32>
    %316 = arith.divf %314, %315 : vector<1x256xf32>
    %317 = vector.extract_strided_slice %303 {offsets = [0, 256], sizes = [1, 256], strides = [1, 1]} : vector<1x768xf32> to vector<1x256xf32>
    %318 = vector.extract_strided_slice %308 {offsets = [0, 256], sizes = [1, 256], strides = [1, 1]} : vector<1x768xf32> to vector<1x256xf32>
    %319 = arith.addf %317, %318 : vector<1x256xf32>
    %320 = arith.negf %319 : vector<1x256xf32>
    %321 = math.exp %320 : vector<1x256xf32>
    %cst_110 = arith.constant 1.000000e+00 : f32
    %322 = vector.broadcast %cst_110 : f32 to vector<1x256xf32>
    %323 = arith.addf %322, %321 : vector<1x256xf32>
    %324 = arith.divf %322, %323 : vector<1x256xf32>
    %325 = vector.extract_strided_slice %303 {offsets = [0, 512], sizes = [1, 256], strides = [1, 1]} : vector<1x768xf32> to vector<1x256xf32>
    %326 = vector.extract_strided_slice %308 {offsets = [0, 512], sizes = [1, 256], strides = [1, 1]} : vector<1x768xf32> to vector<1x256xf32>
    %327 = arith.mulf %316, %326 : vector<1x256xf32>
    %328 = arith.addf %325, %327 : vector<1x256xf32>
    %329 = math.tanh %328 : vector<1x256xf32>
    %cst_111 = arith.constant 1.000000e+00 : f32
    %330 = vector.broadcast %cst_111 : f32 to vector<1x256xf32>
    %331 = arith.subf %330, %324 : vector<1x256xf32>
    %332 = arith.mulf %331, %329 : vector<1x256xf32>
    %333 = arith.mulf %324, %299 : vector<1x256xf32>
    %334 = arith.addf %332, %333 : vector<1x256xf32>
    %335 = arith.index_cast %c7_i32_102 : i32 to index
    %c0_112 = arith.constant 0 : index
    %336 = vector.load %arg8[%335, %c0_112] : memref<8x256xf32, #tpu.memory_space<vmem>>, vector<1x256xf32>
    tpu.vector_store %arg8[%335, %c0_112], %334 {strides = array<i32>} : memref<8x256xf32, #tpu.memory_space<vmem>>, vector<1x256xf32>,
    %c8_i32_113 = arith.constant 8 : i32
    return
  }
  func.func @transform_0(%arg0: i32, %arg1: memref<8xi32, #tpu.memory_space<smem>>) -> (i32, i32) {
    %c0_i32 = arith.constant 0 : i32
    %c0_i32_0 = arith.constant 0 : i32
    %c0_i32_1 = arith.constant 0 : i32
    return %c0_i32, %c0_i32_0 : i32, i32
  }
  func.func @transform_1(%arg0: i32, %arg1: memref<8xi32, #tpu.memory_space<smem>>) -> (i32, i32) {
    %c0_i32 = arith.constant 0 : i32
    %c0_i32_0 = arith.constant 0 : i32
    %c0_i32_1 = arith.constant 0 : i32
    return %c0_i32, %c0_i32_0 : i32, i32
  }
  func.func @transform_2(%arg0: i32, %arg1: memref<8xi32, #tpu.memory_space<smem>>) -> (i32, i32) {
    %c0_i32 = arith.constant 0 : i32
    %c0_i32_0 = arith.constant 0 : i32
    %c0_i32_1 = arith.constant 0 : i32
    return %c0_i32, %c0_i32_0 : i32, i32
  }
  func.func @transform_3(%arg0: i32, %arg1: memref<8xi32, #tpu.memory_space<smem>>) -> (i32, i32) {
    %c0_i32 = arith.constant 0 : i32
    %c0_i32_0 = arith.constant 0 : i32
    %c0_i32_1 = arith.constant 0 : i32
    return %c0_i32, %c0_i32_0 : i32, i32
  }
  func.func @transform_4(%arg0: i32, %arg1: memref<8xi32, #tpu.memory_space<smem>>) -> (i32, i32) {
    %c0_i32 = arith.constant 0 : i32
    %c0_i32_0 = arith.constant 0 : i32
    %c0_i32_1 = arith.constant 0 : i32
    return %c0_i32, %c0_i32_0 : i32, i32
  }
  func.func @transform_5(%arg0: i32, %arg1: memref<8xi32, #tpu.memory_space<smem>>) -> (i32, i32) {
    %c0_i32 = arith.constant 0 : i32
    %c0_i32_0 = arith.constant 0 : i32
    %c0_i32_1 = arith.constant 0 : i32
    return %c0_i32, %c0_i32_0 : i32, i32
  }
  func.func @transform_6(%arg0: i32, %arg1: memref<8xi32, #tpu.memory_space<smem>>) -> (i32, i32) {
    %c0_i32 = arith.constant 0 : i32
    %c0_i32_0 = arith.constant 0 : i32
    %c0_i32_1 = arith.constant 0 : i32
    return %c0_i32, %c0_i32_0 : i32, i32
  }
}

</mosaic_0001>

<bundles_post_ra>
// kernel: tpu_custom_call.1
= control target key start
LH: loop header
LB: loop body
LE: loop exit
PB: predicated region body
PF: predicated region fallthrough
CT: control target
= control target key end

     0   :  { %s11310_s0 = inlined_call_operand.hbm [shape: s32[8], index: 0, kind: input, shape index: {}]   ;;  %s11311_s1 = inlined_call_operand.hbm [shape: f32[24,256], index: 1, kind: input, shape index: {}]   ;;  %s11312_s2 = inlined_call_operand.vmem [shape: f32[1,256], index: 2, kind: input, shape index: {}]   ;;  %s11313_s3 = inlined_call_operand.hbm [shape: bf16[256,768], index: 3, kind: input, shape index: {}]   ;;  %s11314_s4 = inlined_call_operand.hbm [shape: bf16[256,768], index: 4, kind: input, shape index: {}]   ;;  %s11315_s5 = inlined_call_operand.vmem [shape: f32[1,768], index: 5, kind: input, shape index: {}]   ;;  %s11316_s6 = inlined_call_operand.vmem [shape: f32[1,768], index: 6, kind: input, shape index: {}]   ;;  %s11317_s7 = inlined_call_operand.hbm [shape: f32[8,256], index: 7, kind: output, shape index: {}]  }
   0x1   :  { %s9369_s26 = scalar_lea.hbm %s11310_s0, 16 }
   0x2   :  { %p9370_p0 = scmp.ne.s32.totalorder %s11310_s0, %s9369_s26  ;;  %p9373_p1 = scmp.lt.u32.totalorder %s9369_s26, %s11310_s0 }
   0x4   :  { %p9375_p2 = pnand %p9373_p1, %p9370_p0 }
   0x6   :  { %9378 = shalt.err (!%p9375_p2)  }
   0x7   :  { %s9475_s8 = smov [#allocation5]  }
   0x8   :  { %13 = dma.hbm_to_smem %s11310_s0, 16, %s9475_s8, [#allocation4] }
   0x9   :  { %9467 = dma.done.wait [#allocation4], 16 }
   0xa   :  { %9468 = vsyncadd [#allocation4], 4294967280 }
   0xb   :  { %15 = sfence }
   0xc   :  { %16 = vsyncpa [#allocation7], 0 }
   0xd   :  { %17 = vsyncpa [#allocation10], 0 }
   0xe   :  { %18 = vsyncpa [#allocation8], 0  ;;  %s9476_s11 = smov [#allocation9]   ;;  %s9379_s15 = scalar_lea.hbm %s11313_s3, 12288 }
   0xf   :  { %s38_s12 = sshll.u32 %s9476_s11, 4  ;;  %p9380_p3 = scmp.ne.s32.totalorder %s11313_s3, %s9379_s15  ;;  %s39_s12 = int_to_ptr.vmem [resolvable:$true] %s38_s12 }
  0x10   :  { %p9383_p4 = scmp.lt.u32.totalorder %s9379_s15, %s11313_s3 }
  0x12   :  { %p9385_p5 = pnand %p9383_p4, %p9380_p3 }
  0x14   :  { %9388 = shalt.err (!%p9385_p5)
}
  0x15   :  { %s9389_s0 = scalar_lea.vmem %s39_s12, 12288  ;;  %p9394_p7 = scmp.lt.s32.totalorder %s39_s12, %s39_s12 }
  0x16   :  { %p9390_p6 = scmp.ne.s32.totalorder %s39_s12, %s9389_s0  ;;  %p9395_p8 = scmp.lt.s32.totalorder %s9389_s0, %s9389_s0 }
  0x18   :  { %p9396_p9 = por %p9395_p8, %p9394_p7 }
  0x1a   :  { %p9397_p10 = pnand %p9396_p9, %p9390_p6 }
  0x1c   :  { %9400 = shalt.err (!%p9397_p10)
}
  0x1d   :  { %s9477_s20 = smov 384   ;;  %s9478_s21 = smov 24  }
  0x1e   :  { %44 = dma.hbm_to_vmem [thread:$0]  %s11313_s3, 12288, %s39_s12, [#allocation10], %s9477_s20, %s9477_s20, %s9478_s21  }
  0x1f   :  { %s9479_s24 = smov [#allocation6]   ;;  %s9401_s28 = scalar_lea.hbm %s11311_s1, 768 }
  0x20   :  { %s24_s25 = sshll.u32 %s9479_s24, 4  ;;  %p9402_p11 = scmp.ne.s32.totalorder %s11311_s1, %s9401_s28  ;;  %s25_s25 = int_to_ptr.vmem [resolvable:$true] %s24_s25 }
  0x21   :  { %p9405_p12 = scmp.lt.u32.totalorder %s9401_s28, %s11311_s1 }
  0x23   :  { %p9407_p13 = pnand %p9405_p12, %p9402_p11 }
  0x25   :  { %9410 = shalt.err (!%p9407_p13)
}
  0x26   :  { %s9411_s10 = scalar_lea.vmem %s25_s25, 768  ;;  %p9416_p1 = scmp.lt.s32.totalorder %s25_s25, %s25_s25 }
  0x27   :  { %p9412_p0 = scmp.ne.s32.totalorder %s25_s25, %s9411_s10  ;;  %p9417_p2 = scmp.lt.s32.totalorder %s9411_s10, %s9411_s10 }
  0x29   :  { %p9418_p3 = por %p9417_p2, %p9416_p1 }
  0x2b   :  { %p9419_p4 = pnand %p9418_p3, %p9412_p0 }
  0x2d   :  { %9422 = shalt.err (!%p9419_p4)
}
  0x2e   :  { %s9480_s3 = smov 256   ;;  %s9481_s11 = smov 16  }
  0x2f   :  { %30 = dma.hbm_to_vmem [thread:$0]  %s11311_s1, 768, %s25_s25, [#allocation7], %s9480_s3, %s9480_s3, %s9481_s11  }
  0x30   :  { %s9482_s14 = smov [#allocation11]   ;;  %s9423_s18 = scalar_lea.hbm %s11314_s4, 12288 }
  0x31   :  { %s50_s15 = sshll.u32 %s9482_s14, 4  ;;  %p9424_p5 = scmp.ne.s32.totalorder %s11314_s4, %s9423_s18  ;;  %s51_s15 = int_to_ptr.vmem [resolvable:$true] %s50_s15 }
  0x32   :  { %p9427_p6 = scmp.lt.u32.totalorder %s9423_s18, %s11314_s4 }
  0x34   :  { %p9429_p7 = pnand %p9427_p6, %p9424_p5 }
  0x36   :  { %9432 = shalt.err (!%p9429_p7)
}
  0x37   :  { %s9433_s24 = scalar_lea.vmem %s51_s15, 12288  ;;  %p9438_p9 = scmp.lt.s32.totalorder %s51_s15, %s51_s15 }
  0x38   :  { %p9434_p8 = scmp.ne.s32.totalorder %s51_s15, %s9433_s24  ;;  %p9439_p10 = scmp.lt.s32.totalorder %s9433_s24, %s9433_s24 }
  0x3a   :  { %p9440_p11 = por %p9439_p10, %p9438_p9 }
  0x3c   :  { %p9441_p12 = pnand %p9440_p11, %p9434_p8 }
  0x3e   :  { %9444 = shalt.err (!%p9441_p12)
}
  0x3f   :  { %56 = dma.hbm_to_vmem [thread:$0]  %s11314_s4, 12288, %s51_s15, [#allocation10], %s9477_s20, %s9477_s20, %s9478_s21  }
  0x40   :  { %9469 = dma.done.wait [#allocation7], 768  }
  0x41   :  { %9470 = vsyncadd [#allocation7], 4294966528 }
  0x42   :  { %9471 = dma.done.wait [#allocation10], 24576  }
  0x43   :  { %9472 = vsyncadd [#allocation10], 4294942720  ;;  %v8526_v0 = vld [vmem:[#allocation9 + $0x4] ss:$24 sps:$4 sm:$0xff]   ;;  %v8530_v2 = vld [vmem:[#allocation9] ss:$24 sps:$4 sm:$0xff]   ;;  %v80_v39 = vlaneseq }
  0x44   :  { %v8528_v1 = vld [vmem:[#allocation9 + $0xc] ss:$24 sps:$4 sm:$0xff]   ;;  %789 = vmatprep.subr.bf16.mxu0 %v8526_v0  ;;  %v8531_v3 = vld [vmem:[#allocation9 + $0x8] ss:$24 sps:$4 sm:$0xff]   ;;  %v8534_v5 = vld [vmem:[#allocation9 + $0x3c] ss:$24 sps:$4 sm:$0xff]  }
  0x45   :  { %830 = vmatprep.subr.bf16.mxu1 %v8528_v1  ;;  %v8532_v4 = vld [vmem:[#allocation9 + $0x34] ss:$24 sps:$4 sm:$0xff]   ;;  %790 = vmatpush1.bf16.msra.mxu0 %v8530_v2  ;;  %v8536_v6 = vld [vmem:[#allocation9 + $0x30] ss:$24 sps:$4 sm:$0xff]   ;;  %v8538_v8 = vld [vmem:[#allocation9 + $0x64] ss:$24 sps:$4 sm:$0xff]  }
  0x46   :  { %831 = vmatpush1.bf16.msra.mxu1 %v8531_v3  ;;  %791 = vmatprep.subr.bf16.mxu0 %v8532_v4  ;;  %v8537_v7 = vld [vmem:[#allocation9 + $0x38] ss:$24 sps:$4 sm:$0xff]   ;;  %v8540_v9 = vld [vmem:[#allocation9 + $0x6c] ss:$24 sps:$4 sm:$0xff]   ;;  %v8543_v11 = vld [vmem:[#allocation9 + $0x68] ss:$24 sps:$4 sm:$0xff]  }
  0x47   :  { %832 = vmatprep.subr.bf16.mxu1 %v8534_v5  ;;  %v8542_v10 = vld [vmem:[#allocation9 + $0x60] ss:$24 sps:$4 sm:$0xff]   ;;  %v8544_v12 = vld [vmem:[#allocation9 + $0x94] ss:$24 sps:$4 sm:$0xff]   ;;  %s9579_s4 = sld [smem:[#allocation5]]  ;;  %s9581_s20 = sld [smem:[#allocation5 + $0x1]] }
  0x48   :  { %v8546_v13 = vld [vmem:[#allocation9 + $0x9c] ss:$24 sps:$4 sm:$0xff]   ;;  %v8548_v14 = vld [vmem:[#allocation9 + $0x90] ss:$24 sps:$4 sm:$0xff]   ;;  %v8552_v17 = vld [vmem:[#allocation9 + $0xcc] ss:$24 sps:$4 sm:$0xff]  }
  0x49   :  { %792 = vmatpush1.bf16.msra.mxu0 %v8536_v6  ;;  %v8549_v15 = vld [vmem:[#allocation9 + $0x98] ss:$24 sps:$4 sm:$0xff]   ;;  %v8550_v16 = vld [vmem:[#allocation9 + $0xc4] ss:$24 sps:$4 sm:$0xff]   ;;  %v8555_v19 = vld [vmem:[#allocation9 + $0xc8] ss:$24 sps:$4 sm:$0xff]  }
  0x4a   :  { %833 = vmatpush1.bf16.msra.mxu1 %v8537_v7  ;;  %793 = vmatprep.subr.bf16.mxu0 %v8538_v8  ;;  %v8554_v18 = vld [vmem:[#allocation9 + $0xc0] ss:$24 sps:$4 sm:$0xff]   ;;  %s9583_s21 = sld [smem:[#allocation5 + $0x2]]  ;;  %v8556_v20 = vld [vmem:[#allocation9 + $0xf4] ss:$24 sps:$4 sm:$0xff]   ;;  %s9585_s26 = sld [smem:[#allocation5 + $0x3]] }
  0x4b   :  { %834 = vmatprep.subr.bf16.mxu1 %v8540_v9  ;;  %v8558_v21 = vld [vmem:[#allocation9 + $0xfc] ss:$24 sps:$4 sm:$0xff]   ;;  %s9589_s29 = sld [smem:[#allocation5 + $0x4]]  ;;  %v8560_v22 = vld [vmem:[#allocation9 + $0xf0] ss:$24 sps:$4 sm:$0xff]   ;;  %s9595_s11 = sld [smem:[#allocation5 + $0x5]] }
  0x4c   :  { %v8561_v23 = vld [vmem:[#allocation9 + $0xf8] ss:$24 sps:$4 sm:$0xff]   ;;  %v8562_v24 = vld [vmem:[#allocation9 + $0x124] ss:$24 sps:$4 sm:$0xff]   ;;  %v8567_v27 = vld [vmem:[#allocation9 + $0x128] ss:$24 sps:$4 sm:$0xff]  }
  0x4d   :  { %794 = vmatpush1.bf16.msra.mxu0 %v8542_v10  ;;  %s71_s27 = sshra.s32 %s9579_s4, 3  ;;  %s87_s28 = sshra.s32 %s9581_s20, 3  ;;  %v8564_v25 = vld [vmem:[#allocation9 + $0x12c] ss:$24 sps:$4 sm:$0xff]   ;;  %v8566_v26 = vld [vmem:[#allocation9 + $0x120] ss:$24 sps:$4 sm:$0xff]  }
  0x4e   :  { %835 = vmatpush1.bf16.msra.mxu1 %v8543_v11  ;;  %795 = vmatprep.subr.bf16.mxu0 %v8544_v12  ;;  %s74_s30 = sand.u32 7, %s9579_s4  ;;  %s8508_s8 = sshll.u32 %s71_s27, 4  ;;  %v8568_v28 = vld [vmem:[#allocation9 + $0x154] ss:$24 sps:$4 sm:$0xff]   ;;  %v8572_v30 = vld [vmem:[#allocation9 + $0x150] ss:$24 sps:$4 sm:$0xff]  }
  0x4f   :  { %836 = vmatprep.subr.bf16.mxu1 %v8546_v13  ;;  %s90_s9 = sand.u32 7, %s9581_s20  ;;  %s8509_s10 = sshll.u32 %s87_s28, 4  ;;  %v8570_v29 = vld [vmem:[#allocation9 + $0x15c] ss:$24 sps:$4 sm:$0xff]   ;;  %v8573_v31 = vld [vmem:[#allocation9 + $0x158] ss:$24 sps:$4 sm:$0xff]  }
  0x50   :  { %s9593_s3 = sadd.s32 %s8508_s8, %s74_s30  ;;  %s9597_s12 = sadd.s32 %s8509_s10, %s90_s9  ;;  %v8574_v32 = vld [vmem:[#allocation9 + $0x184] ss:$24 sps:$4 sm:$0xff]   ;;  %v8578_v34 = vld [vmem:[#allocation9 + $0x180] ss:$24 sps:$4 sm:$0xff]   ;;  %v8580_v36 = vld [vmem:[#allocation9 + $0x1b4] ss:$24 sps:$4 sm:$0xff]  }
  0x51   :  { %796 = vmatpush1.bf16.msra.mxu0 %v8548_v14  ;;  %s9599_s13 = sld [smem:[#allocation5 + $0x6]]  ;;  %s9601_s14 = sld [smem:[#allocation5 + $0x7]]  ;;  %v8576_v33 = vld [vmem:[#allocation9 + $0x18c] ss:$24 sps:$4 sm:$0xff]   ;;  %v8579_v35 = vld [vmem:[#allocation9 + $0x188] ss:$24 sps:$4 sm:$0xff]  }
  0x52   :  { %837 = vmatpush1.bf16.msra.mxu1 %v8549_v15  ;;  %797 = vmatprep.subr.bf16.mxu0 %v8550_v16  ;;  %s100_s15 = sshra.s32 %s9583_s21, 3  ;;  %s113_s16 = sshra.s32 %s9585_s26, 3  ;;  %v8582_v37 = vld [vmem:[#allocation9 + $0x1bc] ss:$24 sps:$4 sm:$0xff]   ;;  %v8584_v38 = vld [vmem:[#allocation9 + $0x1b0] ss:$24 sps:$4 sm:$0xff]  }
  0x53   :  { %838 = vmatprep.subr.bf16.mxu1 %v8552_v17  ;;  %s103_s17 = sand.u32 7, %s9583_s21  ;;  %s8510_s18 = sshll.u32 %s100_s15, 4  ;;  %v8585_v40 = vld [vmem:[#allocation9 + $0x1b8] ss:$24 sps:$4 sm:$0xff]   ;;  %v8586_v41 = vld [vmem:[#allocation9 + $0x1e4] ss:$24 sps:$4 sm:$0xff]  }
  0x54   :  { %s126_s19 = sshra.s32 %s9589_s29, 3  ;;  %s116_s0 = sand.u32 7, %s9585_s26  ;;  %v8588_v42 = vld [vmem:[#allocation9 + $0x1ec] ss:$24 sps:$4 sm:$0xff]   ;;  %v8590_v43 = vld [vmem:[#allocation9 + $0x1e0] ss:$24 sps:$4 sm:$0xff]  }
  0x55   :  { %798 = vmatpush1.bf16.msra.mxu0 %v8554_v18  ;;  %s9608_s22 = sshll.u32 %s113_s16, 4  ;;  %s129_s23 = sand.u32 7, %s9589_s29  ;;  %v8591_v44 = vld [vmem:[#allocation9 + $0x1e8] ss:$24 sps:$4 sm:$0xff]   ;;  %vm9633_vm0 = vcmp.lt.s32.totalorder %v80_v39, 256 }
  0x56   :  { %839 = vmatpush1.bf16.msra.mxu1 %v8555_v19  ;;  %799 = vmatprep.subr.bf16.mxu0 %v8556_v20  ;;  %s139_s24 = sshra.s32 %s9595_s11, 3  ;;  %s8512_s1 = sshll.u32 %s126_s19, 4  ;;  %v8592_v46 = vld [vmem:[#allocation9 + $0x214] ss:$24 sps:$4 sm:$0xff]   ;;  %v8596_v48 = vld [vmem:[#allocation9 + $0x210] ss:$24 sps:$4 sm:$0xff]  }
  0x57   :  { %840 = vmatprep.subr.bf16.mxu1 %v8558_v21  ;;  %s152_s25 = sshra.s32 %s9599_s13, 3  ;;  %s142_s4 = sand.u32 7, %s9595_s11  ;;  %v8594_v47 = vld [vmem:[#allocation9 + $0x21c] ss:$24 sps:$4 sm:$0xff]   ;;  %v8597_v49 = vld [vmem:[#allocation9 + $0x218] ss:$24 sps:$4 sm:$0xff]  }
  0x58   :  { %s165_s20 = sshra.s32 %s9601_s14, 3  ;;  %s8513_s27 = sshll.u32 %s139_s24, 4  ;;  %v8598_v50 = vld [vmem:[#allocation9 + $0x244] ss:$24 sps:$4 sm:$0xff]   ;;  %v8602_v60 = vld [vmem:[#allocation9 + $0x240] ss:$24 sps:$4 sm:$0xff]  }
  0x59   :  { %800 = vmatpush1.bf16.msra.mxu0 %v8560_v22  ;;  %s155_s28 = sand.u32 7, %s9599_s13  ;;  %s8514_s29 = sshll.u32 %s152_s25, 4  ;;  %v8600_v51 = vld [vmem:[#allocation9 + $0x24c] ss:$24 sps:$4 sm:$0xff]   ;;  %v8603_v61 = vld [vmem:[#allocation9 + $0x248] ss:$24 sps:$4 sm:$0xff]  }
  0x5a   :  { %841 = vmatpush1.bf16.msra.mxu1 %v8561_v23  ;;  %801 = vmatprep.subr.bf16.mxu0 %v8562_v24  ;;  %s168_s30 = sand.u32 7, %s9601_s14  ;;  %s9619_s8 = sadd.s32 %s8510_s18, %s103_s17  ;;  %v8604_v62 = vld [vmem:[#allocation9 + $0x274] ss:$24 sps:$4 sm:$0xff]   ;;  %v8608_v0 = vld [vmem:[#allocation9 + $0x270] ss:$24 sps:$4 sm:$0xff]  }
  0x5b   :  { %842 = vmatprep.subr.bf16.mxu1 %v8564_v25  ;;  %s8515_s9 = sshll.u32 %s165_s20, 4  ;;  %s9624_s10 = sadd.s32 %s9608_s22, %s116_s0  ;;  %v8606_v63 = vld [vmem:[#allocation9 + $0x27c] ss:$24 sps:$4 sm:$0xff]   ;;  %v8609_v1 = vld [vmem:[#allocation9 + $0x278] ss:$24 sps:$4 sm:$0xff]  }
  0x5c   :  { %s9626_s11 = sadd.s32 %s8512_s1, %s129_s23  ;;  %s9628_s13 = sadd.s32 %s8513_s27, %s142_s4  ;;  %v8610_v2 = vld [vmem:[#allocation9 + $0x2a4] ss:$24 sps:$4 sm:$0xff]   ;;  %v8614_v6 = vld [vmem:[#allocation9 + $0x2a0] ss:$24 sps:$4 sm:$0xff]   ;;  %v8616_v8 = vld [vmem:[#allocation9 + $0x2d4] ss:$24 sps:$4 sm:$0xff]  }
  0x5d   :  { %802 = vmatpush1.bf16.msra.mxu0 %v8566_v26  ;;  %s9630_s14 = sadd.s32 %s8514_s29, %s155_s28  ;;  %s9637_s21 = sadd.s32 %s8515_s9, %s168_s30  ;;  %v8612_v3 = vld [vmem:[#allocation9 + $0x2ac] ss:$24 sps:$4 sm:$0xff]   ;;  %v8615_v7 = vld [vmem:[#allocation9 + $0x2a8] ss:$24 sps:$4 sm:$0xff]   ;;  %v8618_v9 = vld [vmem:[#allocation9 + $0x2dc] ss:$24 sps:$4 sm:$0xff]  }
  0x5e   :  { %843 = vmatpush1.bf16.msra.mxu1 %v8567_v27  ;;  %803 = vmatprep.subr.bf16.mxu0 %v8568_v28  ;;  %s78_s26 = scalar_lea.vmem [#allocation6], %s9593_s3  ;;  %s94_s15 = scalar_lea.vmem [#allocation6], %s9597_s12  ;;  %v8620_v10 = vld [vmem:[#allocation9 + $0x2d0] ss:$24 sps:$4 sm:$0xff]   ;;  %v8624_v13 = vld [vmem:[#allocation9 + $0x14] ss:$24 sps:$4 sm:$0xff]  }
  0x5f   :  { %844 = vmatprep.subr.bf16.mxu1 %v8570_v29  ;;  %v79_v52 = vld [vmem:[%s78_s26] ss:$8 sm:$0x3]  ;;  %s107_s16 = scalar_lea.vmem [#allocation6], %s9619_s8  ;;  %s120_s17 = scalar_lea.vmem [#allocation6], %s9624_s10 }
  0x60   :  { %v95_v53 = vld [vmem:[%s94_s15] ss:$8 sm:$0x3]  ;;  %84 = vst.msk [vmem:[#allocation2] ss:$8 sm:$0x3] %vm9633_vm0, %v79_v52 }
  0x61   :  { %804 = vmatpush1.bf16.msra.mxu0 %v8572_v30  ;;  %97 = vst.msk [vmem:[#allocation2 + $0x1] ss:$8 sm:$0x3] %vm9633_vm0, %v95_v53  ;;  %v108_v54 = vld [vmem:[%s107_s16] ss:$8 sm:$0x3] }
  0x62   :  { %845 = vmatpush1.bf16.msra.mxu1 %v8573_v31  ;;  %805 = vmatprep.subr.bf16.mxu0 %v8574_v32  ;;  %v121_v55 = vld [vmem:[%s120_s17] ss:$8 sm:$0x3]  ;;  %110 = vst.msk [vmem:[#allocation2 + $0x2] ss:$8 sm:$0x3] %vm9633_vm0, %v108_v54 }
  0x63   :  { %846 = vmatprep.subr.bf16.mxu1 %v8576_v33  ;;  %123 = vst.msk [vmem:[#allocation2 + $0x3] ss:$8 sm:$0x3] %vm9633_vm0, %v121_v55  ;;  %s133_s3 = scalar_lea.vmem [#allocation6], %s9626_s11  ;;  %s146_s12 = scalar_lea.vmem [#allocation6], %s9628_s13 }
  0x64   :  { %v134_v56 = vld [vmem:[%s133_s3] ss:$8 sm:$0x3]  ;;  %s159_s18 = scalar_lea.vmem [#allocation6], %s9630_s14  ;;  %s172_s19 = scalar_lea.vmem [#allocation6], %s9637_s21 }
  0x65   :  { %806 = vmatpush1.bf16.msra.mxu0 %v8578_v34  ;;  %v147_v57 = vld [vmem:[%s146_s12] ss:$8 sm:$0x3]  ;;  %136 = vst.msk [vmem:[#allocation2 + $0x4] ss:$8 sm:$0x3] %vm9633_vm0, %v134_v56 }
  0x66   :  { %847 = vmatpush1.bf16.msra.mxu1 %v8579_v35  ;;  %807 = vmatprep.subr.bf16.mxu0 %v8580_v36  ;;  %149 = vst.msk [vmem:[#allocation2 + $0x5] ss:$8 sm:$0x3] %vm9633_vm0, %v147_v57  ;;  %v160_v58 = vld [vmem:[%s159_s18] ss:$8 sm:$0x3] }
  0x67   :  { %848 = vmatprep.subr.bf16.mxu1 %v8582_v37  ;;  %v173_v59 = vld [vmem:[%s172_s19] ss:$8 sm:$0x3]  ;;  %162 = vst.msk [vmem:[#allocation2 + $0x6] ss:$8 sm:$0x3] %vm9633_vm0, %v160_v58 }
  0x68   :  { %175 = vst.msk [vmem:[#allocation2 + $0x7] ss:$8 sm:$0x3] %vm9633_vm0, %v173_v59  ;;  %v8621_v11 = vld [vmem:[#allocation9 + $0x2d8] ss:$24 sps:$4 sm:$0xff]   ;;  %v9668_v36 = vshrl.u32 %v80_v39, 7 }
  0x69   :  { %808 = vmatpush1.bf16.msra.mxu0 %v8584_v38  ;;  %v8627_v14 = vld [vmem:[#allocation11 + $0x4] ss:$24 sps:$4 sm:$0xff]   ;;  %v8622_v16 = vld [vmem:[#allocation9 + $0x10] ss:$24 sps:$4 sm:$0xff]   ;;  %v8625_v17 = vld [vmem:[#allocation11] ss:$24 sps:$4 sm:$0xff]  }
  0x6a   :  { %849 = vmatpush1.bf16.msra.mxu1 %v8585_v40  ;;  %809 = vmatprep.subr.bf16.mxu0 %v8586_v41  ;;  %v8630_v18 = vld [vmem:[#allocation9 + $0x44] ss:$24 sps:$4 sm:$0xff]   ;;  %v8633_v19 = vld [vmem:[#allocation11 + $0x34] ss:$24 sps:$4 sm:$0xff]   ;;  %v8628_v20 = vld [vmem:[#allocation9 + $0x40] ss:$24 sps:$4 sm:$0xff]  }
  0x6b   :  { %850 = vmatprep.subr.bf16.mxu1 %v8588_v42  ;;  %v8631_v21 = vld [vmem:[#allocation11 + $0x30] ss:$24 sps:$4 sm:$0xff]   ;;  %v8636_v22 = vld [vmem:[#allocation9 + $0x74] ss:$24 sps:$4 sm:$0xff]   ;;  %v8639_v23 = vld [vmem:[#allocation11 + $0x64] ss:$24 sps:$4 sm:$0xff]  }
  0x6c   :  { %v8634_v24 = vld [vmem:[#allocation9 + $0x70] ss:$24 sps:$4 sm:$0xff]   ;;  %v8637_v25 = vld [vmem:[#allocation11 + $0x60] ss:$24 sps:$4 sm:$0xff]   ;;  %v8642_v26 = vld [vmem:[#allocation9 + $0xa4] ss:$24 sps:$4 sm:$0xff]  }
  0x6d   :  { %810 = vmatpush1.bf16.msra.mxu0 %v8590_v43  ;;  %v8645_v27 = vld [vmem:[#allocation11 + $0x94] ss:$24 sps:$4 sm:$0xff]   ;;  %v8640_v28 = vld [vmem:[#allocation9 + $0xa0] ss:$24 sps:$4 sm:$0xff]   ;;  %v8643_v29 = vld [vmem:[#allocation11 + $0x90] ss:$24 sps:$4 sm:$0xff]  }
  0x6e   :  { %851 = vmatpush1.bf16.msra.mxu1 %v8591_v44  ;;  %811 = vmatprep.subr.bf16.mxu0 %v8592_v46  ;;  %v8648_v30 = vld [vmem:[#allocation9 + $0xd4] ss:$24 sps:$4 sm:$0xff]   ;;  %v8651_v31 = vld [vmem:[#allocation11 + $0xc4] ss:$24 sps:$4 sm:$0xff]   ;;  %v8646_v32 = vld [vmem:[#allocation9 + $0xd0] ss:$24 sps:$4 sm:$0xff]  }
  0x6f   :  { %852 = vmatprep.subr.bf16.mxu1 %v8594_v47  ;;  %v178_v4 = vld [vmem:[#allocation2 + $0x8] sm:$0xff]  ;;  %v177_v12 = vld [vmem:[#allocation2] sm:$0xff]  ;;  %v9671_v42 = vsub.s32 1, %v9668_v36 }
  0x70   :  { %v180_v5 = vpack.c.bf16 %v178_v4, %v178_v4  ;;  %v9663_v15 = vpack.c.bf16 %v177_v12, %v177_v12  ;;  %v8649_v33 = vld [vmem:[#allocation11 + $0xc0] ss:$24 sps:$4 sm:$0xff]   ;;  %v8654_v34 = vld [vmem:[#allocation9 + $0x104] ss:$24 sps:$4 sm:$0xff]   ;;  %v8657_v35 = vld [vmem:[#allocation11 + $0xf4] ss:$24 sps:$4 sm:$0xff]  }
  0x71   :  { %812 = vmatpush1.bf16.msra.mxu0 %v8596_v48  ;;  %v8652_v37 = vld [vmem:[#allocation9 + $0x100] ss:$24 sps:$4 sm:$0xff]   ;;  %v8655_v38 = vld [vmem:[#allocation11 + $0xf0] ss:$24 sps:$4 sm:$0xff]   ;;  %v8660_v40 = vld [vmem:[#allocation9 + $0x134] ss:$24 sps:$4 sm:$0xff]  }
  0x72   :  { %853 = vmatpush1.bf16.msra.mxu1 %v8597_v49  ;;  %813 = vmatprep.subr.bf16.mxu0 %v8598_v50  ;;  %v8663_v41 = vld [vmem:[#allocation11 + $0x124] ss:$24 sps:$4 sm:$0xff]   ;;  %v8658_v43 = vld [vmem:[#allocation9 + $0x130] ss:$24 sps:$4 sm:$0xff]   ;;  %v8661_v44 = vld [vmem:[#allocation11 + $0x120] ss:$24 sps:$4 sm:$0xff]  }
  0x73   :  { %854 = vmatprep.subr.bf16.mxu1 %v8600_v51  ;;  %821 = vmatprep.mubr.bf16.mxu0 %v180_v5  ;;  %v8666_v46 = vld [vmem:[#allocation9 + $0x164] ss:$24 sps:$4 sm:$0xff]   ;;  %v8669_v39 = vld [vmem:[#allocation11 + $0x154] ss:$24 sps:$4 sm:$0xff]   ;;  %v9676_v47 = vld [vmem:[%s11312_s2] sm:$0x3] }
  0x74   :  { %862 = vmatprep.mubr.bf16.mxu1 %v180_v5  ;;  %v8664_v48 = vld [vmem:[#allocation9 + $0x160] ss:$24 sps:$4 sm:$0xff]   ;;  %v930_v49 = vrot.slane %v9676_v47, %v9671_v42  ;;  %v8667_v50 = vld [vmem:[#allocation11 + $0x150] ss:$24 sps:$4 sm:$0xff]   ;;  %v8672_v51 = vld [vmem:[#allocation9 + $0x194] ss:$24 sps:$4 sm:$0xff]  }
  0x75   :  { %814 = vmatpush1.bf16.msra.mxu0 %v8602_v60  ;;  %v8675_v52 = vld [vmem:[#allocation11 + $0x184] ss:$24 sps:$4 sm:$0xff]   ;;  %v8670_v54 = vld [vmem:[#allocation9 + $0x190] ss:$24 sps:$4 sm:$0xff]   ;;  %v8673_v55 = vld [vmem:[#allocation11 + $0x180] ss:$24 sps:$4 sm:$0xff]  }
  0x76   :  { %855 = vmatpush1.bf16.msra.mxu1 %v8603_v61  ;;  %815 = vmatprep.subr.bf16.mxu0 %v8604_v62  ;;  %v9680_v53 = vpack.c.bf16 %v930_v49, %v930_v49  ;;  %v8678_v56 = vld [vmem:[#allocation9 + $0x1c4] ss:$24 sps:$4 sm:$0xff]   ;;  %v8681_v57 = vld [vmem:[#allocation11 + $0x1b4] ss:$24 sps:$4 sm:$0xff]   ;;  %v8676_v58 = vld [vmem:[#allocation9 + $0x1c0] ss:$24 sps:$4 sm:$0xff]  }
  0x77   :  { %856 = vmatprep.subr.bf16.mxu1 %v8606_v63  ;;  %v8679_v59 = vld [vmem:[#allocation11 + $0x1b0] ss:$24 sps:$4 sm:$0xff]   ;;  %v8684_v60 = vld [vmem:[#allocation9 + $0x1f4] ss:$24 sps:$4 sm:$0xff]   ;;  %v8687_v61 = vld [vmem:[#allocation11 + $0x1e4] ss:$24 sps:$4 sm:$0xff]  }
  0x78   :  { %v8682_v62 = vld [vmem:[#allocation9 + $0x1f0] ss:$24 sps:$4 sm:$0xff]   ;;  %v8685_v63 = vld [vmem:[#allocation11 + $0x1e0] ss:$24 sps:$4 sm:$0xff]   ;;  %v8696_v4 = vld [vmem:[#allocation9 + $0x254] ss:$24 sps:$4 sm:$0xff]  }
  0x79   :  { %816 = vmatpush1.bf16.msra.mxu0 %v8608_v0  ;;  %v8690_v0 = vld [vmem:[#allocation9 + $0x224] ss:$24 sps:$4 sm:$0xff]   ;;  %v8708_v12 = vld [vmem:[#allocation9 + $0x2b4] ss:$24 sps:$4 sm:$0xff]   ;;  %v8751_v49 = vld [vmem:[#allocation11 + $0x100] ss:$24 sps:$4 sm:$0xff]  }
  0x7a   :  { %857 = vmatpush1.bf16.msra.mxu1 %v8609_v1  ;;  %817 = vmatprep.subr.bf16.mxu0 %v8610_v2  ;;  %v8693_v1 = vld [vmem:[#allocation11 + $0x214] ss:$24 sps:$4 sm:$0xff]   ;;  %v8688_v2 = vld [vmem:[#allocation9 + $0x220] ss:$24 sps:$4 sm:$0xff]  }
  0x7b   :  { %858 = vmatprep.subr.bf16.mxu1 %v8612_v3  ;;  %v8691_v3 = vld [vmem:[#allocation11 + $0x210] ss:$24 sps:$4 sm:$0xff]  }
  0x7d   :  { %818 = vmatpush1.bf16.msra.mxu0 %v8614_v6  ;;  %v8694_v6 = vld [vmem:[#allocation9 + $0x250] ss:$24 sps:$4 sm:$0xff]  }
  0x7e   :  { %859 = vmatpush1.bf16.msra.mxu1 %v8615_v7  ;;  %819 = vmatprep.subr.bf16.mxu0 %v8616_v8  ;;  %v8697_v7 = vld [vmem:[#allocation11 + $0x240] ss:$24 sps:$4 sm:$0xff]   ;;  %v8702_v8 = vld [vmem:[#allocation9 + $0x284] ss:$24 sps:$4 sm:$0xff]  }
  0x7f   :  { %860 = vmatprep.subr.bf16.mxu1 %v8618_v9  ;;  %v8705_v9 = vld [vmem:[#allocation11 + $0x274] ss:$24 sps:$4 sm:$0xff]  }
  0x81   :  { %820 = vmatpush1.bf16.msra.mxu0 %v8620_v10  ;;  %v8700_v10 = vld [vmem:[#allocation9 + $0x280] ss:$24 sps:$4 sm:$0xff]  }
  0x82   :  { %861 = vmatpush1.bf16.msra.mxu1 %v8621_v11  ;;  %871 = vmatprep.subr.bf16.mxu0 %v8624_v13  ;;  %v8703_v11 = vld [vmem:[#allocation11 + $0x270] ss:$24 sps:$4 sm:$0xff]   ;;  %v8711_v13 = vld [vmem:[#allocation11 + $0x2a4] ss:$24 sps:$4 sm:$0xff]  }
  0x83   :  { %1543 = vmatprep.subr.bf16.mxu1 %v8627_v14  ;;  %v9684_v14 = vsub.s32 0, %v9668_v36 }
  0x84   :  { %822 = vmatmul.mubr.bf16.vlgmr.msra.gmra.mrb[0].mxu0 %v9663_v15 }
  0x85   :  { %863 = vmatmul.mubr.bf16.vlgmr.msra.gmra.mrb[0].mxu1 %v9663_v15  ;;  %872 = vmatpush1.bf16.msra.mxu0 %v8622_v16  ;;  %v8706_v16 = vld [vmem:[#allocation9 + $0x2b0] ss:$24 sps:$4 sm:$0xff]  }
  0x86   :  { %1544 = vmatpush1.bf16.msra.mxu1 %v8625_v17  ;;  %873 = vmatprep.subr.bf16.mxu0 %v8630_v18  ;;  %v8709_v17 = vld [vmem:[#allocation11 + $0x2a0] ss:$24 sps:$4 sm:$0xff]   ;;  %v8714_v18 = vld [vmem:[#allocation9 + $0x2e4] ss:$24 sps:$4 sm:$0xff]  }
  0x87   :  { %1545 = vmatprep.subr.bf16.mxu1 %v8633_v19  ;;  %903 = vmatprep.mubr.bf16.mxu0 %v180_v5  ;;  %v8699_v5 = vld [vmem:[#allocation11 + $0x244] ss:$24 sps:$4 sm:$0xff]   ;;  %v9686_v19 = vld [vmem:[#allocation11 + $0x2d4] ss:$24 sps:$4 sm:$0xff]  }
  0x88   :  { %1575 = vmatprep.mubr.bf16.mxu1 %v9680_v53 }
  0x89   :  { %874 = vmatpush1.bf16.msra.mxu0 %v8628_v20  ;;  %v8712_v20 = vld [vmem:[#allocation9 + $0x2e0] ss:$24 sps:$4 sm:$0xff]  }
  0x8a   :  { %1546 = vmatpush1.bf16.msra.mxu1 %v8631_v21  ;;  %875 = vmatprep.subr.bf16.mxu0 %v8636_v22  ;;  %v926_v21 = vrot.slane %v9676_v47, %v9684_v14  ;;  %v9690_v22 = vld [vmem:[#allocation11 + $0x2d0] ss:$24 sps:$4 sm:$0xff]   ;;  %v8753_v47 = vld [vmem:[#allocation11 + $0x104] ss:$24 sps:$4 sm:$0xff]  }
  0x8b   :  { %1547 = vmatprep.subr.bf16.mxu1 %v8639_v23  ;;  %v9692_v23 = vld [vmem:[#allocation11 + $0xc] ss:$24 sps:$4 sm:$0xff]  }
  0x8d   :  { %876 = vmatpush1.bf16.msra.mxu0 %v8634_v24  ;;  %v9695_v24 = vld [vmem:[#allocation11 + $0x14] ss:$24 sps:$4 sm:$0xff]  }
  0x8e   :  { %1548 = vmatpush1.bf16.msra.mxu1 %v8637_v25  ;;  %877 = vmatprep.subr.bf16.mxu0 %v8642_v26  ;;  %v9697_v25 = vld [vmem:[#allocation11 + $0x8] ss:$24 sps:$4 sm:$0xff]   ;;  %v9699_v26 = vpack.c.bf16 %v926_v21, %v926_v21  ;;  %v9826_v21 = vld [vmem:[#allocation11 + $0x2ac] ss:$24 sps:$4 sm:$0xff]  }
  0x8f   :  { %1549 = vmatprep.subr.bf16.mxu1 %v8645_v27  ;;  %v8721_v27 = vld [vmem:[#allocation11 + $0x10] ss:$24 sps:$4 sm:$0xff]  }
  0x91   :  { %878 = vmatpush1.bf16.msra.mxu0 %v8640_v28  ;;  %v9702_v28 = vld [vmem:[#allocation11 + $0x3c] ss:$24 sps:$4 sm:$0xff]  }
  0x92   :  { %1550 = vmatpush1.bf16.msra.mxu1 %v8643_v29  ;;  %879 = vmatprep.subr.bf16.mxu0 %v8648_v30  ;;  %v8729_v29 = vld [vmem:[#allocation11 + $0x44] ss:$24 sps:$4 sm:$0xff]   ;;  %v9708_v30 = vld [vmem:[#allocation11 + $0x38] ss:$24 sps:$4 sm:$0xff]  }
  0x93   :  { %1551 = vmatprep.subr.bf16.mxu1 %v8651_v31  ;;  %v8727_v31 = vld [vmem:[#allocation11 + $0x40] ss:$24 sps:$4 sm:$0xff]  }
  0x95   :  { %880 = vmatpush1.bf16.msra.mxu0 %v8646_v32  ;;  %v9711_v32 = vld [vmem:[#allocation11 + $0x6c] ss:$24 sps:$4 sm:$0xff]  }
  0x96   :  { %1552 = vmatpush1.bf16.msra.mxu1 %v8649_v33  ;;  %881 = vmatprep.subr.bf16.mxu0 %v8654_v34  ;;  %v8735_v33 = vld [vmem:[#allocation11 + $0x74] ss:$24 sps:$4 sm:$0xff]   ;;  %v9714_v34 = vld [vmem:[#allocation11 + $0x68] ss:$24 sps:$4 sm:$0xff]  }
  0x97   :  { %1553 = vmatprep.subr.bf16.mxu1 %v8657_v35  ;;  %v8733_v35 = vld [vmem:[#allocation11 + $0x70] ss:$24 sps:$4 sm:$0xff]  }
  0x99   :  { %882 = vmatpush1.bf16.msra.mxu0 %v8652_v37  ;;  %v8741_v37 = vld [vmem:[#allocation11 + $0xa4] ss:$24 sps:$4 sm:$0xff]  }
  0x9a   :  { %1554 = vmatpush1.bf16.msra.mxu1 %v8655_v38  ;;  %883 = vmatprep.subr.bf16.mxu0 %v8660_v40  ;;  %v9722_v38 = vld [vmem:[#allocation11 + $0x98] ss:$24 sps:$4 sm:$0xff]  }
  0x9b   :  { %1555 = vmatprep.subr.bf16.mxu1 %v8663_v41  ;;  %v8739_v40 = vld [vmem:[#allocation11 + $0xa0] ss:$24 sps:$4 sm:$0xff]   ;;  %v9724_v41 = vld [vmem:[#allocation11 + $0xcc] ss:$24 sps:$4 sm:$0xff]  }
  0x9d   :  { %884 = vmatpush1.bf16.msra.mxu0 %v8658_v43  ;;  %v8747_v43 = vld [vmem:[#allocation11 + $0xd4] ss:$24 sps:$4 sm:$0xff]  }
  0x9e   :  { %1556 = vmatpush1.bf16.msra.mxu1 %v8661_v44  ;;  %885 = vmatprep.subr.bf16.mxu0 %v8666_v46  ;;  %v9728_v44 = vld [vmem:[#allocation11 + $0xc8] ss:$24 sps:$4 sm:$0xff]  }
  0x9f   :  { %1557 = vmatprep.subr.bf16.mxu1 %v8669_v39  ;;  %v8745_v46 = vld [vmem:[#allocation11 + $0xd0] ss:$24 sps:$4 sm:$0xff]   ;;  %v9730_v39 = vld [vmem:[#allocation11 + $0xfc] ss:$24 sps:$4 sm:$0xff]  }
  0xa1   :  { %886 = vmatpush1.bf16.msra.mxu0 %v8664_v48  ;;  %v9734_v48 = vld [vmem:[#allocation11 + $0xf8] ss:$24 sps:$4 sm:$0xff]  }
  0xa2   :  { %1558 = vmatpush1.bf16.msra.mxu1 %v8667_v50  ;;  %887 = vmatprep.subr.bf16.mxu0 %v8672_v51  ;;  %v9736_v50 = vld [vmem:[#allocation11 + $0x12c] ss:$24 sps:$4 sm:$0xff]  }
  0xa3   :  { %1559 = vmatprep.subr.bf16.mxu1 %v8675_v52  ;;  %v8759_v51 = vld [vmem:[#allocation11 + $0x134] ss:$24 sps:$4 sm:$0xff]   ;;  %v9740_v52 = vld [vmem:[#allocation11 + $0x128] ss:$24 sps:$4 sm:$0xff]  }
  0xa5   :  { %888 = vmatpush1.bf16.msra.mxu0 %v8670_v54  ;;  %v9744_v54 = vld [vmem:[#allocation11 + $0x15c] ss:$24 sps:$4 sm:$0xff]  }
  0xa6   :  { %1560 = vmatpush1.bf16.msra.mxu1 %v8673_v55  ;;  %889 = vmatprep.subr.bf16.mxu0 %v8678_v56  ;;  %v9746_v55 = vld [vmem:[#allocation11 + $0x164] ss:$24 sps:$4 sm:$0xff]   ;;  %v9750_v56 = vld [vmem:[#allocation11 + $0x158] ss:$24 sps:$4 sm:$0xff]  }
  0xa7   :  { %1561 = vmatprep.subr.bf16.mxu1 %v8681_v57  ;;  %v9752_v57 = vld [vmem:[#allocation11 + $0x160] ss:$24 sps:$4 sm:$0xff]  }
  0xa9   :  { %890 = vmatpush1.bf16.msra.mxu0 %v8676_v58  ;;  %v9754_v58 = vld [vmem:[#allocation11 + $0x18c] ss:$24 sps:$4 sm:$0xff]  }
  0xaa   :  { %1562 = vmatpush1.bf16.msra.mxu1 %v8679_v59  ;;  %891 = vmatprep.subr.bf16.mxu0 %v8684_v60  ;;  %v9756_v59 = vld [vmem:[#allocation11 + $0x194] ss:$24 sps:$4 sm:$0xff]   ;;  %v9762_v60 = vld [vmem:[#allocation11 + $0x188] ss:$24 sps:$4 sm:$0xff]  }
  0xab   :  { %1563 = vmatprep.subr.bf16.mxu1 %v8687_v61  ;;  %v9764_v61 = vld [vmem:[#allocation11 + $0x190] ss:$24 sps:$4 sm:$0xff]  }
  0xad   :  { %892 = vmatpush1.bf16.msra.mxu0 %v8682_v62  ;;  %v9766_v62 = vld [vmem:[#allocation11 + $0x1bc] ss:$24 sps:$4 sm:$0xff]  }
  0xae   :  { %1564 = vmatpush1.bf16.msra.mxu1 %v8685_v63  ;;  %893 = vmatprep.subr.bf16.mxu0 %v8690_v0  ;;  %v9768_v63 = vld [vmem:[#allocation11 + $0x1c4] ss:$24 sps:$4 sm:$0xff]   ;;  %v9774_v0 = vld [vmem:[#allocation11 + $0x1b8] ss:$24 sps:$4 sm:$0xff]  }
  0xaf   :  { %1565 = vmatprep.subr.bf16.mxu1 %v8693_v1  ;;  %v9776_v1 = vld [vmem:[#allocation11 + $0x1c0] ss:$24 sps:$4 sm:$0xff]  }
  0xb1   :  { %894 = vmatpush1.bf16.msra.mxu0 %v8688_v2  ;;  %v9778_v2 = vld [vmem:[#allocation11 + $0x1ec] ss:$24 sps:$4 sm:$0xff]  }
  0xb2   :  { %1566 = vmatpush1.bf16.msra.mxu1 %v8691_v3  ;;  %895 = vmatprep.subr.bf16.mxu0 %v8696_v4  ;;  %v9780_v3 = vld [vmem:[#allocation11 + $0x1f4] ss:$24 sps:$4 sm:$0xff]   ;;  %v9786_v4 = vld [vmem:[#allocation11 + $0x1e8] ss:$24 sps:$4 sm:$0xff]  }
  0xb3   :  { %1567 = vmatprep.subr.bf16.mxu1 %v8699_v5  ;;  %v9788_v5 = vld [vmem:[#allocation11 + $0x1f0] ss:$24 sps:$4 sm:$0xff]  }
  0xb5   :  { %896 = vmatpush1.bf16.msra.mxu0 %v8694_v6  ;;  %v9790_v6 = vld [vmem:[#allocation11 + $0x21c] ss:$24 sps:$4 sm:$0xff]  }
  0xb6   :  { %1568 = vmatpush1.bf16.msra.mxu1 %v8697_v7  ;;  %897 = vmatprep.subr.bf16.mxu0 %v8702_v8  ;;  %v9792_v7 = vld [vmem:[#allocation11 + $0x224] ss:$24 sps:$4 sm:$0xff]   ;;  %v9798_v8 = vld [vmem:[#allocation11 + $0x218] ss:$24 sps:$4 sm:$0xff]  }
  0xb7   :  { %1569 = vmatprep.subr.bf16.mxu1 %v8705_v9  ;;  %v9800_v9 = vld [vmem:[#allocation11 + $0x220] ss:$24 sps:$4 sm:$0xff]  }
  0xb9   :  { %898 = vmatpush1.bf16.msra.mxu0 %v8700_v10  ;;  %v9802_v10 = vld [vmem:[#allocation11 + $0x24c] ss:$24 sps:$4 sm:$0xff]  }
  0xba   :  { %1570 = vmatpush1.bf16.msra.mxu1 %v8703_v11  ;;  %899 = vmatprep.subr.bf16.mxu0 %v8708_v12  ;;  %v9804_v11 = vld [vmem:[#allocation11 + $0x254] ss:$24 sps:$4 sm:$0xff]   ;;  %v9810_v12 = vld [vmem:[#allocation11 + $0x248] ss:$24 sps:$4 sm:$0xff]  }
  0xbb   :  { %1571 = vmatprep.subr.bf16.mxu1 %v8711_v13  ;;  %v9812_v13 = vld [vmem:[#allocation11 + $0x250] ss:$24 sps:$4 sm:$0xff]  }
  0xbd   :  { %900 = vmatpush1.bf16.msra.mxu0 %v8706_v16  ;;  %v9814_v16 = vld [vmem:[#allocation11 + $0x27c] ss:$24 sps:$4 sm:$0xff]  }
  0xbe   :  { %1572 = vmatpush1.bf16.msra.mxu1 %v8709_v17  ;;  %901 = vmatprep.subr.bf16.mxu0 %v8714_v18  ;;  %v9816_v17 = vld [vmem:[#allocation11 + $0x284] ss:$24 sps:$4 sm:$0xff]   ;;  %v9822_v18 = vld [vmem:[#allocation11 + $0x278] ss:$24 sps:$4 sm:$0xff]  }
  0xbf   :  { %1573 = vmatprep.subr.bf16.mxu1 %v9686_v19 }
  0xc1   :  { %902 = vmatpush1.bf16.msra.mxu0 %v8712_v20  ;;  %v9824_v20 = vld [vmem:[#allocation11 + $0x280] ss:$24 sps:$4 sm:$0xff]  }
  0xc2   :  { %1574 = vmatpush1.bf16.msra.mxu1 %v9690_v22  ;;  %1584 = vmatprep.subr.bf16.mxu0 %v9692_v23 }
  0xc3   :  { %1625 = vmatprep.subr.bf16.mxu1 %v9695_v24 }
  0xc4   :  { %904 = vmatmul.mubr.bf16.vlgmr.msra.gmra.mrb[4].mxu0 %v9663_v15  ;;  %v9718_v15 = vld [vmem:[#allocation11 + $0x9c] ss:$24 sps:$4 sm:$0xff]  }
  0xc5   :  { %1576 = vmatmul.mubr.bf16.vlgmr.msra.gmra.mrb[4].mxu1 %v9699_v26  ;;  %1585 = vmatpush1.bf16.msra.mxu0 %v9697_v25 }
  0xc6   :  { %1626 = vmatpush1.bf16.msra.mxu1 %v8721_v27  ;;  %1586 = vmatprep.subr.bf16.mxu0 %v9702_v28  ;;  %v9828_v27 = vld [vmem:[#allocation11 + $0x2b4] ss:$24 sps:$4 sm:$0xff]  }
  0xc7   :  { %1627 = vmatprep.subr.bf16.mxu1 %v8729_v29  ;;  %1616 = vmatprep.mubr.bf16.mxu0 %v9680_v53  ;;  %v9834_v29 = vld [vmem:[#allocation11 + $0x2a8] ss:$24 sps:$4 sm:$0xff]  }
  0xc8   :  { %1657 = vmatprep.mubr.bf16.mxu1 %v9680_v53  ;;  %v9742_v53 = vld [vmem:[#allocation11 + $0x130] ss:$24 sps:$4 sm:$0xff]  }
  0xc9   :  { %1587 = vmatpush1.bf16.msra.mxu0 %v9708_v30 }
  0xca   :  { %1628 = vmatpush1.bf16.msra.mxu1 %v8727_v31  ;;  %1588 = vmatprep.subr.bf16.mxu0 %v9711_v32  ;;  %v9836_v31 = vld [vmem:[#allocation11 + $0x2b0] ss:$24 sps:$4 sm:$0xff]  }
  0xcb   :  { %1629 = vmatprep.subr.bf16.mxu1 %v8735_v33  ;;  %v9838_v33 = vld [vmem:[#allocation11 + $0x2dc] ss:$24 sps:$4 sm:$0xff]  }
  0xcd   :  { %1589 = vmatpush1.bf16.msra.mxu0 %v9714_v34 }
  0xce   :  { %1630 = vmatpush1.bf16.msra.mxu1 %v8733_v35  ;;  %1590 = vmatprep.subr.bf16.mxu0 %v9718_v15  ;;  %v9840_v35 = vld [vmem:[#allocation11 + $0x2e4] ss:$24 sps:$4 sm:$0xff]  }
  0xcf   :  { %1631 = vmatprep.subr.bf16.mxu1 %v8741_v37  ;;  %v9846_v37 = vld [vmem:[#allocation11 + $0x2d8] ss:$24 sps:$4 sm:$0xff]  }
  0xd1   :  { %1591 = vmatpush1.bf16.msra.mxu0 %v9722_v38 }
  0xd2   :  { %1632 = vmatpush1.bf16.msra.mxu1 %v8739_v40  ;;  %1592 = vmatprep.subr.bf16.mxu0 %v9724_v41  ;;  %v9848_v40 = vld [vmem:[#allocation11 + $0x2e0] ss:$24 sps:$4 sm:$0xff]  }
  0xd3   :  { %1633 = vmatprep.subr.bf16.mxu1 %v8747_v43  ;;  %v9326_v43 = vld [vmem:[#allocation11 + $0x4] ss:$24 sps:$4 sm:$0xff]  }
  0xd5   :  { %1593 = vmatpush1.bf16.msra.mxu0 %v9728_v44 }
  0xd6   :  { %1634 = vmatpush1.bf16.msra.mxu1 %v8745_v46  ;;  %1594 = vmatprep.subr.bf16.mxu0 %v9730_v39  ;;  %v9327_v46 = vld [vmem:[#allocation11] ss:$24 sps:$4 sm:$0xff]  }
  0xd7   :  { %1635 = vmatprep.subr.bf16.mxu1 %v8753_v47  ;;  %v9328_v47 = vld [vmem:[#allocation11 + $0x34] ss:$24 sps:$4 sm:$0xff]  }
  0xd9   :  { %1595 = vmatpush1.bf16.msra.mxu0 %v9734_v48 }
  0xda   :  { %1636 = vmatpush1.bf16.msra.mxu1 %v8751_v49  ;;  %1596 = vmatprep.subr.bf16.mxu0 %v9736_v50  ;;  %v9329_v49 = vld [vmem:[#allocation11 + $0x30] ss:$24 sps:$4 sm:$0xff]  }
  0xdb   :  { %1637 = vmatprep.subr.bf16.mxu1 %v8759_v51  ;;  %v9330_v51 = vld [vmem:[#allocation11 + $0x64] ss:$24 sps:$4 sm:$0xff]  }
  0xdd   :  { %1597 = vmatpush1.bf16.msra.mxu0 %v9740_v52 }
  0xde   :  { %1638 = vmatpush1.bf16.msra.mxu1 %v9742_v53  ;;  %1598 = vmatprep.subr.bf16.mxu0 %v9744_v54 }
  0xdf   :  { %1639 = vmatprep.subr.bf16.mxu1 %v9746_v55 }
  0xe1   :  { %1599 = vmatpush1.bf16.msra.mxu0 %v9750_v56 }
  0xe2   :  { %1640 = vmatpush1.bf16.msra.mxu1 %v9752_v57  ;;  %1600 = vmatprep.subr.bf16.mxu0 %v9754_v58 }
  0xe3   :  { %1641 = vmatprep.subr.bf16.mxu1 %v9756_v59 }
  0xe5   :  { %1601 = vmatpush1.bf16.msra.mxu0 %v9762_v60 }
  0xe6   :  { %1642 = vmatpush1.bf16.msra.mxu1 %v9764_v61  ;;  %1602 = vmatprep.subr.bf16.mxu0 %v9766_v62 }
  0xe7   :  { %1643 = vmatprep.subr.bf16.mxu1 %v9768_v63 }
  0xe9   :  { %1603 = vmatpush1.bf16.msra.mxu0 %v9774_v0 }
  0xea   :  { %1644 = vmatpush1.bf16.msra.mxu1 %v9776_v1  ;;  %1604 = vmatprep.subr.bf16.mxu0 %v9778_v2 }
  0xeb   :  { %1645 = vmatprep.subr.bf16.mxu1 %v9780_v3 }
  0xed   :  { %1605 = vmatpush1.bf16.msra.mxu0 %v9786_v4 }
  0xee   :  { %1646 = vmatpush1.bf16.msra.mxu1 %v9788_v5  ;;  %1606 = vmatprep.subr.bf16.mxu0 %v9790_v6 }
  0xef   :  { %1647 = vmatprep.subr.bf16.mxu1 %v9792_v7 }
  0xf1   :  { %1607 = vmatpush1.bf16.msra.mxu0 %v9798_v8 }
  0xf2   :  { %1648 = vmatpush1.bf16.msra.mxu1 %v9800_v9  ;;  %1608 = vmatprep.subr.bf16.mxu0 %v9802_v10 }
  0xf3   :  { %1649 = vmatprep.subr.bf16.mxu1 %v9804_v11 }
  0xf5   :  { %1609 = vmatpush1.bf16.msra.mxu0 %v9810_v12 }
  0xf6   :  { %1650 = vmatpush1.bf16.msra.mxu1 %v9812_v13  ;;  %1610 = vmatprep.subr.bf16.mxu0 %v9814_v16 }
  0xf7   :  { %1651 = vmatprep.subr.bf16.mxu1 %v9816_v17 }
  0xf9   :  { %1611 = vmatpush1.bf16.msra.mxu0 %v9822_v18 }
  0xfa   :  { %1652 = vmatpush1.bf16.msra.mxu1 %v9824_v20  ;;  %1612 = vmatprep.subr.bf16.mxu0 %v9826_v21 }
  0xfb   :  { %1653 = vmatprep.subr.bf16.mxu1 %v9828_v27 }
  0xfd   :  { %1613 = vmatpush1.bf16.msra.mxu0 %v9834_v29 }
  0xfe   :  { %1654 = vmatpush1.bf16.msra.mxu1 %v9836_v31  ;;  %1614 = vmatprep.subr.bf16.mxu0 %v9838_v33 }
  0xff   :  { %1655 = vmatprep.subr.bf16.mxu1 %v9840_v35 }
 0x101   :  { %1615 = vmatpush1.bf16.msra.mxu0 %v9846_v37 }
 0x102   :  { %1656 = vmatpush1.bf16.msra.mxu1 %v9848_v40  ;;  %2373 = vmatprep.subr.bf16.mxu0 %v9326_v43 }
 0x103   :  { %2414 = vmatprep.subr.bf16.mxu1 %v9692_v23  ;;  %v9331_v23 = vld [vmem:[#allocation11 + $0x60] ss:$24 sps:$4 sm:$0xff]  }
 0x104   :  { %1617 = vmatmul.mubr.bf16.vlgmr.msra.gmra.mrb[8].mxu0 %v9699_v26 }
 0x105   :  { %1658 = vmatmul.mubr.bf16.vlgmr.msra.gmra.mrb[8].mxu1 %v9699_v26  ;;  %2374 = vmatpush1.bf16.msra.mxu0 %v9327_v46  ;;  %v9332_v26 = vld [vmem:[#allocation11 + $0x94] ss:$24 sps:$4 sm:$0xff]  }
 0x106   :  { %2415 = vmatpush1.bf16.msra.mxu1 %v9697_v25  ;;  %2375 = vmatprep.subr.bf16.mxu0 %v9328_v47  ;;  %v9333_v25 = vld [vmem:[#allocation11 + $0x90] ss:$24 sps:$4 sm:$0xff]  }
 0x107   :  { %2416 = vmatprep.subr.bf16.mxu1 %v9702_v28  ;;  %v9334_v28 = vld [vmem:[#allocation11 + $0xc4] ss:$24 sps:$4 sm:$0xff]  }
 0x109   :  { %2376 = vmatpush1.bf16.msra.mxu0 %v9329_v49 }
 0x10a   :  { %2417 = vmatpush1.bf16.msra.mxu1 %v9708_v30  ;;  %2377 = vmatprep.subr.bf16.mxu0 %v9330_v51  ;;  %v9335_v30 = vld [vmem:[#allocation11 + $0xc0] ss:$24 sps:$4 sm:$0xff]  }
 0x10b   :  { %2418 = vmatprep.subr.bf16.mxu1 %v9711_v32  ;;  %v9336_v32 = vld [vmem:[#allocation11 + $0xf4] ss:$24 sps:$4 sm:$0xff]  }
 0x10d   :  { %2378 = vmatpush1.bf16.msra.mxu0 %v9331_v23 }
 0x10e   :  { %2419 = vmatpush1.bf16.msra.mxu1 %v9714_v34  ;;  %2379 = vmatprep.subr.bf16.mxu0 %v9332_v26  ;;  %v9337_v34 = vld [vmem:[#allocation11 + $0xf0] ss:$24 sps:$4 sm:$0xff]  }
 0x10f   :  { %2420 = vmatprep.subr.bf16.mxu1 %v9718_v15  ;;  %v9338_v15 = vld [vmem:[#allocation11 + $0x124] ss:$24 sps:$4 sm:$0xff]  }
 0x111   :  { %2380 = vmatpush1.bf16.msra.mxu0 %v9333_v25 }
 0x112   :  { %2421 = vmatpush1.bf16.msra.mxu1 %v9722_v38  ;;  %2381 = vmatprep.subr.bf16.mxu0 %v9334_v28  ;;  %v9339_v38 = vld [vmem:[#allocation11 + $0x120] ss:$24 sps:$4 sm:$0xff]   ;;  %v9907_v28 = vsub.s32 4, %v9668_v36 }
 0x113   :  { %2422 = vmatprep.subr.bf16.mxu1 %v9724_v41  ;;  %v9340_v41 = vld [vmem:[#allocation11 + $0x154] ss:$24 sps:$4 sm:$0xff]  }
 0x115   :  { %2382 = vmatpush1.bf16.msra.mxu0 %v9335_v30  ;;  %v9910_v30 = vsub.s32 5, %v9668_v36 }
 0x116   :  { %2423 = vmatpush1.bf16.msra.mxu1 %v9728_v44  ;;  %2383 = vmatprep.subr.bf16.mxu0 %v9336_v32  ;;  %v9341_v44 = vld [vmem:[#allocation11 + $0x150] ss:$24 sps:$4 sm:$0xff]   ;;  %v1031_v32 = vld [vmem:[%s11316_s6] sm:$0x3f] }
 0x117   :  { %2424 = vmatprep.subr.bf16.mxu1 %v9730_v39  ;;  %v9342_v39 = vld [vmem:[#allocation11 + $0x184] ss:$24 sps:$4 sm:$0xff]  }
 0x119   :  { %2384 = vmatpush1.bf16.msra.mxu0 %v9337_v34 }
 0x11a   :  { %2425 = vmatpush1.bf16.msra.mxu1 %v9734_v48  ;;  %2385 = vmatprep.subr.bf16.mxu0 %v9338_v15  ;;  %v9343_v48 = vld [vmem:[#allocation11 + $0x180] ss:$24 sps:$4 sm:$0xff]   ;;  %v1516_v15 = vrot.slane %v1031_v32, %v9684_v14 }
 0x11b   :  { %2426 = vmatprep.subr.bf16.mxu1 %v9736_v50  ;;  %v9344_v50 = vld [vmem:[#allocation11 + $0x1b4] ss:$24 sps:$4 sm:$0xff]  }
 0x11d   :  { %2386 = vmatpush1.bf16.msra.mxu0 %v9339_v38 }
 0x11e   :  { %2427 = vmatpush1.bf16.msra.mxu1 %v9740_v52  ;;  %2387 = vmatprep.subr.bf16.mxu0 %v9340_v41  ;;  %v9345_v52 = vld [vmem:[#allocation11 + $0x1b0] ss:$24 sps:$4 sm:$0xff]   ;;  %v1520_v41 = vrot.slane %v1031_v32, %v9671_v42 }
 0x11f   :  { %2428 = vmatprep.subr.bf16.mxu1 %v9744_v54  ;;  %v9346_v54 = vld [vmem:[#allocation11 + $0x1e4] ss:$24 sps:$4 sm:$0xff]  }
 0x121   :  { %2388 = vmatpush1.bf16.msra.mxu0 %v9341_v44 }
 0x122   :  { %2429 = vmatpush1.bf16.msra.mxu1 %v9750_v56  ;;  %2389 = vmatprep.subr.bf16.mxu0 %v9342_v39  ;;  %v9347_v56 = vld [vmem:[#allocation11 + $0x1e0] ss:$24 sps:$4 sm:$0xff]  }
 0x123   :  { %2430 = vmatprep.subr.bf16.mxu1 %v9754_v58  ;;  %v9348_v58 = vld [vmem:[#allocation11 + $0x214] ss:$24 sps:$4 sm:$0xff]  }
 0x125   :  { %2390 = vmatpush1.bf16.msra.mxu0 %v9343_v48 }
 0x126   :  { %2431 = vmatpush1.bf16.msra.mxu1 %v9762_v60  ;;  %2391 = vmatprep.subr.bf16.mxu0 %v9344_v50  ;;  %v9349_v60 = vld [vmem:[#allocation11 + $0x210] ss:$24 sps:$4 sm:$0xff]  }
 0x127   :  { %2432 = vmatprep.subr.bf16.mxu1 %v9766_v62  ;;  %v9350_v62 = vld [vmem:[#allocation11 + $0x244] ss:$24 sps:$4 sm:$0xff]  }
 0x129   :  { %2392 = vmatpush1.bf16.msra.mxu0 %v9345_v52 }
 0x12a   :  { %2433 = vmatpush1.bf16.msra.mxu1 %v9774_v0  ;;  %2393 = vmatprep.subr.bf16.mxu0 %v9346_v54  ;;  %v9351_v0 = vld [vmem:[#allocation11 + $0x240] ss:$24 sps:$4 sm:$0xff]  }
 0x12b   :  { %2434 = vmatprep.subr.bf16.mxu1 %v9778_v2  ;;  %v9352_v2 = vld [vmem:[#allocation11 + $0x274] ss:$24 sps:$4 sm:$0xff]  }
 0x12d   :  { %2394 = vmatpush1.bf16.msra.mxu0 %v9347_v56 }
 0x12e   :  { %2435 = vmatpush1.bf16.msra.mxu1 %v9786_v4  ;;  %2395 = vmatprep.subr.bf16.mxu0 %v9348_v58  ;;  %v9353_v4 = vld [vmem:[#allocation11 + $0x270] ss:$24 sps:$4 sm:$0xff]  }
 0x12f   :  { %2436 = vmatprep.subr.bf16.mxu1 %v9790_v6  ;;  %v9354_v6 = vld [vmem:[#allocation11 + $0x2a4] ss:$24 sps:$4 sm:$0xff]  }
 0x131   :  { %2396 = vmatpush1.bf16.msra.mxu0 %v9349_v60 }
 0x132   :  { %2437 = vmatpush1.bf16.msra.mxu1 %v9798_v8  ;;  %2397 = vmatprep.subr.bf16.mxu0 %v9350_v62  ;;  %v9355_v8 = vld [vmem:[#allocation11 + $0x2a0] ss:$24 sps:$4 sm:$0xff]  }
 0x133   :  { %2438 = vmatprep.subr.bf16.mxu1 %v9802_v10  ;;  %v9894_v10 = vsub.s32 2, %v9668_v36 }
 0x135   :  { %2398 = vmatpush1.bf16.msra.mxu0 %v9351_v0  ;;  %11422 = vst [vmem:[#allocation17_spill] sm:$0xff] %v9894_v10 }
 0x136   :  { %2439 = vmatpush1.bf16.msra.mxu1 %v9810_v12  ;;  %2399 = vmatprep.subr.bf16.mxu0 %v9352_v2  ;;  %v277_v12 = vld [vmem:[%s11315_s5] sm:$0x3f] }
 0x137   :  { %2440 = vmatprep.subr.bf16.mxu1 %v9814_v16  ;;  %v9900_v16 = vsub.s32 3, %v9668_v36  ;;  %v298_v34 = vrot.slane %v277_v12, %v9907_v28  ;;  %v302_v38 = vrot.slane %v277_v12, %v9910_v30 }
 0x139   :  { %2400 = vmatpush1.bf16.msra.mxu0 %v9353_v4  ;;  %11423 = vst [vmem:[#allocation18_spill] sm:$0xff] %v9900_v16 }
 0x13a   :  { %2441 = vmatpush1.bf16.msra.mxu1 %v9822_v18  ;;  %2401 = vmatprep.subr.bf16.mxu0 %v9354_v6  ;;  %v290_v18 = vrot.slane %v277_v12, %v9894_v10  ;;  %v9483_v6 = vmov 1966171168  }
 0x13b   :  { %2442 = vmatprep.subr.bf16.mxu1 %v9826_v21  ;;  %v294_v21 = vrot.slane %v277_v12, %v9900_v16 }
 0x13d   :  { %2402 = vmatpush1.bf16.msra.mxu0 %v9355_v8  ;;  %v1670_v8 = vunpack.c.l.s4 %v9483_v6 }
 0x13e   :  { %2443 = vmatpush1.bf16.msra.mxu1 %v9834_v29  ;;  %2403 = vmatprep.subr.bf16.mxu0 %v9686_v19  ;;  %v282_v19 = vrot.slane %v277_v12, %v9684_v14 }
 0x13f   :  { %2444 = vmatprep.subr.bf16.mxu1 %v9838_v33 }
 0x141   :  { %2404 = vmatpush1.bf16.msra.mxu0 %v9690_v22  ;;  %v286_v22 = vrot.slane %v277_v12, %v9671_v42  ;;  %v1671_v12 = vunpack.c.0.s8 %v1670_v8 }
 0x142   :  { %2445 = vmatpush1.bf16.msra.mxu1 %v9846_v37  ;;  %2455 = vmatprep.subr.bf16.mxu0 %v9695_v24 }
 0x157   :  { %v823_v29 = vpop.f32.mrb[0].mxu0 }
 0x158   :  { %v864_v24 = vpop.f32.mrb[0].mxu1  ;;  %v824_v33 = vadd.f32 %v823_v29, %v282_v19  ;;  %v825_v43 = vpop.f32.mrb[1].mxu0  ;;  %v9920_v19 = vsub.s32 %v1671_v12, %v9668_v36  ;;  %v1536_v36 = vrot.slane %v1031_v32, %v9910_v30 }
 0x159   :  { %v865_v37 = vadd.f32 %v864_v24, %v290_v18  ;;  %v866_v46 = vpop.f32.mrb[1].mxu1  ;;  %v826_v47 = vadd.f32 %v825_v43, %v286_v22  ;;  %v827_v51 = vpop.f32.mrb[2].mxu0 }
 0x15a   :  { %v867_v49 = vadd.f32 %v866_v46, %v294_v21  ;;  %v868_v23 = vpop.f32.mrb[2].mxu1  ;;  %912 = vst [vmem:[#allocation3] sm:$0xff] %v824_v33  ;;  %v828_v26 = vpop.f32.mrb[3].mxu0  ;;  %v1528_v51 = vrot.slane %v1031_v32, %v9900_v16 }
 0x15b   :  { %914 = vst [vmem:[#allocation3 + $0x10] sm:$0xff] %v865_v37  ;;  %v869_v25 = vpop.f32.mrb[3].mxu1  ;;  %913 = vst [vmem:[#allocation3 + $0x8] sm:$0xff] %v826_v47  ;;  %v1524_v47 = vrot.slane %v1031_v32, %v9894_v10 }
 0x15c   :  { %915 = vst [vmem:[#allocation3 + $0x18] sm:$0xff] %v867_v49  ;;  %v1532_v49 = vrot.slane %v1031_v32, %v9907_v28 }
 0x163   :  { %v919_v21 = vld [vmem:[#allocation3] ss:$8 sm:$0xf] }
 0x197   :  { %v905_v44 = vpop.f32.mrb[4].mxu0 }
 0x198   :  { %v1577_v39 = vpop.f32.mrb[4].mxu1  ;;  %v906_v48 = vadd.f32 %v905_v44, %v298_v34  ;;  %v907_v50 = vpop.f32.mrb[5].mxu0 }
 0x199   :  { %v1578_v52 = vadd.f32 %v1577_v39, %v1516_v15  ;;  %v1579_v54 = vpop.f32.mrb[5].mxu1  ;;  %v908_v56 = vadd.f32 %v907_v50, %v302_v38  ;;  %v909_v58 = vpop.f32.mrb[6].mxu0 }
 0x19a   :  { %v1580_v60 = vadd.f32 %v1579_v54, %v1520_v41  ;;  %v1581_v62 = vpop.f32.mrb[6].mxu1  ;;  %916 = vst [vmem:[#allocation3 + $0x20] sm:$0xff] %v906_v48  ;;  %v910_v0 = vpop.f32.mrb[7].mxu0 }
 0x19b   :  { %v1582_v2 = vpop.f32.mrb[7].mxu1  ;;  %917 = vst [vmem:[#allocation3 + $0x28] sm:$0xff] %v908_v56 }
 0x19c   :  { %v1668_v4 = vcombine.low %v1578_v52, %v1580_v60 }
 0x19e   :  { %v1675_v18 = vrot.slane %v1668_v4, %v9920_v19 }
 0x1a0   :  { %v1682_v24 = vrot.slane %v1675_v18, %v9920_v19 }
 0x1a2   :  { %v920_v22 = vld [vmem:[#allocation3] ss:$8 sm:$0x30] }
 0x1a3   :  { %v921_v29 = vor.u32 %v920_v22, %v919_v21 }
 0x1a5   :  { %v1684_v33 = vadd.f32 %v1682_v24, %v921_v29  ;;  %v1692_v32 = vrot.slane %v921_v29, 2  ;;  %v1738_v12 = vrot.slane %v921_v29, 4 }
 0x1a7   :  { %v7820_v37 = vmul.f32 -1.442695, %v1684_v33 }
 0x1a9   :  { %9246 = vpow2.f32 %v7820_v37 }
 0x1b3   :  { %v9247_v43 = vpop.eup %9246 }
 0x1b4   :  { %v1688_v46 = vadd.f32 1.0, %v9247_v43 }
 0x1b6   :  { %9248 = vrcp.f32 %v1688_v46  ;;  %v9356_v46 = vld [vmem:[%s11312_s2] sm:$0x3] }
 0x1c0   :  { %v9249_v2 = vpop.eup %9248 }
 0x1d7   :  { %v1618_v23 = vpop.f32.mrb[8].mxu0 }
 0x1d8   :  { %v1659_v26 = vpop.f32.mrb[8].mxu1  ;;  %v1619_v25 = vadd.f32 %v1618_v23, %v1524_v47  ;;  %v1620_v15 = vpop.f32.mrb[9].mxu0 }
 0x1d9   :  { %v1660_v34 = vadd.f32 %v1659_v26, %v1532_v49  ;;  %v1661_v38 = vpop.f32.mrb[9].mxu1  ;;  %v1621_v41 = vadd.f32 %v1620_v15, %v1528_v51  ;;  %v1622_v39 = vpop.f32.mrb[10].mxu0  ;;  %v9357_v26 = vld [vmem:[#allocation11 + $0x10] ss:$24 sps:$4 sm:$0xff]   ;;  %v9360_v15 = vld [vmem:[#allocation11 + $0x74] ss:$24 sps:$4 sm:$0xff]  }
 0x1da   :  { %v1662_v44 = vadd.f32 %v1661_v38, %v1536_v36  ;;  %v1663_v48 = vpop.f32.mrb[10].mxu1  ;;  %v1623_v50 = vpop.f32.mrb[11].mxu0  ;;  %v9361_v38 = vld [vmem:[#allocation11 + $0x70] ss:$24 sps:$4 sm:$0xff]   ;;  %v9364_v39 = vld [vmem:[#allocation11 + $0xd4] ss:$24 sps:$4 sm:$0xff]  }
 0x1db   :  { %v1664_v52 = vpop.f32.mrb[11].mxu1  ;;  %v1696_v54 = vcombine.low %v1619_v25, %v1621_v41  ;;  %v9358_v25 = vld [vmem:[#allocation11 + $0x44] ss:$24 sps:$4 sm:$0xff]   ;;  %v9365_v48 = vld [vmem:[#allocation11 + $0xd0] ss:$24 sps:$4 sm:$0xff]  }
 0x1dc   :  { %v1721_v56 = vcombine.low %v1660_v34, %v1662_v44  ;;  %v9359_v34 = vld [vmem:[#allocation11 + $0x40] ss:$24 sps:$4 sm:$0xff]   ;;  %v9362_v41 = vld [vmem:[#allocation11 + $0xa4] ss:$24 sps:$4 sm:$0xff]  }
 0x1dd   :  { %v1703_v58 = vrot.slane %v1696_v54, %v9920_v19  ;;  %v9363_v44 = vld [vmem:[#allocation11 + $0xa0] ss:$24 sps:$4 sm:$0xff]   ;;  %v9366_v50 = vld [vmem:[#allocation11 + $0x104] ss:$24 sps:$4 sm:$0xff]   ;;  %v9368_v54 = vld [vmem:[#allocation11 + $0x134] ss:$24 sps:$4 sm:$0xff]  }
 0x1de   :  { %v1728_v60 = vrot.slane %v1721_v56, %v9920_v19  ;;  %v9367_v52 = vld [vmem:[#allocation11 + $0x100] ss:$24 sps:$4 sm:$0xff]  }
 0x1df   :  { %v1710_v62 = vrot.slane %v1703_v58, %v9920_v19  ;;  %v10018_v56 = vld [vmem:[#allocation11 + $0xc8] ss:$24 sps:$4 sm:$0xff]   ;;  %v10020_v58 = vld [vmem:[#allocation11 + $0xf4] ss:$24 sps:$4 sm:$0xff]  }
 0x1e0   :  { %v1735_v0 = vrot.slane %v1728_v60, %v9920_v19  ;;  %11432 = vst [vmem:[#allocation27_spill] sm:$0xff] %v10018_v56  ;;  %v10023_v60 = vld [vmem:[#allocation11 + $0xfc] ss:$24 sps:$4 sm:$0xff]  }
 0x1e1   :  { %v1712_v4 = vadd.f32 %v1710_v62, %v1692_v32  ;;  %11433 = vst [vmem:[#allocation28_spill] sm:$0xff] %v10023_v60  ;;  %v10026_v32 = vld [vmem:[#allocation11 + $0xf0] ss:$24 sps:$4 sm:$0xff]  }
 0x1e2   :  { %v1737_v6 = vmul.f32 %v9249_v2, %v1735_v0  ;;  %v10030_v62 = vld [vmem:[#allocation11 + $0xf8] ss:$24 sps:$4 sm:$0xff]   ;;  %v10032_v0 = vld [vmem:[#allocation11 + $0x124] ss:$24 sps:$4 sm:$0xff]  }
 0x1e3   :  { %v7821_v8 = vmul.f32 -1.442695, %v1712_v4  ;;  %11434 = vst [vmem:[#allocation29_spill] sm:$0xff] %v10030_v62  ;;  %v10035_v2 = vld [vmem:[#allocation11 + $0x12c] ss:$24 sps:$4 sm:$0xff]  }
 0x1e4   :  { %v1740_v21 = vadd.f32 %v1738_v12, %v1737_v6  ;;  %11435 = vst [vmem:[#allocation30_spill] sm:$0xff] %v10035_v2  ;;  %v10038_v4 = vld [vmem:[#allocation11 + $0x120] ss:$24 sps:$4 sm:$0xff]   ;;  %v10047_v12 = vld [vmem:[#allocation11 + $0x15c] ss:$24 sps:$4 sm:$0xff]  }
 0x1e5   :  { %9250 = vpow2.f32 %v7821_v8  ;;  %v10042_v6 = vld [vmem:[#allocation11 + $0x128] ss:$24 sps:$4 sm:$0xff]   ;;  %v10044_v8 = vld [vmem:[#allocation11 + $0x154] ss:$24 sps:$4 sm:$0xff]   ;;  %11437 = vst [vmem:[#allocation32_spill] sm:$0xff] %v10047_v12 }
 0x1e6   :  { %11436 = vst [vmem:[#allocation31_spill] sm:$0xff] %v10042_v6 }
 0x1ef   :  { %v9251_v18 = vpop.eup %9250 }
 0x1f0   :  { %v1716_v22 = vadd.f32 1.0, %v9251_v18  ;;  %v10050_v18 = vld [vmem:[#allocation11 + $0x150] ss:$24 sps:$4 sm:$0xff]  }
 0x1f2   :  { %9252 = vrcp.f32 %v1716_v22  ;;  %v10054_v22 = vld [vmem:[#allocation11 + $0x158] ss:$24 sps:$4 sm:$0xff]  }
 0x1f3   :  { %9254 = vtanh.f32 %v1740_v21  ;;  %11438 = vst [vmem:[#allocation33_spill] sm:$0xff] %v10054_v22  ;;  %v10059_v21 = vld [vmem:[#allocation11 + $0x184] ss:$24 sps:$4 sm:$0xff]  }
 0x1fc   :  { %v9253_v24 = vpop.eup %9252 }
 0x1fd   :  { %v1742_v33 = vsub.f32 1.0, %v9253_v24  ;;  %v9255_v37 = vpop.eup %9254  ;;  %v1744_v47 = vmul.f32 %v9356_v46, %v9253_v24  ;;  %v10061_v24 = vld [vmem:[#allocation11 + $0x180] ss:$24 sps:$4 sm:$0xff]   ;;  %v10073_v46 = vld [vmem:[#allocation11 + $0x1b0] ss:$24 sps:$4 sm:$0xff]  }
 0x1ff   :  { %v1743_v43 = vmul.f32 %v9255_v37, %v1742_v33  ;;  %v10063_v33 = vld [vmem:[#allocation11 + $0x18c] ss:$24 sps:$4 sm:$0xff]   ;;  %v10066_v37 = vld [vmem:[#allocation11 + $0x188] ss:$24 sps:$4 sm:$0xff]  }
 0x200   :  { %11439 = vst [vmem:[#allocation34_spill] sm:$0xff] %v10063_v33  ;;  %11440 = vst [vmem:[#allocation35_spill] sm:$0xff] %v10066_v37 }
 0x201   :  { %v9935_v49 = vadd.f32 %v1744_v47, %v1743_v43  ;;  %v10071_v43 = vld [vmem:[#allocation11 + $0x1b4] ss:$24 sps:$4 sm:$0xff]  }
 0x202   :  { %v10075_v47 = vld [vmem:[#allocation11 + $0x1bc] ss:$24 sps:$4 sm:$0xff]  }
 0x203   :  { %1746 = vst.msk [vmem:[#allocation12] ss:$8 sm:$0x3] %vm9633_vm0, %v9935_v49  ;;  %v1760_v29 = vrot.slane %v9935_v49, %v9671_v42  ;;  %v1756_v51 = vrot.slane %v9935_v49, %v9684_v14  ;;  %11441 = vst [vmem:[#allocation36_spill] sm:$0xff] %v10075_v47 }
 0x205   :  { %v1764_v36 = vpack.c.bf16 %v1760_v29, %v1760_v29  ;;  %v1763_v23 = vpack.c.bf16 %v1756_v51, %v1756_v51  ;;  %v10078_v29 = vld [vmem:[#allocation11 + $0x1b8] ss:$24 sps:$4 sm:$0xff]   ;;  %v10083_v51 = vld [vmem:[#allocation11 + $0x1e4] ss:$24 sps:$4 sm:$0xff]  }
 0x206   :  { %11442 = vst [vmem:[#allocation37_spill] sm:$0xff] %v10078_v29 }
 0x207   :  { %2405 = vmatprep.mubr.bf16.mxu0 %v1764_v36  ;;  %2446 = vmatprep.mubr.bf16.mxu1 %v1764_v36 }
 0x208   :  { %2406 = vmatmul.mubr.bf16.vlgmr.msra.gmra.mrb[12].mxu0 %v1763_v23  ;;  %2447 = vmatmul.mubr.bf16.vlgmr.msra.gmra.mrb[12].mxu1 %v1763_v23 }
 0x209   :  { %2456 = vmatpush1.bf16.msra.mxu0 %v9357_v26  ;;  %2487 = vmatprep.mubr.bf16.mxu0 %v1764_v36  ;;  %v10085_v36 = vld [vmem:[#allocation11 + $0x1e0] ss:$24 sps:$4 sm:$0xff]  }
 0x20a   :  { %2457 = vmatprep.subr.bf16.mxu0 %v9358_v25  ;;  %v10090_v26 = vld [vmem:[#allocation11 + $0x1e8] ss:$24 sps:$4 sm:$0xff]   ;;  %v10095_v25 = vld [vmem:[#allocation11 + $0x214] ss:$24 sps:$4 sm:$0xff]  }
 0x20b   :  { %11444 = vst [vmem:[#allocation39_spill] sm:$0xff] %v10090_v26 }
 0x20d   :  { %2458 = vmatpush1.bf16.msra.mxu0 %v9359_v34  ;;  %v10097_v34 = vld [vmem:[#allocation11 + $0x210] ss:$24 sps:$4 sm:$0xff]  }
 0x20e   :  { %2459 = vmatprep.subr.bf16.mxu0 %v9360_v15  ;;  %v10099_v15 = vld [vmem:[#allocation11 + $0x21c] ss:$24 sps:$4 sm:$0xff]  }
 0x20f   :  { %11445 = vst [vmem:[#allocation40_spill] sm:$0xff] %v10099_v15 }
 0x211   :  { %2460 = vmatpush1.bf16.msra.mxu0 %v9361_v38  ;;  %v10102_v38 = vld [vmem:[#allocation11 + $0x218] ss:$24 sps:$4 sm:$0xff]  }
 0x212   :  { %2461 = vmatprep.subr.bf16.mxu0 %v9362_v41  ;;  %11446 = vst [vmem:[#allocation41_spill] sm:$0xff] %v10102_v38  ;;  %v10106_v41 = vld [vmem:[#allocation11 + $0x240] ss:$24 sps:$4 sm:$0xff]  }
 0x215   :  { %2462 = vmatpush1.bf16.msra.mxu0 %v9363_v44  ;;  %v10108_v44 = vld [vmem:[#allocation11 + $0x244] ss:$24 sps:$4 sm:$0xff]  }
 0x216   :  { %2463 = vmatprep.subr.bf16.mxu0 %v9364_v39  ;;  %v10111_v39 = vld [vmem:[#allocation11 + $0x248] ss:$24 sps:$4 sm:$0xff]  }
 0x217   :  { %11447 = vst [vmem:[#allocation42_spill] sm:$0xff] %v10111_v39 }
 0x219   :  { %2464 = vmatpush1.bf16.msra.mxu0 %v9365_v48  ;;  %v10113_v48 = vld [vmem:[#allocation11 + $0x24c] ss:$24 sps:$4 sm:$0xff]  }
 0x21a   :  { %2465 = vmatprep.subr.bf16.mxu0 %v9366_v50  ;;  %11448 = vst [vmem:[#allocation43_spill] sm:$0xff] %v10113_v48  ;;  %v10115_v50 = vld [vmem:[#allocation11 + $0x274] ss:$24 sps:$4 sm:$0xff]  }
 0x21d   :  { %2466 = vmatpush1.bf16.msra.mxu0 %v9367_v52  ;;  %v10118_v52 = vld [vmem:[#allocation11 + $0x27c] ss:$24 sps:$4 sm:$0xff]  }
 0x21e   :  { %2467 = vmatprep.subr.bf16.mxu0 %v9368_v54  ;;  %11449 = vst [vmem:[#allocation44_spill] sm:$0xff] %v10118_v52  ;;  %v10122_v54 = vld [vmem:[#allocation11 + $0x270] ss:$24 sps:$4 sm:$0xff]  }
 0x221   :  { %2468 = vmatpush1.bf16.msra.mxu0 %v9742_v53  ;;  %v9963_v53 = vld [vmem:[#allocation11] ss:$24 sps:$4 sm:$0xff]  }
 0x222   :  { %2469 = vmatprep.subr.bf16.mxu0 %v9746_v55  ;;  %v9965_v55 = vld [vmem:[#allocation11 + $0x4] ss:$24 sps:$4 sm:$0xff]  }
 0x223   :  { %3204 = vmatprep.subr.bf16.mxu1 %v9965_v55 }
 0x224   :  { %3205 = vmatpush1.bf16.msra.mxu1 %v9963_v53 }
 0x225   :  { %2470 = vmatpush1.bf16.msra.mxu0 %v9752_v57  ;;  %v9967_v57 = vld [vmem:[#allocation11 + $0x8] ss:$24 sps:$4 sm:$0xff]  }
 0x226   :  { %2471 = vmatprep.subr.bf16.mxu0 %v9756_v59  ;;  %11424 = vst [vmem:[#allocation19_spill] sm:$0xff] %v9967_v57  ;;  %v9969_v59 = vld [vmem:[#allocation11 + $0xc] ss:$24 sps:$4 sm:$0xff]  }
 0x229   :  { %2472 = vmatpush1.bf16.msra.mxu0 %v9764_v61  ;;  %v9971_v61 = vld [vmem:[#allocation11 + $0x34] ss:$24 sps:$4 sm:$0xff]  }
 0x22a   :  { %2473 = vmatprep.subr.bf16.mxu0 %v9768_v63  ;;  %v9974_v63 = vld [vmem:[#allocation11 + $0x3c] ss:$24 sps:$4 sm:$0xff]   ;;  %3206 = vmatprep.subr.bf16.mxu1 %v9971_v61 }
 0x22b   :  { %11425 = vst [vmem:[#allocation20_spill] sm:$0xff] %v9974_v63 }
 0x22d   :  { %2474 = vmatpush1.bf16.msra.mxu0 %v9776_v1  ;;  %v9978_v1 = vld [vmem:[#allocation11 + $0x30] ss:$24 sps:$4 sm:$0xff]  }
 0x22e   :  { %2475 = vmatprep.subr.bf16.mxu0 %v9780_v3  ;;  %v9982_v3 = vld [vmem:[#allocation11 + $0x38] ss:$24 sps:$4 sm:$0xff]   ;;  %3207 = vmatpush1.bf16.msra.mxu1 %v9978_v1 }
 0x22f   :  { %11426 = vst [vmem:[#allocation21_spill] sm:$0xff] %v9982_v3 }
 0x231   :  { %2476 = vmatpush1.bf16.msra.mxu0 %v9788_v5  ;;  %v9984_v5 = vld [vmem:[#allocation11 + $0x64] ss:$24 sps:$4 sm:$0xff]  }
 0x232   :  { %2477 = vmatprep.subr.bf16.mxu0 %v9792_v7  ;;  %v9987_v7 = vld [vmem:[#allocation11 + $0x6c] ss:$24 sps:$4 sm:$0xff]   ;;  %3208 = vmatprep.subr.bf16.mxu1 %v9984_v5 }
 0x233   :  { %11427 = vst [vmem:[#allocation22_spill] sm:$0xff] %v9987_v7 }
 0x235   :  { %2478 = vmatpush1.bf16.msra.mxu0 %v9800_v9  ;;  %v9990_v9 = vld [vmem:[#allocation11 + $0x60] ss:$24 sps:$4 sm:$0xff]  }
 0x236   :  { %2479 = vmatprep.subr.bf16.mxu0 %v9804_v11  ;;  %v9994_v11 = vld [vmem:[#allocation11 + $0x68] ss:$24 sps:$4 sm:$0xff]   ;;  %3209 = vmatpush1.bf16.msra.mxu1 %v9990_v9 }
 0x237   :  { %11428 = vst [vmem:[#allocation23_spill] sm:$0xff] %v9994_v11 }
 0x239   :  { %2480 = vmatpush1.bf16.msra.mxu0 %v9812_v13  ;;  %v9996_v13 = vld [vmem:[#allocation11 + $0x94] ss:$24 sps:$4 sm:$0xff]  }
 0x23a   :  { %2481 = vmatprep.subr.bf16.mxu0 %v9816_v17  ;;  %v9999_v17 = vld [vmem:[#allocation11 + $0x9c] ss:$24 sps:$4 sm:$0xff]   ;;  %3210 = vmatprep.subr.bf16.mxu1 %v9996_v13 }
 0x23b   :  { %11429 = vst [vmem:[#allocation24_spill] sm:$0xff] %v9999_v17 }
 0x23d   :  { %2482 = vmatpush1.bf16.msra.mxu0 %v9824_v20  ;;  %v10002_v20 = vld [vmem:[#allocation11 + $0x90] ss:$24 sps:$4 sm:$0xff]  }
 0x23e   :  { %2483 = vmatprep.subr.bf16.mxu0 %v9828_v27  ;;  %v10006_v27 = vld [vmem:[#allocation11 + $0x98] ss:$24 sps:$4 sm:$0xff]   ;;  %3211 = vmatpush1.bf16.msra.mxu1 %v10002_v20 }
 0x23f   :  { %11430 = vst [vmem:[#allocation25_spill] sm:$0xff] %v10006_v27 }
 0x241   :  { %2484 = vmatpush1.bf16.msra.mxu0 %v9836_v31  ;;  %v10008_v31 = vld [vmem:[#allocation11 + $0xc4] ss:$24 sps:$4 sm:$0xff]  }
 0x242   :  { %2485 = vmatprep.subr.bf16.mxu0 %v9840_v35  ;;  %v10011_v35 = vld [vmem:[#allocation11 + $0xcc] ss:$24 sps:$4 sm:$0xff]   ;;  %3212 = vmatprep.subr.bf16.mxu1 %v10008_v31 }
 0x243   :  { %11431 = vst [vmem:[#allocation26_spill] sm:$0xff] %v10011_v35 }
 0x245   :  { %2486 = vmatpush1.bf16.msra.mxu0 %v9848_v40  ;;  %v10014_v40 = vld [vmem:[#allocation11 + $0xc0] ss:$24 sps:$4 sm:$0xff]  }
 0x246   :  { %3245 = vmatprep.subr.bf16.mxu0 %v9969_v59  ;;  %3213 = vmatpush1.bf16.msra.mxu1 %v10014_v40 }
 0x247   :  { %3214 = vmatprep.subr.bf16.mxu1 %v10020_v58 }
 0x248   :  { %2488 = vmatmul.mubr.bf16.vlgmr.msra.gmra.mrb[16].mxu0 %v1763_v23  ;;  %v10087_v23 = vld [vmem:[#allocation11 + $0x1ec] ss:$24 sps:$4 sm:$0xff]  }
 0x249   :  { %3246 = vmatpush1.bf16.msra.mxu0 %v9967_v57  ;;  %11443 = vst [vmem:[#allocation38_spill] sm:$0xff] %v10087_v23 }
 0x24a   :  { %3247 = vmatprep.subr.bf16.mxu0 %v9974_v63  ;;  %3215 = vmatpush1.bf16.msra.mxu1 %v10026_v32 }
 0x24b   :  { %3216 = vmatprep.subr.bf16.mxu1 %v10032_v0 }
 0x24d   :  { %3248 = vmatpush1.bf16.msra.mxu0 %v9982_v3  ;;  %v1750_v3 = vld [vmem:[#allocation3 + $0x1] ss:$8 sm:$0x30] }
 0x24e   :  { %3249 = vmatprep.subr.bf16.mxu0 %v9987_v7  ;;  %3217 = vmatpush1.bf16.msra.mxu1 %v10038_v4 }
 0x24f   :  { %3218 = vmatprep.subr.bf16.mxu1 %v10044_v8 }
 0x251   :  { %3250 = vmatpush1.bf16.msra.mxu0 %v9994_v11 }
 0x252   :  { %3251 = vmatprep.subr.bf16.mxu0 %v9999_v17  ;;  %3219 = vmatpush1.bf16.msra.mxu1 %v10050_v18 }
 0x253   :  { %3220 = vmatprep.subr.bf16.mxu1 %v10059_v21 }
 0x255   :  { %3252 = vmatpush1.bf16.msra.mxu0 %v10006_v27 }
 0x256   :  { %3253 = vmatprep.subr.bf16.mxu0 %v10011_v35  ;;  %3221 = vmatpush1.bf16.msra.mxu1 %v10061_v24 }
 0x257   :  { %3222 = vmatprep.subr.bf16.mxu1 %v10071_v43 }
 0x259   :  { %3254 = vmatpush1.bf16.msra.mxu0 %v10018_v56 }
 0x25a   :  { %3255 = vmatprep.subr.bf16.mxu0 %v10023_v60  ;;  %3223 = vmatpush1.bf16.msra.mxu1 %v10073_v46 }
 0x25b   :  { %3224 = vmatprep.subr.bf16.mxu1 %v10083_v51 }
 0x25d   :  { %3256 = vmatpush1.bf16.msra.mxu0 %v10030_v62 }
 0x25e   :  { %3257 = vmatprep.subr.bf16.mxu0 %v10035_v2  ;;  %3225 = vmatpush1.bf16.msra.mxu1 %v10085_v36 }
 0x25f   :  { %3226 = vmatprep.subr.bf16.mxu1 %v10095_v25 }
 0x261   :  { %3258 = vmatpush1.bf16.msra.mxu0 %v10042_v6 }
 0x262   :  { %3259 = vmatprep.subr.bf16.mxu0 %v10047_v12  ;;  %3227 = vmatpush1.bf16.msra.mxu1 %v10097_v34 }
 0x263   :  { %3228 = vmatprep.subr.bf16.mxu1 %v10108_v44 }
 0x265   :  { %3260 = vmatpush1.bf16.msra.mxu0 %v10054_v22 }
 0x266   :  { %3261 = vmatprep.subr.bf16.mxu0 %v10063_v33  ;;  %3229 = vmatpush1.bf16.msra.mxu1 %v10106_v41 }
 0x267   :  { %3230 = vmatprep.subr.bf16.mxu1 %v10115_v50 }
 0x269   :  { %3262 = vmatpush1.bf16.msra.mxu0 %v10066_v37 }
 0x26a   :  { %3263 = vmatprep.subr.bf16.mxu0 %v10075_v47  ;;  %3231 = vmatpush1.bf16.msra.mxu1 %v10122_v54  ;;  %v10150_v47 = vld [vmem:[#allocation11 + $0x2d8] ss:$24 sps:$4 sm:$0xff]  }
 0x26b   :  { %11454 = vst [vmem:[#allocation49_spill] sm:$0xff] %v10150_v47 }
 0x26d   :  { %3264 = vmatpush1.bf16.msra.mxu0 %v10078_v29  ;;  %v10143_v29 = vld [vmem:[#allocation11 + $0x2dc] ss:$24 sps:$4 sm:$0xff]  }
 0x26e   :  { %3265 = vmatprep.subr.bf16.mxu0 %v10087_v23  ;;  %v10134_v23 = vld [vmem:[#allocation11 + $0x2a0] ss:$24 sps:$4 sm:$0xff]   ;;  %11453 = vst [vmem:[#allocation48_spill] sm:$0xff] %v10143_v29 }
 0x271   :  { %3266 = vmatpush1.bf16.msra.mxu0 %v10090_v26  ;;  %v10131_v26 = vld [vmem:[#allocation11 + $0x2ac] ss:$24 sps:$4 sm:$0xff]  }
 0x272   :  { %3267 = vmatprep.subr.bf16.mxu0 %v10099_v15  ;;  %v10128_v15 = vld [vmem:[#allocation11 + $0x2a4] ss:$24 sps:$4 sm:$0xff]   ;;  %11451 = vst [vmem:[#allocation46_spill] sm:$0xff] %v10131_v26 }
 0x273   :  { %3232 = vmatprep.subr.bf16.mxu1 %v10128_v15 }
 0x274   :  { %3233 = vmatpush1.bf16.msra.mxu1 %v10134_v23 }
 0x275   :  { %3268 = vmatpush1.bf16.msra.mxu0 %v10102_v38  ;;  %v10126_v38 = vld [vmem:[#allocation11 + $0x278] ss:$24 sps:$4 sm:$0xff]  }
 0x276   :  { %3269 = vmatprep.subr.bf16.mxu0 %v10113_v48  ;;  %11450 = vst [vmem:[#allocation45_spill] sm:$0xff] %v10126_v38  ;;  %v10138_v48 = vld [vmem:[#allocation11 + $0x2a8] ss:$24 sps:$4 sm:$0xff]  }
 0x277   :  { %11452 = vst [vmem:[#allocation47_spill] sm:$0xff] %v10138_v48 }
 0x279   :  { %3270 = vmatpush1.bf16.msra.mxu0 %v10111_v39  ;;  %v10140_v39 = vld [vmem:[#allocation11 + $0x2d4] ss:$24 sps:$4 sm:$0xff]  }
 0x27a   :  { %3271 = vmatprep.subr.bf16.mxu0 %v10118_v52  ;;  %v10146_v52 = vld [vmem:[#allocation11 + $0x2d0] ss:$24 sps:$4 sm:$0xff]   ;;  %3234 = vmatprep.subr.bf16.mxu1 %v10140_v39 }
 0x27b   :  { %3235 = vmatpush1.bf16.msra.mxu1 %v10146_v52 }
 0x27d   :  { %3272 = vmatpush1.bf16.msra.mxu0 %v10126_v38  ;;  %v10155_v38 = vld [vmem:[#allocation11 + $0x14] ss:$24 sps:$4 sm:$0xff]  }
 0x27e   :  { %3273 = vmatprep.subr.bf16.mxu0 %v10131_v26  ;;  %11455 = vst [vmem:[#allocation50_spill] sm:$0xff] %v10155_v38  ;;  %3286 = vmatprep.subr.bf16.mxu1 %v10155_v38 }
 0x281   :  { %3274 = vmatpush1.bf16.msra.mxu0 %v10138_v48  ;;  %v1861_v48 = vld [vmem:[%s11316_s6] sm:$0x3f] }
 0x282   :  { %3275 = vmatprep.subr.bf16.mxu0 %v10143_v29  ;;  %v2346_v26 = vrot.slane %v1861_v48, %v9684_v14  ;;  %v2354_v37 = vrot.slane %v1861_v48, %v9894_v10  ;;  %v2350_v29 = vrot.slane %v1861_v48, %v9671_v42  ;;  %v2358_v33 = vrot.slane %v1861_v48, %v9900_v16  ;;  %v1749_v16 = vld [vmem:[#allocation3 + $0x1] ss:$8 sm:$0xf] }
 0x283   :  { %v1751_v57 = vor.u32 %v1750_v3, %v1749_v16 }
 0x285   :  { %3276 = vmatpush1.bf16.msra.mxu0 %v10150_v47 }
 0x286   :  { %4035 = vmatprep.subr.bf16.mxu0 %v9965_v55 }
 0x2db   :  { %v2407_v22 = vpop.f32.mrb[12].mxu0  ;;  %v2448_v47 = vpop.f32.mrb[12].mxu1 }
 0x2dc   :  { %v2408_v12 = vadd.f32 %v2407_v22, %v2346_v26  ;;  %v2449_v6 = vadd.f32 %v2448_v47, %v2354_v37  ;;  %v2409_v2 = vpop.f32.mrb[13].mxu0  ;;  %v2450_v55 = vpop.f32.mrb[13].mxu1 }
 0x2dd   :  { %v2410_v62 = vadd.f32 %v2409_v2, %v2350_v29  ;;  %v2451_v60 = vadd.f32 %v2450_v55, %v2358_v33  ;;  %v2411_v56 = vpop.f32.mrb[14].mxu0  ;;  %v2452_v35 = vpop.f32.mrb[14].mxu1 }
 0x2de   :  { %v2412_v27 = vpop.f32.mrb[15].mxu0  ;;  %v2453_v17 = vpop.f32.mrb[15].mxu1  ;;  %v2522_v56 = vrot.slane %v1751_v57, 2 }
 0x2df   :  { %v2498_v11 = vcombine.low %v2408_v12, %v2410_v62  ;;  %v2526_v7 = vcombine.low %v2449_v6, %v2451_v60  ;;  %v2366_v62 = vrot.slane %v1861_v48, %v9910_v30 }
 0x2e1   :  { %v2505_v10 = vrot.slane %v2498_v11, %v9920_v19  ;;  %v2533_v22 = vrot.slane %v2526_v7, %v9920_v19  ;;  %v2362_v11 = vrot.slane %v1861_v48, %v9907_v28 }
 0x2e3   :  { %v2512_v63 = vrot.slane %v2505_v10, %v9920_v19  ;;  %v2540_v2 = vrot.slane %v2533_v22, %v9920_v19  ;;  %v2568_v22 = vrot.slane %v1751_v57, 4 }
 0x2e5   :  { %v2514_v38 = vadd.f32 %v2512_v63, %v1751_v57  ;;  %v2542_v35 = vadd.f32 %v2540_v2, %v2522_v56 }
 0x2e7   :  { %v7918_v37 = vmul.f32 -1.442695, %v2514_v38  ;;  %v7919_v27 = vmul.f32 -1.442695, %v2542_v35 }
 0x2e9   :  { %9256 = vpow2.f32 %v7918_v37 }
 0x2ea   :  { %9258 = vpow2.f32 %v7919_v27 }
 0x2f3   :  { %v9257_v17 = vpop.eup %9256 }
 0x2f4   :  { %v2518_v60 = vadd.f32 1.0, %v9257_v17  ;;  %v9259_v6 = vpop.eup %9258 }
 0x2f5   :  { %v2546_v47 = vadd.f32 1.0, %v9259_v6  ;;  %v10209_v6 = vld [vmem:[#allocation11 + $0xa0] ss:$24 sps:$4 sm:$0xff]  }
 0x2f6   :  { %9260 = vrcp.f32 %v2518_v60 }
 0x2f7   :  { %9262 = vrcp.f32 %v2546_v47  ;;  %v11466_v47 = vld [vmem:[#allocation28_spill] sm:$0xff] }
 0x300   :  { %v9261_v38 = vpop.eup %9260 }
 0x301   :  { %v9263_v48 = vpop.eup %9262 }
 0x302   :  { %v2572_v2 = vsub.f32 1.0, %v9263_v48  ;;  %v2574_v27 = vmul.f32 %v9263_v48, %v9935_v49  ;;  %v10193_v49 = vld [vmem:[#allocation11 + $0x40] ss:$24 sps:$4 sm:$0xff]  }
 0x303   :  { %v11473_v48 = vld [vmem:[#allocation35_spill] sm:$0xff] }
 0x31b   :  { %v2489_v10 = vpop.f32.mrb[16].mxu0 }
 0x31c   :  { %v2490_v16 = vadd.f32 %v2489_v10, %v2362_v11  ;;  %v2491_v63 = vpop.f32.mrb[17].mxu0 }
 0x31d   :  { %v2492_v3 = vadd.f32 %v2491_v63, %v2366_v62  ;;  %v2493_v7 = vpop.f32.mrb[18].mxu0  ;;  %v10184_v62 = vld [vmem:[#allocation11 + $0x10] ss:$24 sps:$4 sm:$0xff]   ;;  %v10196_v63 = vld [vmem:[#allocation11 + $0x74] ss:$24 sps:$4 sm:$0xff]  }
 0x31e   :  { %v2494_v12 = vpop.f32.mrb[19].mxu0  ;;  %v10204_v7 = vld [vmem:[#allocation11 + $0xa4] ss:$24 sps:$4 sm:$0xff]  }
 0x31f   :  { %v2551_v33 = vcombine.low %v2490_v16, %v2492_v3  ;;  %v10188_v16 = vld [vmem:[#allocation11 + $0x44] ss:$24 sps:$4 sm:$0xff]   ;;  %v10201_v3 = vld [vmem:[#allocation11 + $0x70] ss:$24 sps:$4 sm:$0xff]  }
 0x320   :  { %v11460_v12 = vld [vmem:[#allocation22_spill] sm:$0xff] }
 0x321   :  { %v2558_v29 = vrot.slane %v2551_v33, %v9920_v19  ;;  %v11463_v33 = vld [vmem:[#allocation25_spill] sm:$0xff] }
 0x323   :  { %v2565_v26 = vrot.slane %v2558_v29, %v9920_v19  ;;  %v11467_v29 = vld [vmem:[#allocation29_spill] sm:$0xff] }
 0x325   :  { %v2567_v55 = vmul.f32 %v9261_v38, %v2565_v26  ;;  %v11468_v26 = vld [vmem:[#allocation30_spill] sm:$0xff]  ;;  %v11469_v38 = vld [vmem:[#allocation31_spill] sm:$0xff] }
 0x327   :  { %v2570_v37 = vadd.f32 %v2568_v22, %v2567_v55  ;;  %v11470_v55 = vld [vmem:[#allocation32_spill] sm:$0xff]  ;;  %v11471_v22 = vld [vmem:[#allocation33_spill] sm:$0xff] }
 0x329   :  { %9264 = vtanh.f32 %v2570_v37  ;;  %v11472_v37 = vld [vmem:[#allocation34_spill] sm:$0xff] }
 0x333   :  { %v9265_v56 = vpop.eup %9264 }
 0x334   :  { %v2573_v35 = vmul.f32 %v9265_v56, %v2572_v2  ;;  %v11474_v2 = vld [vmem:[#allocation36_spill] sm:$0xff]  ;;  %v11475_v56 = vld [vmem:[#allocation37_spill] sm:$0xff] }
 0x336   :  { %v10175_v17 = vadd.f32 %v2574_v27, %v2573_v35  ;;  %v11476_v35 = vld [vmem:[#allocation38_spill] sm:$0xff]  ;;  %v11477_v27 = vld [vmem:[#allocation39_spill] sm:$0xff] }
 0x338   :  { %2577 = vst.msk [vmem:[#allocation12 + $0x1] ss:$8 sm:$0x3] %vm9633_vm0, %v10175_v17  ;;  %v2591_v60 = vrot.slane %v10175_v17, %v9671_v42  ;;  %v2587_v57 = vrot.slane %v10175_v17, %v9684_v14 }
 0x33a   :  { %v2595_v11 = vpack.c.bf16 %v2591_v60, %v2591_v60  ;;  %v10186_v10 = vpack.c.bf16 %v2587_v57, %v2587_v57  ;;  %v11478_v60 = vld [vmem:[#allocation40_spill] sm:$0xff]  ;;  %v11479_v57 = vld [vmem:[#allocation41_spill] sm:$0xff] }
 0x33c   :  { %3236 = vmatprep.mubr.bf16.mxu1 %v2595_v11  ;;  %3277 = vmatprep.mubr.bf16.mxu0 %v2595_v11 }
 0x33d   :  { %3237 = vmatmul.mubr.bf16.vlgmr.msra.gmra.mrb[16].mxu1 %v10186_v10  ;;  %3278 = vmatmul.mubr.bf16.vlgmr.msra.gmra.mrb[20].mxu0 %v10186_v10 }
 0x33e   :  { %3287 = vmatpush1.bf16.msra.mxu1 %v10184_v62  ;;  %3318 = vmatprep.mubr.bf16.mxu1 %v2595_v11  ;;  %v11480_v11 = vld [vmem:[#allocation43_spill] sm:$0xff] }
 0x33f   :  { %3288 = vmatprep.subr.bf16.mxu1 %v10188_v16  ;;  %4036 = vmatpush1.bf16.msra.mxu0 %v9963_v53  ;;  %v10212_v53 = vld [vmem:[#allocation11 + $0xd4] ss:$24 sps:$4 sm:$0xff]  }
 0x340   :  { %4037 = vmatprep.subr.bf16.mxu0 %v9971_v61  ;;  %v10217_v61 = vld [vmem:[#allocation11 + $0xd0] ss:$24 sps:$4 sm:$0xff]  }
 0x342   :  { %3289 = vmatpush1.bf16.msra.mxu1 %v10193_v49 }
 0x343   :  { %3290 = vmatprep.subr.bf16.mxu1 %v10196_v63  ;;  %4038 = vmatpush1.bf16.msra.mxu0 %v9978_v1  ;;  %v10220_v1 = vld [vmem:[#allocation11 + $0x104] ss:$24 sps:$4 sm:$0xff]  }
 0x344   :  { %4039 = vmatprep.subr.bf16.mxu0 %v9984_v5  ;;  %v10225_v5 = vld [vmem:[#allocation11 + $0x100] ss:$24 sps:$4 sm:$0xff]  }
 0x346   :  { %3291 = vmatpush1.bf16.msra.mxu1 %v10201_v3 }
 0x347   :  { %3292 = vmatprep.subr.bf16.mxu1 %v10204_v7  ;;  %4040 = vmatpush1.bf16.msra.mxu0 %v9990_v9  ;;  %v10228_v9 = vld [vmem:[#allocation11 + $0x134] ss:$24 sps:$4 sm:$0xff]  }
 0x348   :  { %4041 = vmatprep.subr.bf16.mxu0 %v9996_v13  ;;  %v10233_v13 = vld [vmem:[#allocation11 + $0x130] ss:$24 sps:$4 sm:$0xff]  }
 0x34a   :  { %3293 = vmatpush1.bf16.msra.mxu1 %v10209_v6 }
 0x34b   :  { %3294 = vmatprep.subr.bf16.mxu1 %v10212_v53  ;;  %4042 = vmatpush1.bf16.msra.mxu0 %v10002_v20  ;;  %v10236_v20 = vld [vmem:[#allocation11 + $0x164] ss:$24 sps:$4 sm:$0xff]  }
 0x34c   :  { %4043 = vmatprep.subr.bf16.mxu0 %v10008_v31  ;;  %v10241_v31 = vld [vmem:[#allocation11 + $0x160] ss:$24 sps:$4 sm:$0xff]  }
 0x34e   :  { %3295 = vmatpush1.bf16.msra.mxu1 %v10217_v61 }
 0x34f   :  { %3296 = vmatprep.subr.bf16.mxu1 %v10220_v1  ;;  %4044 = vmatpush1.bf16.msra.mxu0 %v10014_v40  ;;  %v10244_v40 = vld [vmem:[#allocation11 + $0x194] ss:$24 sps:$4 sm:$0xff]  }
 0x350   :  { %4045 = vmatprep.subr.bf16.mxu0 %v10020_v58  ;;  %v10249_v58 = vld [vmem:[#allocation11 + $0x190] ss:$24 sps:$4 sm:$0xff]  }
 0x352   :  { %3297 = vmatpush1.bf16.msra.mxu1 %v10225_v5 }
 0x353   :  { %3298 = vmatprep.subr.bf16.mxu1 %v10228_v9  ;;  %4046 = vmatpush1.bf16.msra.mxu0 %v10026_v32  ;;  %v10252_v32 = vld [vmem:[#allocation11 + $0x1c4] ss:$24 sps:$4 sm:$0xff]  }
 0x354   :  { %4047 = vmatprep.subr.bf16.mxu0 %v10032_v0  ;;  %v10257_v0 = vld [vmem:[#allocation11 + $0x1c0] ss:$24 sps:$4 sm:$0xff]  }
 0x356   :  { %3299 = vmatpush1.bf16.msra.mxu1 %v10233_v13 }
 0x357   :  { %3300 = vmatprep.subr.bf16.mxu1 %v10236_v20  ;;  %4048 = vmatpush1.bf16.msra.mxu0 %v10038_v4  ;;  %v10260_v4 = vld [vmem:[#allocation11 + $0x1f4] ss:$24 sps:$4 sm:$0xff]  }
 0x358   :  { %4049 = vmatprep.subr.bf16.mxu0 %v10044_v8  ;;  %v10265_v8 = vld [vmem:[#allocation11 + $0x1f0] ss:$24 sps:$4 sm:$0xff]  }
 0x35a   :  { %3301 = vmatpush1.bf16.msra.mxu1 %v10241_v31 }
 0x35b   :  { %3302 = vmatprep.subr.bf16.mxu1 %v10244_v40  ;;  %4050 = vmatpush1.bf16.msra.mxu0 %v10050_v18  ;;  %v10268_v18 = vld [vmem:[#allocation11 + $0x224] ss:$24 sps:$4 sm:$0xff]  }
 0x35c   :  { %4051 = vmatprep.subr.bf16.mxu0 %v10059_v21  ;;  %v10273_v21 = vld [vmem:[#allocation11 + $0x220] ss:$24 sps:$4 sm:$0xff]  }
 0x35e   :  { %3303 = vmatpush1.bf16.msra.mxu1 %v10249_v58 }
 0x35f   :  { %3304 = vmatprep.subr.bf16.mxu1 %v10252_v32  ;;  %4052 = vmatpush1.bf16.msra.mxu0 %v10061_v24  ;;  %v10276_v24 = vld [vmem:[#allocation11 + $0x254] ss:$24 sps:$4 sm:$0xff]  }
 0x360   :  { %4053 = vmatprep.subr.bf16.mxu0 %v10071_v43  ;;  %v10281_v43 = vld [vmem:[#allocation11 + $0x250] ss:$24 sps:$4 sm:$0xff]  }
 0x362   :  { %3305 = vmatpush1.bf16.msra.mxu1 %v10257_v0 }
 0x363   :  { %3306 = vmatprep.subr.bf16.mxu1 %v10260_v4  ;;  %4054 = vmatpush1.bf16.msra.mxu0 %v10073_v46  ;;  %v10284_v46 = vld [vmem:[#allocation11 + $0x284] ss:$24 sps:$4 sm:$0xff]  }
 0x364   :  { %4055 = vmatprep.subr.bf16.mxu0 %v10083_v51  ;;  %v10289_v51 = vld [vmem:[#allocation11 + $0x280] ss:$24 sps:$4 sm:$0xff]  }
 0x366   :  { %3307 = vmatpush1.bf16.msra.mxu1 %v10265_v8 }
 0x367   :  { %3308 = vmatprep.subr.bf16.mxu1 %v10268_v18  ;;  %4056 = vmatpush1.bf16.msra.mxu0 %v10085_v36  ;;  %v10292_v36 = vld [vmem:[#allocation11 + $0x2b4] ss:$24 sps:$4 sm:$0xff]  }
 0x368   :  { %4057 = vmatprep.subr.bf16.mxu0 %v10095_v25  ;;  %v10297_v25 = vld [vmem:[#allocation11 + $0x2b0] ss:$24 sps:$4 sm:$0xff]  }
 0x36a   :  { %3309 = vmatpush1.bf16.msra.mxu1 %v10273_v21 }
 0x36b   :  { %3310 = vmatprep.subr.bf16.mxu1 %v10276_v24  ;;  %4058 = vmatpush1.bf16.msra.mxu0 %v10097_v34  ;;  %v10300_v34 = vld [vmem:[#allocation11 + $0x2e4] ss:$24 sps:$4 sm:$0xff]  }
 0x36c   :  { %4059 = vmatprep.subr.bf16.mxu0 %v10108_v44  ;;  %v10305_v44 = vld [vmem:[#allocation11 + $0x2e0] ss:$24 sps:$4 sm:$0xff]  }
 0x36e   :  { %3311 = vmatpush1.bf16.msra.mxu1 %v10281_v43 }
 0x36f   :  { %3312 = vmatprep.subr.bf16.mxu1 %v10284_v46  ;;  %4060 = vmatpush1.bf16.msra.mxu0 %v10106_v41  ;;  %v11456_v41 = vld [vmem:[#allocation50_spill] sm:$0xff] }
 0x370   :  { %4061 = vmatprep.subr.bf16.mxu0 %v10115_v50  ;;  %v11458_v50 = vld [vmem:[#allocation20_spill] sm:$0xff] }
 0x372   :  { %3313 = vmatpush1.bf16.msra.mxu1 %v10289_v51 }
 0x373   :  { %3314 = vmatprep.subr.bf16.mxu1 %v10292_v36  ;;  %4062 = vmatpush1.bf16.msra.mxu0 %v10122_v54  ;;  %v11459_v54 = vld [vmem:[#allocation21_spill] sm:$0xff] }
 0x374   :  { %4063 = vmatprep.subr.bf16.mxu0 %v10128_v15  ;;  %v11457_v15 = vld [vmem:[#allocation19_spill] sm:$0xff] }
 0x376   :  { %3315 = vmatpush1.bf16.msra.mxu1 %v10297_v25 }
 0x377   :  { %3316 = vmatprep.subr.bf16.mxu1 %v10300_v34  ;;  %4064 = vmatpush1.bf16.msra.mxu0 %v10134_v23  ;;  %v11461_v23 = vld [vmem:[#allocation23_spill] sm:$0xff] }
 0x378   :  { %4065 = vmatprep.subr.bf16.mxu0 %v10140_v39  ;;  %v11462_v39 = vld [vmem:[#allocation24_spill] sm:$0xff] }
 0x37a   :  { %3317 = vmatpush1.bf16.msra.mxu1 %v10305_v44 }
 0x37b   :  { %4076 = vmatprep.subr.bf16.mxu1 %v9969_v59  ;;  %4066 = vmatpush1.bf16.msra.mxu0 %v10146_v52  ;;  %v11464_v59 = vld [vmem:[#allocation26_spill] sm:$0xff]  ;;  %v11465_v52 = vld [vmem:[#allocation27_spill] sm:$0xff] }
 0x37c   :  { %4117 = vmatprep.subr.bf16.mxu0 %v11456_v41  ;;  %v11482_v41 = vld [vmem:[#allocation44_spill] sm:$0xff] }
 0x37d   :  { %3319 = vmatmul.mubr.bf16.vlgmr.msra.gmra.mrb[20].mxu1 %v10186_v10  ;;  %v11481_v10 = vld [vmem:[#allocation42_spill] sm:$0xff] }
 0x37e   :  { %4077 = vmatpush1.bf16.msra.mxu1 %v11457_v15  ;;  %v11483_v15 = vld [vmem:[#allocation45_spill] sm:$0xff] }
 0x37f   :  { %4078 = vmatprep.subr.bf16.mxu1 %v11458_v50  ;;  %v11484_v50 = vld [vmem:[#allocation46_spill] sm:$0xff] }
 0x382   :  { %4079 = vmatpush1.bf16.msra.mxu1 %v11459_v54  ;;  %v11485_v54 = vld [vmem:[#allocation47_spill] sm:$0xff] }
 0x383   :  { %4080 = vmatprep.subr.bf16.mxu1 %v11460_v12  ;;  %v11486_v12 = vld [vmem:[#allocation48_spill] sm:$0xff] }
 0x386   :  { %4081 = vmatpush1.bf16.msra.mxu1 %v11461_v23  ;;  %v11487_v23 = vld [vmem:[#allocation49_spill] sm:$0xff] }
 0x387   :  { %4082 = vmatprep.subr.bf16.mxu1 %v11462_v39  ;;  %v2692_v39 = vld [vmem:[%s11316_s6] sm:$0x3f] }
 0x38a   :  { %4083 = vmatpush1.bf16.msra.mxu1 %v11463_v33  ;;  %v3177_v33 = vrot.slane %v2692_v39, %v9684_v14 }
 0x38b   :  { %4084 = vmatprep.subr.bf16.mxu1 %v11464_v59  ;;  %v11488_v59 = vld [vmem:[#allocation17_spill] sm:$0xff] }
 0x38e   :  { %4085 = vmatpush1.bf16.msra.mxu1 %v11465_v52  ;;  %v3185_v52 = vrot.slane %v2692_v39, %v11488_v59 }
 0x38f   :  { %4086 = vmatprep.subr.bf16.mxu1 %v11466_v47  ;;  %v3181_v47 = vrot.slane %v2692_v39, %v9671_v42 }
 0x392   :  { %4087 = vmatpush1.bf16.msra.mxu1 %v11467_v29  ;;  %v11489_v29 = vld [vmem:[#allocation18_spill] sm:$0xff] }
 0x393   :  { %4088 = vmatprep.subr.bf16.mxu1 %v11468_v26  ;;  %v3189_v26 = vrot.slane %v2692_v39, %v11489_v29 }
 0x396   :  { %4089 = vmatpush1.bf16.msra.mxu1 %v11469_v38 }
 0x397   :  { %4090 = vmatprep.subr.bf16.mxu1 %v11470_v55 }
 0x39a   :  { %4091 = vmatpush1.bf16.msra.mxu1 %v11471_v22 }
 0x39b   :  { %4092 = vmatprep.subr.bf16.mxu1 %v11472_v37 }
 0x39e   :  { %4093 = vmatpush1.bf16.msra.mxu1 %v11473_v48 }
 0x39f   :  { %4094 = vmatprep.subr.bf16.mxu1 %v11474_v2 }
 0x3a2   :  { %4095 = vmatpush1.bf16.msra.mxu1 %v11475_v56 }
 0x3a3   :  { %4096 = vmatprep.subr.bf16.mxu1 %v11476_v35 }
 0x3a6   :  { %4097 = vmatpush1.bf16.msra.mxu1 %v11477_v27 }
 0x3a7   :  { %4098 = vmatprep.subr.bf16.mxu1 %v11478_v60 }
 0x3aa   :  { %4099 = vmatpush1.bf16.msra.mxu1 %v11479_v57 }
 0x3ab   :  { %4100 = vmatprep.subr.bf16.mxu1 %v11480_v11 }
 0x3ae   :  { %4101 = vmatpush1.bf16.msra.mxu1 %v11481_v10 }
 0x3af   :  { %4102 = vmatprep.subr.bf16.mxu1 %v11482_v41 }
 0x3b2   :  { %4103 = vmatpush1.bf16.msra.mxu1 %v11483_v15 }
 0x3b3   :  { %4104 = vmatprep.subr.bf16.mxu1 %v11484_v50  ;;  %v2581_v50 = vld [vmem:[#allocation3 + $0x2] ss:$8 sm:$0x30] }
 0x3b6   :  { %4105 = vmatpush1.bf16.msra.mxu1 %v11485_v54 }
 0x3b7   :  { %4106 = vmatprep.subr.bf16.mxu1 %v11486_v12  ;;  %v2580_v12 = vld [vmem:[#allocation3 + $0x2] ss:$8 sm:$0xf] }
 0x3ba   :  { %4107 = vmatpush1.bf16.msra.mxu1 %v11487_v23  ;;  %v2582_v23 = vor.u32 %v2581_v50, %v2580_v12 }
 0x410   :  { %v3238_v38 = vpop.f32.mrb[16].mxu1  ;;  %v3279_v55 = vpop.f32.mrb[20].mxu0 }
 0x411   :  { %v3239_v22 = vadd.f32 %v3238_v38, %v3177_v33  ;;  %v3280_v37 = vadd.f32 %v3279_v55, %v3185_v52  ;;  %v3240_v48 = vpop.f32.mrb[17].mxu1  ;;  %v3281_v2 = vpop.f32.mrb[21].mxu0 }
 0x412   :  { %v3241_v56 = vadd.f32 %v3240_v48, %v3181_v47  ;;  %v3282_v35 = vadd.f32 %v3281_v2, %v3189_v26  ;;  %v3242_v27 = vpop.f32.mrb[18].mxu1  ;;  %v3283_v60 = vpop.f32.mrb[22].mxu0  ;;  %v3353_v26 = vrot.slane %v2582_v23, 2  ;;  %v3197_v2 = vrot.slane %v2692_v39, %v9910_v30 }
 0x413   :  { %v3243_v57 = vpop.f32.mrb[19].mxu1  ;;  %v3284_v11 = vpop.f32.mrb[23].mxu0 }
 0x414   :  { %v3329_v10 = vcombine.low %v3239_v22, %v3241_v56  ;;  %v3357_v41 = vcombine.low %v3280_v37, %v3282_v35  ;;  %v3193_v37 = vrot.slane %v2692_v39, %v9907_v28 }
 0x416   :  { %v3336_v15 = vrot.slane %v3329_v10, %v9920_v19  ;;  %v3364_v33 = vrot.slane %v3357_v41, %v9920_v19 }
 0x418   :  { %v3343_v54 = vrot.slane %v3336_v15, %v9920_v19  ;;  %v3371_v47 = vrot.slane %v3364_v33, %v9920_v19  ;;  %v3399_v33 = vrot.slane %v2582_v23, 4 }
 0x41a   :  { %v3345_v29 = vadd.f32 %v3343_v54, %v2582_v23  ;;  %v3373_v38 = vadd.f32 %v3371_v47, %v3353_v26 }
 0x41c   :  { %v8016_v52 = vmul.f32 -1.442695, %v3345_v29  ;;  %v8017_v55 = vmul.f32 -1.442695, %v3373_v38 }
 0x41e   :  { %9266 = vpow2.f32 %v8016_v52 }
 0x41f   :  { %9268 = vpow2.f32 %v8017_v55 }
 0x428   :  { %v9267_v48 = vpop.eup %9266 }
 0x429   :  { %v3349_v22 = vadd.f32 1.0, %v9267_v48  ;;  %v9269_v29 = vpop.eup %9268 }
 0x42a   :  { %v3377_v41 = vadd.f32 1.0, %v9269_v29  ;;  %v10512_v29 = vld [vmem:[#allocation11 + $0x1b0] ss:$24 sps:$4 sm:$0xff]  }
 0x42b   :  { %9270 = vrcp.f32 %v3349_v22 }
 0x42c   :  { %9272 = vrcp.f32 %v3377_v41  ;;  %v10522_v41 = vld [vmem:[#allocation11 + $0x1e4] ss:$24 sps:$4 sm:$0xff]  }
 0x435   :  { %v9271_v54 = vpop.eup %9270 }
 0x436   :  { %v9273_v39 = vpop.eup %9272 }
 0x437   :  { %v3403_v47 = vsub.f32 1.0, %v9273_v39  ;;  %v3405_v55 = vmul.f32 %v9273_v39, %v10175_v17  ;;  %v10402_v17 = vld [vmem:[#allocation11] ss:$24 sps:$4 sm:$0xff]  }
 0x438   :  { %v10541_v39 = vld [vmem:[#allocation11 + $0x218] ss:$24 sps:$4 sm:$0xff]  }
 0x439   :  { %11512 = vst [vmem:[#allocation40_spill] sm:$0xff] %v10541_v39 }
 0x450   :  { %v3320_v56 = vpop.f32.mrb[20].mxu1 }
 0x451   :  { %v3321_v35 = vadd.f32 %v3320_v56, %v3193_v37  ;;  %v3322_v27 = vpop.f32.mrb[21].mxu1  ;;  %v10498_v56 = vld [vmem:[#allocation11 + $0x184] ss:$24 sps:$4 sm:$0xff]  }
 0x452   :  { %v3323_v60 = vadd.f32 %v3322_v27, %v3197_v2  ;;  %v3324_v57 = vpop.f32.mrb[22].mxu1  ;;  %v10502_v27 = vld [vmem:[#allocation11 + $0x18c] ss:$24 sps:$4 sm:$0xff]  }
 0x453   :  { %v3325_v11 = vpop.f32.mrb[23].mxu1  ;;  %11505 = vst [vmem:[#allocation33_spill] sm:$0xff] %v10502_v27  ;;  %v10510_v57 = vld [vmem:[#allocation11 + $0x1b4] ss:$24 sps:$4 sm:$0xff]  }
 0x454   :  { %v3382_v10 = vcombine.low %v3321_v35, %v3323_v60  ;;  %v10500_v35 = vld [vmem:[#allocation11 + $0x180] ss:$24 sps:$4 sm:$0xff]   ;;  %v10514_v11 = vld [vmem:[#allocation11 + $0x1bc] ss:$24 sps:$4 sm:$0xff]  }
 0x455   :  { %v10505_v60 = vld [vmem:[#allocation11 + $0x188] ss:$24 sps:$4 sm:$0xff]   ;;  %11507 = vst [vmem:[#allocation35_spill] sm:$0xff] %v10514_v11 }
 0x456   :  { %v3389_v15 = vrot.slane %v3382_v10, %v9920_v19  ;;  %11506 = vst [vmem:[#allocation34_spill] sm:$0xff] %v10505_v60  ;;  %v10517_v10 = vld [vmem:[#allocation11 + $0x1b8] ss:$24 sps:$4 sm:$0xff]  }
 0x457   :  { %11508 = vst [vmem:[#allocation36_spill] sm:$0xff] %v10517_v10 }
 0x458   :  { %v3396_v50 = vrot.slane %v3389_v15, %v9920_v19  ;;  %v10524_v15 = vld [vmem:[#allocation11 + $0x1e0] ss:$24 sps:$4 sm:$0xff]  }
 0x45a   :  { %v3398_v12 = vmul.f32 %v9271_v54, %v3396_v50  ;;  %v10526_v50 = vld [vmem:[#allocation11 + $0x1ec] ss:$24 sps:$4 sm:$0xff]   ;;  %v10529_v54 = vld [vmem:[#allocation11 + $0x1e8] ss:$24 sps:$4 sm:$0xff]  }
 0x45b   :  { %11509 = vst [vmem:[#allocation37_spill] sm:$0xff] %v10526_v50  ;;  %11510 = vst [vmem:[#allocation38_spill] sm:$0xff] %v10529_v54 }
 0x45c   :  { %v3401_v52 = vadd.f32 %v3399_v33, %v3398_v12  ;;  %v10534_v12 = vld [vmem:[#allocation11 + $0x214] ss:$24 sps:$4 sm:$0xff]   ;;  %v10536_v33 = vld [vmem:[#allocation11 + $0x210] ss:$24 sps:$4 sm:$0xff]  }
 0x45e   :  { %9274 = vtanh.f32 %v3401_v52  ;;  %v10538_v52 = vld [vmem:[#allocation11 + $0x21c] ss:$24 sps:$4 sm:$0xff]  }
 0x45f   :  { %11511 = vst [vmem:[#allocation39_spill] sm:$0xff] %v10538_v52 }
 0x468   :  { %v9275_v26 = vpop.eup %9274 }
 0x469   :  { %v3404_v38 = vmul.f32 %v9275_v26, %v3403_v47  ;;  %v10545_v47 = vld [vmem:[#allocation11 + $0x240] ss:$24 sps:$4 sm:$0xff]   ;;  %v10547_v26 = vld [vmem:[#allocation11 + $0x244] ss:$24 sps:$4 sm:$0xff]  }
 0x46b   :  { %v10362_v48 = vadd.f32 %v3405_v55, %v3404_v38  ;;  %v10550_v38 = vld [vmem:[#allocation11 + $0x248] ss:$24 sps:$4 sm:$0xff]   ;;  %v10552_v55 = vld [vmem:[#allocation11 + $0x24c] ss:$24 sps:$4 sm:$0xff]  }
 0x46c   :  { %11513 = vst [vmem:[#allocation41_spill] sm:$0xff] %v10550_v38  ;;  %11514 = vst [vmem:[#allocation43_spill] sm:$0xff] %v10552_v55 }
 0x46d   :  { %3408 = vst.msk [vmem:[#allocation12 + $0x2] ss:$8 sm:$0x3] %vm9633_vm0, %v10362_v48  ;;  %v3422_v22 = vrot.slane %v10362_v48, %v9671_v42  ;;  %v3418_v23 = vrot.slane %v10362_v48, %v9684_v14 }
 0x46f   :  { %v3426_v37 = vpack.c.bf16 %v3422_v22, %v3422_v22  ;;  %v3425_v2 = vpack.c.bf16 %v3418_v23, %v3418_v23  ;;  %v10554_v22 = vld [vmem:[#allocation11 + $0x274] ss:$24 sps:$4 sm:$0xff]  }
 0x470   :  { %v10557_v23 = vld [vmem:[#allocation11 + $0x27c] ss:$24 sps:$4 sm:$0xff]  }
 0x471   :  { %4067 = vmatprep.mubr.bf16.mxu0 %v3426_v37  ;;  %4108 = vmatprep.mubr.bf16.mxu1 %v3426_v37  ;;  %11515 = vst [vmem:[#allocation42_spill] sm:$0xff] %v10557_v23 }
 0x472   :  { %4068 = vmatmul.mubr.bf16.vlgmr.msra.gmra.mrb[24].mxu0 %v3425_v2  ;;  %4109 = vmatmul.mubr.bf16.vlgmr.msra.gmra.mrb[24].mxu1 %v3425_v2 }
 0x473   :  { %4118 = vmatpush1.bf16.msra.mxu0 %v10184_v62  ;;  %4149 = vmatprep.mubr.bf16.mxu0 %v3426_v37  ;;  %v10404_v62 = vld [vmem:[#allocation11 + $0x4] ss:$24 sps:$4 sm:$0xff]   ;;  %v10561_v37 = vld [vmem:[#allocation11 + $0x270] ss:$24 sps:$4 sm:$0xff]  }
 0x474   :  { %4119 = vmatprep.subr.bf16.mxu0 %v10188_v16  ;;  %v10406_v16 = vld [vmem:[#allocation11 + $0x8] ss:$24 sps:$4 sm:$0xff]   ;;  %4866 = vmatprep.subr.bf16.mxu1 %v10404_v62 }
 0x475   :  { %11490 = vst [vmem:[#allocation50_spill] sm:$0xff] %v10406_v16  ;;  %4867 = vmatpush1.bf16.msra.mxu1 %v10402_v17 }
 0x477   :  { %4120 = vmatpush1.bf16.msra.mxu0 %v10193_v49  ;;  %v10408_v49 = vld [vmem:[#allocation11 + $0xc] ss:$24 sps:$4 sm:$0xff]  }
 0x478   :  { %4121 = vmatprep.subr.bf16.mxu0 %v10196_v63  ;;  %v10410_v63 = vld [vmem:[#allocation11 + $0x34] ss:$24 sps:$4 sm:$0xff]  }
 0x479   :  { %4868 = vmatprep.subr.bf16.mxu1 %v10410_v63 }
 0x47b   :  { %4122 = vmatpush1.bf16.msra.mxu0 %v10201_v3  ;;  %v10413_v3 = vld [vmem:[#allocation11 + $0x3c] ss:$24 sps:$4 sm:$0xff]  }
 0x47c   :  { %4123 = vmatprep.subr.bf16.mxu0 %v10204_v7  ;;  %11491 = vst [vmem:[#allocation19_spill] sm:$0xff] %v10413_v3  ;;  %v10417_v7 = vld [vmem:[#allocation11 + $0x30] ss:$24 sps:$4 sm:$0xff]  }
 0x47d   :  { %4869 = vmatpush1.bf16.msra.mxu1 %v10417_v7 }
 0x47f   :  { %4124 = vmatpush1.bf16.msra.mxu0 %v10209_v6  ;;  %v10421_v6 = vld [vmem:[#allocation11 + $0x38] ss:$24 sps:$4 sm:$0xff]  }
 0x480   :  { %4125 = vmatprep.subr.bf16.mxu0 %v10212_v53  ;;  %11492 = vst [vmem:[#allocation20_spill] sm:$0xff] %v10421_v6  ;;  %v10423_v53 = vld [vmem:[#allocation11 + $0x64] ss:$24 sps:$4 sm:$0xff]  }
 0x481   :  { %4870 = vmatprep.subr.bf16.mxu1 %v10423_v53 }
 0x483   :  { %4126 = vmatpush1.bf16.msra.mxu0 %v10217_v61  ;;  %v10426_v61 = vld [vmem:[#allocation11 + $0x6c] ss:$24 sps:$4 sm:$0xff]  }
 0x484   :  { %4127 = vmatprep.subr.bf16.mxu0 %v10220_v1  ;;  %11493 = vst [vmem:[#allocation21_spill] sm:$0xff] %v10426_v61  ;;  %v10429_v1 = vld [vmem:[#allocation11 + $0x60] ss:$24 sps:$4 sm:$0xff]  }
 0x485   :  { %4871 = vmatpush1.bf16.msra.mxu1 %v10429_v1 }
 0x487   :  { %4128 = vmatpush1.bf16.msra.mxu0 %v10225_v5  ;;  %v10433_v5 = vld [vmem:[#allocation11 + $0x68] ss:$24 sps:$4 sm:$0xff]  }
 0x488   :  { %4129 = vmatprep.subr.bf16.mxu0 %v10228_v9  ;;  %11494 = vst [vmem:[#allocation22_spill] sm:$0xff] %v10433_v5  ;;  %v10435_v9 = vld [vmem:[#allocation11 + $0x94] ss:$24 sps:$4 sm:$0xff]  }
 0x489   :  { %4872 = vmatprep.subr.bf16.mxu1 %v10435_v9 }
 0x48b   :  { %4130 = vmatpush1.bf16.msra.mxu0 %v10233_v13  ;;  %v10438_v13 = vld [vmem:[#allocation11 + $0x9c] ss:$24 sps:$4 sm:$0xff]  }
 0x48c   :  { %4131 = vmatprep.subr.bf16.mxu0 %v10236_v20  ;;  %11495 = vst [vmem:[#allocation23_spill] sm:$0xff] %v10438_v13  ;;  %v10441_v20 = vld [vmem:[#allocation11 + $0x90] ss:$24 sps:$4 sm:$0xff]  }
 0x48d   :  { %4873 = vmatpush1.bf16.msra.mxu1 %v10441_v20 }
 0x48f   :  { %4132 = vmatpush1.bf16.msra.mxu0 %v10241_v31  ;;  %v10445_v31 = vld [vmem:[#allocation11 + $0x98] ss:$24 sps:$4 sm:$0xff]  }
 0x490   :  { %4133 = vmatprep.subr.bf16.mxu0 %v10244_v40  ;;  %11496 = vst [vmem:[#allocation24_spill] sm:$0xff] %v10445_v31  ;;  %v10447_v40 = vld [vmem:[#allocation11 + $0xc4] ss:$24 sps:$4 sm:$0xff]  }
 0x491   :  { %4874 = vmatprep.subr.bf16.mxu1 %v10447_v40 }
 0x493   :  { %4134 = vmatpush1.bf16.msra.mxu0 %v10249_v58  ;;  %v10450_v58 = vld [vmem:[#allocation11 + $0xcc] ss:$24 sps:$4 sm:$0xff]  }
 0x494   :  { %4135 = vmatprep.subr.bf16.mxu0 %v10252_v32  ;;  %11497 = vst [vmem:[#allocation25_spill] sm:$0xff] %v10450_v58  ;;  %v10453_v32 = vld [vmem:[#allocation11 + $0xc0] ss:$24 sps:$4 sm:$0xff]  }
 0x495   :  { %4875 = vmatpush1.bf16.msra.mxu1 %v10453_v32 }
 0x497   :  { %4136 = vmatpush1.bf16.msra.mxu0 %v10257_v0  ;;  %v10457_v0 = vld [vmem:[#allocation11 + $0xc8] ss:$24 sps:$4 sm:$0xff]  }
 0x498   :  { %4137 = vmatprep.subr.bf16.mxu0 %v10260_v4  ;;  %11498 = vst [vmem:[#allocation26_spill] sm:$0xff] %v10457_v0  ;;  %v10459_v4 = vld [vmem:[#allocation11 + $0xf4] ss:$24 sps:$4 sm:$0xff]  }
 0x499   :  { %4876 = vmatprep.subr.bf16.mxu1 %v10459_v4 }
 0x49b   :  { %4138 = vmatpush1.bf16.msra.mxu0 %v10265_v8  ;;  %v10462_v8 = vld [vmem:[#allocation11 + $0xfc] ss:$24 sps:$4 sm:$0xff]  }
 0x49c   :  { %4139 = vmatprep.subr.bf16.mxu0 %v10268_v18  ;;  %11499 = vst [vmem:[#allocation27_spill] sm:$0xff] %v10462_v8  ;;  %v10465_v18 = vld [vmem:[#allocation11 + $0xf0] ss:$24 sps:$4 sm:$0xff]  }
 0x49d   :  { %4877 = vmatpush1.bf16.msra.mxu1 %v10465_v18 }
 0x49f   :  { %4140 = vmatpush1.bf16.msra.mxu0 %v10273_v21  ;;  %v10469_v21 = vld [vmem:[#allocation11 + $0xf8] ss:$24 sps:$4 sm:$0xff]  }
 0x4a0   :  { %4141 = vmatprep.subr.bf16.mxu0 %v10276_v24  ;;  %11500 = vst [vmem:[#allocation28_spill] sm:$0xff] %v10469_v21  ;;  %v10471_v24 = vld [vmem:[#allocation11 + $0x124] ss:$24 sps:$4 sm:$0xff]  }
 0x4a1   :  { %4878 = vmatprep.subr.bf16.mxu1 %v10471_v24 }
 0x4a3   :  { %4142 = vmatpush1.bf16.msra.mxu0 %v10281_v43  ;;  %v10474_v43 = vld [vmem:[#allocation11 + $0x12c] ss:$24 sps:$4 sm:$0xff]  }
 0x4a4   :  { %4143 = vmatprep.subr.bf16.mxu0 %v10284_v46  ;;  %11501 = vst [vmem:[#allocation29_spill] sm:$0xff] %v10474_v43  ;;  %v10477_v46 = vld [vmem:[#allocation11 + $0x120] ss:$24 sps:$4 sm:$0xff]  }
 0x4a5   :  { %4879 = vmatpush1.bf16.msra.mxu1 %v10477_v46 }
 0x4a7   :  { %4144 = vmatpush1.bf16.msra.mxu0 %v10289_v51  ;;  %v10481_v51 = vld [vmem:[#allocation11 + $0x128] ss:$24 sps:$4 sm:$0xff]  }
 0x4a8   :  { %4145 = vmatprep.subr.bf16.mxu0 %v10292_v36  ;;  %11502 = vst [vmem:[#allocation30_spill] sm:$0xff] %v10481_v51  ;;  %v10483_v36 = vld [vmem:[#allocation11 + $0x154] ss:$24 sps:$4 sm:$0xff]  }
 0x4a9   :  { %4880 = vmatprep.subr.bf16.mxu1 %v10483_v36 }
 0x4ab   :  { %4146 = vmatpush1.bf16.msra.mxu0 %v10297_v25  ;;  %v10486_v25 = vld [vmem:[#allocation11 + $0x15c] ss:$24 sps:$4 sm:$0xff]  }
 0x4ac   :  { %4147 = vmatprep.subr.bf16.mxu0 %v10300_v34  ;;  %11503 = vst [vmem:[#allocation31_spill] sm:$0xff] %v10486_v25  ;;  %v10489_v34 = vld [vmem:[#allocation11 + $0x150] ss:$24 sps:$4 sm:$0xff]  }
 0x4ad   :  { %4881 = vmatpush1.bf16.msra.mxu1 %v10489_v34 }
 0x4ae   :  { %4882 = vmatprep.subr.bf16.mxu1 %v10498_v56 }
 0x4af   :  { %4148 = vmatpush1.bf16.msra.mxu0 %v10305_v44  ;;  %v10493_v44 = vld [vmem:[#allocation11 + $0x158] ss:$24 sps:$4 sm:$0xff]  }
 0x4b0   :  { %4907 = vmatprep.subr.bf16.mxu0 %v10408_v49  ;;  %11504 = vst [vmem:[#allocation32_spill] sm:$0xff] %v10493_v44 }
 0x4b1   :  { %4883 = vmatpush1.bf16.msra.mxu1 %v10500_v35 }
 0x4b2   :  { %4150 = vmatmul.mubr.bf16.vlgmr.msra.gmra.mrb[28].mxu0 %v3425_v2  ;;  %4884 = vmatprep.subr.bf16.mxu1 %v10510_v57  ;;  %v10565_v2 = vld [vmem:[#allocation11 + $0x278] ss:$24 sps:$4 sm:$0xff]  }
 0x4b3   :  { %4908 = vmatpush1.bf16.msra.mxu0 %v10406_v16  ;;  %11516 = vst [vmem:[#allocation44_spill] sm:$0xff] %v10565_v2 }
 0x4b4   :  { %4909 = vmatprep.subr.bf16.mxu0 %v10413_v3 }
 0x4b5   :  { %4885 = vmatpush1.bf16.msra.mxu1 %v10512_v29 }
 0x4b6   :  { %4886 = vmatprep.subr.bf16.mxu1 %v10522_v41 }
 0x4b7   :  { %4910 = vmatpush1.bf16.msra.mxu0 %v10421_v6  ;;  %v3412_v6 = vld [vmem:[#allocation3 + $0x3] ss:$8 sm:$0x30] }
 0x4b8   :  { %4911 = vmatprep.subr.bf16.mxu0 %v10426_v61 }
 0x4b9   :  { %4887 = vmatpush1.bf16.msra.mxu1 %v10524_v15 }
 0x4ba   :  { %4888 = vmatprep.subr.bf16.mxu1 %v10534_v12 }
 0x4bb   :  { %4912 = vmatpush1.bf16.msra.mxu0 %v10433_v5 }
 0x4bc   :  { %4913 = vmatprep.subr.bf16.mxu0 %v10438_v13 }
 0x4bd   :  { %4889 = vmatpush1.bf16.msra.mxu1 %v10536_v33 }
 0x4be   :  { %4890 = vmatprep.subr.bf16.mxu1 %v10547_v26 }
 0x4bf   :  { %4914 = vmatpush1.bf16.msra.mxu0 %v10445_v31 }
 0x4c0   :  { %4915 = vmatprep.subr.bf16.mxu0 %v10450_v58 }
 0x4c1   :  { %4891 = vmatpush1.bf16.msra.mxu1 %v10545_v47 }
 0x4c2   :  { %4892 = vmatprep.subr.bf16.mxu1 %v10554_v22 }
 0x4c3   :  { %4916 = vmatpush1.bf16.msra.mxu0 %v10457_v0 }
 0x4c4   :  { %4917 = vmatprep.subr.bf16.mxu0 %v10462_v8 }
 0x4c5   :  { %4893 = vmatpush1.bf16.msra.mxu1 %v10561_v37 }
 0x4c7   :  { %4918 = vmatpush1.bf16.msra.mxu0 %v10469_v21 }
 0x4c8   :  { %4919 = vmatprep.subr.bf16.mxu0 %v10474_v43 }
 0x4cb   :  { %4920 = vmatpush1.bf16.msra.mxu0 %v10481_v51 }
 0x4cc   :  { %4921 = vmatprep.subr.bf16.mxu0 %v10486_v25 }
 0x4cf   :  { %4922 = vmatpush1.bf16.msra.mxu0 %v10493_v44 }
 0x4d0   :  { %4923 = vmatprep.subr.bf16.mxu0 %v10502_v27 }
 0x4d3   :  { %4924 = vmatpush1.bf16.msra.mxu0 %v10505_v60  ;;  %v11522_v60 = vld [vmem:[#allocation18_spill] sm:$0xff] }
 0x4d4   :  { %4925 = vmatprep.subr.bf16.mxu0 %v10514_v11 }
 0x4d7   :  { %4926 = vmatpush1.bf16.msra.mxu0 %v10517_v10  ;;  %v10589_v10 = vld [vmem:[#allocation11 + $0x2d8] ss:$24 sps:$4 sm:$0xff]  }
 0x4d8   :  { %4927 = vmatprep.subr.bf16.mxu0 %v10526_v50  ;;  %v10582_v50 = vld [vmem:[#allocation11 + $0x2dc] ss:$24 sps:$4 sm:$0xff]   ;;  %11520 = vst [vmem:[#allocation48_spill] sm:$0xff] %v10589_v10 }
 0x4d9   :  { %11519 = vst [vmem:[#allocation47_spill] sm:$0xff] %v10582_v50 }
 0x4db   :  { %4928 = vmatpush1.bf16.msra.mxu0 %v10529_v54  ;;  %v10573_v54 = vld [vmem:[#allocation11 + $0x2a0] ss:$24 sps:$4 sm:$0xff]  }
 0x4dc   :  { %4929 = vmatprep.subr.bf16.mxu0 %v10538_v52  ;;  %v10570_v52 = vld [vmem:[#allocation11 + $0x2ac] ss:$24 sps:$4 sm:$0xff]  }
 0x4dd   :  { %11517 = vst [vmem:[#allocation45_spill] sm:$0xff] %v10570_v52 }
 0x4df   :  { %4930 = vmatpush1.bf16.msra.mxu0 %v10541_v39  ;;  %v10567_v39 = vld [vmem:[#allocation11 + $0x2a4] ss:$24 sps:$4 sm:$0xff]  }
 0x4e0   :  { %4931 = vmatprep.subr.bf16.mxu0 %v10552_v55  ;;  %4894 = vmatprep.subr.bf16.mxu1 %v10567_v39  ;;  %v10577_v55 = vld [vmem:[#allocation11 + $0x2a8] ss:$24 sps:$4 sm:$0xff]  }
 0x4e1   :  { %11518 = vst [vmem:[#allocation46_spill] sm:$0xff] %v10577_v55  ;;  %4895 = vmatpush1.bf16.msra.mxu1 %v10573_v54 }
 0x4e3   :  { %4932 = vmatpush1.bf16.msra.mxu0 %v10550_v38  ;;  %v10579_v38 = vld [vmem:[#allocation11 + $0x2d4] ss:$24 sps:$4 sm:$0xff]  }
 0x4e4   :  { %4933 = vmatprep.subr.bf16.mxu0 %v10557_v23  ;;  %v10585_v23 = vld [vmem:[#allocation11 + $0x2d0] ss:$24 sps:$4 sm:$0xff]   ;;  %4896 = vmatprep.subr.bf16.mxu1 %v10579_v38 }
 0x4e5   :  { %4897 = vmatpush1.bf16.msra.mxu1 %v10585_v23 }
 0x4e7   :  { %4934 = vmatpush1.bf16.msra.mxu0 %v10565_v2  ;;  %v10594_v2 = vld [vmem:[#allocation11 + $0x14] ss:$24 sps:$4 sm:$0xff]  }
 0x4e8   :  { %4935 = vmatprep.subr.bf16.mxu0 %v10570_v52  ;;  %11521 = vst [vmem:[#allocation49_spill] sm:$0xff] %v10594_v2  ;;  %4948 = vmatprep.subr.bf16.mxu1 %v10594_v2 }
 0x4eb   :  { %4936 = vmatpush1.bf16.msra.mxu0 %v10577_v55  ;;  %v3523_v55 = vld [vmem:[%s11316_s6] sm:$0x3f] }
 0x4ec   :  { %4937 = vmatprep.subr.bf16.mxu0 %v10582_v50  ;;  %v4008_v52 = vrot.slane %v3523_v55, %v9684_v14  ;;  %v4016_v11 = vrot.slane %v3523_v55, %v11488_v59  ;;  %v4012_v50 = vrot.slane %v3523_v55, %v9671_v42  ;;  %v4020_v27 = vrot.slane %v3523_v55, %v11522_v60  ;;  %v3411_v60 = vld [vmem:[#allocation3 + $0x3] ss:$8 sm:$0xf] }
 0x4ed   :  { %v3413_v16 = vor.u32 %v3412_v6, %v3411_v60 }
 0x4ef   :  { %4938 = vmatpush1.bf16.msra.mxu0 %v10589_v10 }
 0x4f0   :  { %5697 = vmatprep.subr.bf16.mxu0 %v10404_v62 }
 0x545   :  { %v4069_v44 = vpop.f32.mrb[24].mxu0  ;;  %v4110_v10 = vpop.f32.mrb[24].mxu1 }
 0x546   :  { %v4070_v25 = vadd.f32 %v4069_v44, %v4008_v52  ;;  %v4111_v51 = vadd.f32 %v4110_v10, %v4016_v11  ;;  %v4071_v43 = vpop.f32.mrb[25].mxu0  ;;  %v4112_v62 = vpop.f32.mrb[25].mxu1 }
 0x547   :  { %v4072_v21 = vadd.f32 %v4071_v43, %v4012_v50  ;;  %v4113_v8 = vadd.f32 %v4112_v62, %v4020_v27  ;;  %v4073_v0 = vpop.f32.mrb[26].mxu0  ;;  %v4114_v58 = vpop.f32.mrb[26].mxu1 }
 0x548   :  { %v4074_v31 = vpop.f32.mrb[27].mxu0  ;;  %v4115_v13 = vpop.f32.mrb[27].mxu1  ;;  %v4184_v0 = vrot.slane %v3413_v16, 2 }
 0x549   :  { %v4160_v5 = vcombine.low %v4070_v25, %v4072_v21  ;;  %v4188_v61 = vcombine.low %v4111_v51, %v4113_v8  ;;  %v4028_v21 = vrot.slane %v3523_v55, %v9910_v30 }
 0x54b   :  { %v4167_v59 = vrot.slane %v4160_v5, %v9920_v19  ;;  %v4195_v44 = vrot.slane %v4188_v61, %v9920_v19  ;;  %v4024_v5 = vrot.slane %v3523_v55, %v9907_v28 }
 0x54d   :  { %v4174_v3 = vrot.slane %v4167_v59, %v9920_v19  ;;  %v4202_v43 = vrot.slane %v4195_v44, %v9920_v19  ;;  %v4230_v44 = vrot.slane %v3413_v16, 4 }
 0x54f   :  { %v4176_v2 = vadd.f32 %v4174_v3, %v3413_v16  ;;  %v4204_v58 = vadd.f32 %v4202_v43, %v4184_v0 }
 0x551   :  { %v8114_v11 = vmul.f32 -1.442695, %v4176_v2  ;;  %v8115_v31 = vmul.f32 -1.442695, %v4204_v58 }
 0x553   :  { %9276 = vpow2.f32 %v8114_v11 }
 0x554   :  { %9278 = vpow2.f32 %v8115_v31 }
 0x55d   :  { %v9277_v13 = vpop.eup %9276 }
 0x55e   :  { %v4180_v8 = vadd.f32 1.0, %v9277_v13  ;;  %v9279_v25 = vpop.eup %9278 }
 0x55f   :  { %v4208_v10 = vadd.f32 1.0, %v9279_v25  ;;  %v10648_v25 = vld [vmem:[#allocation11 + $0xa0] ss:$24 sps:$4 sm:$0xff]  }
 0x560   :  { %9280 = vrcp.f32 %v4180_v8 }
 0x561   :  { %9282 = vrcp.f32 %v4208_v10  ;;  %v11533_v10 = vld [vmem:[#allocation27_spill] sm:$0xff] }
 0x56a   :  { %v9281_v2 = vpop.eup %9280 }
 0x56b   :  { %v9283_v55 = vpop.eup %9282 }
 0x56c   :  { %v4234_v43 = vsub.f32 1.0, %v9283_v55  ;;  %v4236_v31 = vmul.f32 %v9283_v55, %v10362_v48  ;;  %v10632_v48 = vld [vmem:[#allocation11 + $0x40] ss:$24 sps:$4 sm:$0xff]  }
 0x56d   :  { %v11540_v55 = vld [vmem:[#allocation34_spill] sm:$0xff] }
 0x585   :  { %v4151_v59 = vpop.f32.mrb[28].mxu0 }
 0x586   :  { %v4152_v6 = vadd.f32 %v4151_v59, %v4024_v5  ;;  %v4153_v3 = vpop.f32.mrb[29].mxu0 }
 0x587   :  { %v4154_v51 = vadd.f32 %v4153_v3, %v4028_v21  ;;  %v4155_v61 = vpop.f32.mrb[30].mxu0  ;;  %v10623_v21 = vld [vmem:[#allocation11 + $0x10] ss:$24 sps:$4 sm:$0xff]   ;;  %v10635_v3 = vld [vmem:[#allocation11 + $0x74] ss:$24 sps:$4 sm:$0xff]  }
 0x588   :  { %v4156_v27 = vpop.f32.mrb[31].mxu0  ;;  %v10643_v61 = vld [vmem:[#allocation11 + $0xa4] ss:$24 sps:$4 sm:$0xff]  }
 0x589   :  { %v4213_v60 = vcombine.low %v4152_v6, %v4154_v51  ;;  %v10627_v6 = vld [vmem:[#allocation11 + $0x44] ss:$24 sps:$4 sm:$0xff]   ;;  %v10640_v51 = vld [vmem:[#allocation11 + $0x70] ss:$24 sps:$4 sm:$0xff]  }
 0x58a   :  { %v11527_v27 = vld [vmem:[#allocation21_spill] sm:$0xff] }
 0x58b   :  { %v4220_v50 = vrot.slane %v4213_v60, %v9920_v19  ;;  %v11530_v60 = vld [vmem:[#allocation24_spill] sm:$0xff] }
 0x58d   :  { %v4227_v52 = vrot.slane %v4220_v50, %v9920_v19  ;;  %v11534_v50 = vld [vmem:[#allocation28_spill] sm:$0xff] }
 0x58f   :  { %v4229_v62 = vmul.f32 %v9281_v2, %v4227_v52  ;;  %v11535_v52 = vld [vmem:[#allocation29_spill] sm:$0xff]  ;;  %v11536_v2 = vld [vmem:[#allocation30_spill] sm:$0xff] }
 0x591   :  { %v4232_v11 = vadd.f32 %v4230_v44, %v4229_v62  ;;  %v11537_v62 = vld [vmem:[#allocation31_spill] sm:$0xff]  ;;  %v11538_v44 = vld [vmem:[#allocation32_spill] sm:$0xff] }
 0x593   :  { %9284 = vtanh.f32 %v4232_v11  ;;  %v11539_v11 = vld [vmem:[#allocation33_spill] sm:$0xff] }
 0x59d   :  { %v9285_v0 = vpop.eup %9284 }
 0x59e   :  { %v4235_v58 = vmul.f32 %v9285_v0, %v4234_v43  ;;  %v11541_v43 = vld [vmem:[#allocation35_spill] sm:$0xff]  ;;  %v11542_v0 = vld [vmem:[#allocation36_spill] sm:$0xff] }
 0x5a0   :  { %v10614_v13 = vadd.f32 %v4236_v31, %v4235_v58  ;;  %v11543_v58 = vld [vmem:[#allocation37_spill] sm:$0xff]  ;;  %v11544_v31 = vld [vmem:[#allocation38_spill] sm:$0xff] }
 0x5a2   :  { %4239 = vst.msk [vmem:[#allocation12 + $0x3] ss:$8 sm:$0x3] %vm9633_vm0, %v10614_v13  ;;  %v4253_v8 = vrot.slane %v10614_v13, %v9671_v42  ;;  %v4249_v16 = vrot.slane %v10614_v13, %v9684_v14 }
 0x5a4   :  { %v4257_v5 = vpack.c.bf16 %v4253_v8, %v4253_v8  ;;  %v10625_v59 = vpack.c.bf16 %v4249_v16, %v4249_v16  ;;  %v11545_v8 = vld [vmem:[#allocation39_spill] sm:$0xff]  ;;  %v11546_v16 = vld [vmem:[#allocation40_spill] sm:$0xff] }
 0x5a6   :  { %4898 = vmatprep.mubr.bf16.mxu1 %v4257_v5  ;;  %4939 = vmatprep.mubr.bf16.mxu0 %v4257_v5 }
 0x5a7   :  { %4899 = vmatmul.mubr.bf16.vlgmr.msra.gmra.mrb[28].mxu1 %v10625_v59  ;;  %4940 = vmatmul.mubr.bf16.vlgmr.msra.gmra.mrb[32].mxu0 %v10625_v59 }
 0x5a8   :  { %4949 = vmatpush1.bf16.msra.mxu1 %v10623_v21  ;;  %4980 = vmatprep.mubr.bf16.mxu1 %v4257_v5  ;;  %v11547_v5 = vld [vmem:[#allocation43_spill] sm:$0xff] }
 0x5a9   :  { %4950 = vmatprep.subr.bf16.mxu1 %v10627_v6  ;;  %5698 = vmatpush1.bf16.msra.mxu0 %v10402_v17  ;;  %v10651_v17 = vld [vmem:[#allocation11 + $0xd4] ss:$24 sps:$4 sm:$0xff]  }
 0x5aa   :  { %5699 = vmatprep.subr.bf16.mxu0 %v10410_v63  ;;  %v10656_v63 = vld [vmem:[#allocation11 + $0xd0] ss:$24 sps:$4 sm:$0xff]  }
 0x5ac   :  { %4951 = vmatpush1.bf16.msra.mxu1 %v10632_v48 }
 0x5ad   :  { %4952 = vmatprep.subr.bf16.mxu1 %v10635_v3  ;;  %5700 = vmatpush1.bf16.msra.mxu0 %v10417_v7  ;;  %v10659_v7 = vld [vmem:[#allocation11 + $0x104] ss:$24 sps:$4 sm:$0xff]  }
 0x5ae   :  { %5701 = vmatprep.subr.bf16.mxu0 %v10423_v53  ;;  %v10664_v53 = vld [vmem:[#allocation11 + $0x100] ss:$24 sps:$4 sm:$0xff]  }
 0x5b0   :  { %4953 = vmatpush1.bf16.msra.mxu1 %v10640_v51 }
 0x5b1   :  { %4954 = vmatprep.subr.bf16.mxu1 %v10643_v61  ;;  %5702 = vmatpush1.bf16.msra.mxu0 %v10429_v1  ;;  %v10667_v1 = vld [vmem:[#allocation11 + $0x134] ss:$24 sps:$4 sm:$0xff]  }
 0x5b2   :  { %5703 = vmatprep.subr.bf16.mxu0 %v10435_v9  ;;  %v10672_v9 = vld [vmem:[#allocation11 + $0x130] ss:$24 sps:$4 sm:$0xff]  }
 0x5b4   :  { %4955 = vmatpush1.bf16.msra.mxu1 %v10648_v25 }
 0x5b5   :  { %4956 = vmatprep.subr.bf16.mxu1 %v10651_v17  ;;  %5704 = vmatpush1.bf16.msra.mxu0 %v10441_v20  ;;  %v10675_v20 = vld [vmem:[#allocation11 + $0x164] ss:$24 sps:$4 sm:$0xff]  }
 0x5b6   :  { %5705 = vmatprep.subr.bf16.mxu0 %v10447_v40  ;;  %v10680_v40 = vld [vmem:[#allocation11 + $0x160] ss:$24 sps:$4 sm:$0xff]  }
 0x5b8   :  { %4957 = vmatpush1.bf16.msra.mxu1 %v10656_v63 }
 0x5b9   :  { %4958 = vmatprep.subr.bf16.mxu1 %v10659_v7  ;;  %5706 = vmatpush1.bf16.msra.mxu0 %v10453_v32  ;;  %v10683_v32 = vld [vmem:[#allocation11 + $0x194] ss:$24 sps:$4 sm:$0xff]  }
 0x5ba   :  { %5707 = vmatprep.subr.bf16.mxu0 %v10459_v4  ;;  %v10688_v4 = vld [vmem:[#allocation11 + $0x190] ss:$24 sps:$4 sm:$0xff]  }
 0x5bc   :  { %4959 = vmatpush1.bf16.msra.mxu1 %v10664_v53 }
 0x5bd   :  { %4960 = vmatprep.subr.bf16.mxu1 %v10667_v1  ;;  %5708 = vmatpush1.bf16.msra.mxu0 %v10465_v18  ;;  %v10691_v18 = vld [vmem:[#allocation11 + $0x1c4] ss:$24 sps:$4 sm:$0xff]  }
 0x5be   :  { %5709 = vmatprep.subr.bf16.mxu0 %v10471_v24  ;;  %v10696_v24 = vld [vmem:[#allocation11 + $0x1c0] ss:$24 sps:$4 sm:$0xff]  }
 0x5c0   :  { %4961 = vmatpush1.bf16.msra.mxu1 %v10672_v9 }
 0x5c1   :  { %4962 = vmatprep.subr.bf16.mxu1 %v10675_v20  ;;  %5710 = vmatpush1.bf16.msra.mxu0 %v10477_v46  ;;  %v10699_v46 = vld [vmem:[#allocation11 + $0x1f4] ss:$24 sps:$4 sm:$0xff]  }
 0x5c2   :  { %5711 = vmatprep.subr.bf16.mxu0 %v10483_v36  ;;  %v10704_v36 = vld [vmem:[#allocation11 + $0x1f0] ss:$24 sps:$4 sm:$0xff]  }
 0x5c4   :  { %4963 = vmatpush1.bf16.msra.mxu1 %v10680_v40 }
 0x5c5   :  { %4964 = vmatprep.subr.bf16.mxu1 %v10683_v32  ;;  %5712 = vmatpush1.bf16.msra.mxu0 %v10489_v34  ;;  %v10707_v34 = vld [vmem:[#allocation11 + $0x224] ss:$24 sps:$4 sm:$0xff]  }
 0x5c6   :  { %5713 = vmatprep.subr.bf16.mxu0 %v10498_v56  ;;  %v10712_v56 = vld [vmem:[#allocation11 + $0x220] ss:$24 sps:$4 sm:$0xff]  }
 0x5c8   :  { %4965 = vmatpush1.bf16.msra.mxu1 %v10688_v4 }
 0x5c9   :  { %4966 = vmatprep.subr.bf16.mxu1 %v10691_v18  ;;  %5714 = vmatpush1.bf16.msra.mxu0 %v10500_v35  ;;  %v10715_v35 = vld [vmem:[#allocation11 + $0x254] ss:$24 sps:$4 sm:$0xff]  }
 0x5ca   :  { %5715 = vmatprep.subr.bf16.mxu0 %v10510_v57  ;;  %v10720_v57 = vld [vmem:[#allocation11 + $0x250] ss:$24 sps:$4 sm:$0xff]  }
 0x5cc   :  { %4967 = vmatpush1.bf16.msra.mxu1 %v10696_v24 }
 0x5cd   :  { %4968 = vmatprep.subr.bf16.mxu1 %v10699_v46  ;;  %5716 = vmatpush1.bf16.msra.mxu0 %v10512_v29  ;;  %v10723_v29 = vld [vmem:[#allocation11 + $0x284] ss:$24 sps:$4 sm:$0xff]  }
 0x5ce   :  { %5717 = vmatprep.subr.bf16.mxu0 %v10522_v41  ;;  %v10728_v41 = vld [vmem:[#allocation11 + $0x280] ss:$24 sps:$4 sm:$0xff]  }
 0x5d0   :  { %4969 = vmatpush1.bf16.msra.mxu1 %v10704_v36 }
 0x5d1   :  { %4970 = vmatprep.subr.bf16.mxu1 %v10707_v34  ;;  %5718 = vmatpush1.bf16.msra.mxu0 %v10524_v15  ;;  %v10731_v15 = vld [vmem:[#allocation11 + $0x2b4] ss:$24 sps:$4 sm:$0xff]  }
 0x5d2   :  { %5719 = vmatprep.subr.bf16.mxu0 %v10534_v12  ;;  %v10736_v12 = vld [vmem:[#allocation11 + $0x2b0] ss:$24 sps:$4 sm:$0xff]  }
 0x5d4   :  { %4971 = vmatpush1.bf16.msra.mxu1 %v10712_v56 }
 0x5d5   :  { %4972 = vmatprep.subr.bf16.mxu1 %v10715_v35  ;;  %5720 = vmatpush1.bf16.msra.mxu0 %v10536_v33  ;;  %v10739_v33 = vld [vmem:[#allocation11 + $0x2e4] ss:$24 sps:$4 sm:$0xff]  }
 0x5d6   :  { %5721 = vmatprep.subr.bf16.mxu0 %v10547_v26  ;;  %v10744_v26 = vld [vmem:[#allocation11 + $0x2e0] ss:$24 sps:$4 sm:$0xff]  }
 0x5d8   :  { %4973 = vmatpush1.bf16.msra.mxu1 %v10720_v57 }
 0x5d9   :  { %4974 = vmatprep.subr.bf16.mxu1 %v10723_v29  ;;  %5722 = vmatpush1.bf16.msra.mxu0 %v10545_v47  ;;  %v11523_v47 = vld [vmem:[#allocation49_spill] sm:$0xff] }
 0x5da   :  { %5723 = vmatprep.subr.bf16.mxu0 %v10554_v22  ;;  %v11525_v22 = vld [vmem:[#allocation19_spill] sm:$0xff] }
 0x5dc   :  { %4975 = vmatpush1.bf16.msra.mxu1 %v10728_v41 }
 0x5dd   :  { %4976 = vmatprep.subr.bf16.mxu1 %v10731_v15  ;;  %5724 = vmatpush1.bf16.msra.mxu0 %v10561_v37  ;;  %v11526_v37 = vld [vmem:[#allocation20_spill] sm:$0xff] }
 0x5de   :  { %5725 = vmatprep.subr.bf16.mxu0 %v10567_v39  ;;  %v11524_v39 = vld [vmem:[#allocation50_spill] sm:$0xff] }
 0x5e0   :  { %4977 = vmatpush1.bf16.msra.mxu1 %v10736_v12 }
 0x5e1   :  { %4978 = vmatprep.subr.bf16.mxu1 %v10739_v33  ;;  %5726 = vmatpush1.bf16.msra.mxu0 %v10573_v54  ;;  %v11528_v54 = vld [vmem:[#allocation22_spill] sm:$0xff] }
 0x5e2   :  { %5727 = vmatprep.subr.bf16.mxu0 %v10579_v38  ;;  %v11529_v38 = vld [vmem:[#allocation23_spill] sm:$0xff] }
 0x5e4   :  { %4979 = vmatpush1.bf16.msra.mxu1 %v10744_v26 }
 0x5e5   :  { %5738 = vmatprep.subr.bf16.mxu1 %v10408_v49  ;;  %5728 = vmatpush1.bf16.msra.mxu0 %v10585_v23  ;;  %v11531_v49 = vld [vmem:[#allocation25_spill] sm:$0xff]  ;;  %v11532_v23 = vld [vmem:[#allocation26_spill] sm:$0xff] }
 0x5e6   :  { %5779 = vmatprep.subr.bf16.mxu0 %v11523_v47  ;;  %v11549_v47 = vld [vmem:[#allocation42_spill] sm:$0xff] }
 0x5e7   :  { %4981 = vmatmul.mubr.bf16.vlgmr.msra.gmra.mrb[32].mxu1 %v10625_v59  ;;  %v11548_v59 = vld [vmem:[#allocation41_spill] sm:$0xff] }
 0x5e8   :  { %5739 = vmatpush1.bf16.msra.mxu1 %v11524_v39  ;;  %v11550_v39 = vld [vmem:[#allocation44_spill] sm:$0xff] }
 0x5e9   :  { %5740 = vmatprep.subr.bf16.mxu1 %v11525_v22  ;;  %v11551_v22 = vld [vmem:[#allocation45_spill] sm:$0xff] }
 0x5ec   :  { %5741 = vmatpush1.bf16.msra.mxu1 %v11526_v37  ;;  %v11552_v37 = vld [vmem:[#allocation46_spill] sm:$0xff] }
 0x5ed   :  { %5742 = vmatprep.subr.bf16.mxu1 %v11527_v27  ;;  %v11553_v27 = vld [vmem:[#allocation47_spill] sm:$0xff] }
 0x5f0   :  { %5743 = vmatpush1.bf16.msra.mxu1 %v11528_v54  ;;  %v11554_v54 = vld [vmem:[#allocation48_spill] sm:$0xff] }
 0x5f1   :  { %5744 = vmatprep.subr.bf16.mxu1 %v11529_v38  ;;  %v4354_v38 = vld [vmem:[%s11316_s6] sm:$0x3f] }
 0x5f4   :  { %5745 = vmatpush1.bf16.msra.mxu1 %v11530_v60  ;;  %v4839_v60 = vrot.slane %v4354_v38, %v9684_v14 }
 0x5f5   :  { %5746 = vmatprep.subr.bf16.mxu1 %v11531_v49  ;;  %v11555_v49 = vld [vmem:[#allocation17_spill] sm:$0xff] }
 0x5f8   :  { %5747 = vmatpush1.bf16.msra.mxu1 %v11532_v23  ;;  %v4847_v23 = vrot.slane %v4354_v38, %v11555_v49 }
 0x5f9   :  { %5748 = vmatprep.subr.bf16.mxu1 %v11533_v10  ;;  %v4843_v10 = vrot.slane %v4354_v38, %v9671_v42 }
 0x5fc   :  { %5749 = vmatpush1.bf16.msra.mxu1 %v11534_v50  ;;  %v11556_v50 = vld [vmem:[#allocation18_spill] sm:$0xff] }
 0x5fd   :  { %5750 = vmatprep.subr.bf16.mxu1 %v11535_v52  ;;  %v4851_v52 = vrot.slane %v4354_v38, %v11556_v50 }
 0x600   :  { %5751 = vmatpush1.bf16.msra.mxu1 %v11536_v2 }
 0x601   :  { %5752 = vmatprep.subr.bf16.mxu1 %v11537_v62 }
 0x604   :  { %5753 = vmatpush1.bf16.msra.mxu1 %v11538_v44 }
 0x605   :  { %5754 = vmatprep.subr.bf16.mxu1 %v11539_v11 }
 0x608   :  { %5755 = vmatpush1.bf16.msra.mxu1 %v11540_v55 }
 0x609   :  { %5756 = vmatprep.subr.bf16.mxu1 %v11541_v43 }
 0x60c   :  { %5757 = vmatpush1.bf16.msra.mxu1 %v11542_v0 }
 0x60d   :  { %5758 = vmatprep.subr.bf16.mxu1 %v11543_v58 }
 0x610   :  { %5759 = vmatpush1.bf16.msra.mxu1 %v11544_v31 }
 0x611   :  { %5760 = vmatprep.subr.bf16.mxu1 %v11545_v8 }
 0x614   :  { %5761 = vmatpush1.bf16.msra.mxu1 %v11546_v16 }
 0x615   :  { %5762 = vmatprep.subr.bf16.mxu1 %v11547_v5 }
 0x618   :  { %5763 = vmatpush1.bf16.msra.mxu1 %v11548_v59 }
 0x619   :  { %5764 = vmatprep.subr.bf16.mxu1 %v11549_v47 }
 0x61c   :  { %5765 = vmatpush1.bf16.msra.mxu1 %v11550_v39 }
 0x61d   :  { %5766 = vmatprep.subr.bf16.mxu1 %v11551_v22  ;;  %v4243_v22 = vld [vmem:[#allocation3 + $0x4] ss:$8 sm:$0x30] }
 0x620   :  { %5767 = vmatpush1.bf16.msra.mxu1 %v11552_v37 }
 0x621   :  { %5768 = vmatprep.subr.bf16.mxu1 %v11553_v27  ;;  %v4242_v27 = vld [vmem:[#allocation3 + $0x4] ss:$8 sm:$0xf] }
 0x624   :  { %5769 = vmatpush1.bf16.msra.mxu1 %v11554_v54  ;;  %v4244_v54 = vor.u32 %v4243_v22, %v4242_v27 }
 0x67a   :  { %v4900_v2 = vpop.f32.mrb[28].mxu1  ;;  %v4941_v62 = vpop.f32.mrb[32].mxu0 }
 0x67b   :  { %v4901_v44 = vadd.f32 %v4900_v2, %v4839_v60  ;;  %v4942_v11 = vadd.f32 %v4941_v62, %v4847_v23  ;;  %v4902_v55 = vpop.f32.mrb[29].mxu1  ;;  %v4943_v43 = vpop.f32.mrb[33].mxu0 }
 0x67c   :  { %v4903_v0 = vadd.f32 %v4902_v55, %v4843_v10  ;;  %v4944_v58 = vadd.f32 %v4943_v43, %v4851_v52  ;;  %v4904_v31 = vpop.f32.mrb[30].mxu1  ;;  %v4945_v8 = vpop.f32.mrb[34].mxu0  ;;  %v5015_v52 = vrot.slane %v4244_v54, 2  ;;  %v4859_v43 = vrot.slane %v4354_v38, %v9910_v30 }
 0x67d   :  { %v4905_v16 = vpop.f32.mrb[31].mxu1  ;;  %v4946_v5 = vpop.f32.mrb[35].mxu0 }
 0x67e   :  { %v4991_v59 = vcombine.low %v4901_v44, %v4903_v0  ;;  %v5019_v47 = vcombine.low %v4942_v11, %v4944_v58  ;;  %v4855_v11 = vrot.slane %v4354_v38, %v9907_v28 }
 0x680   :  { %v4998_v39 = vrot.slane %v4991_v59, %v9920_v19  ;;  %v5026_v60 = vrot.slane %v5019_v47, %v9920_v19 }
 0x682   :  { %v5005_v37 = vrot.slane %v4998_v39, %v9920_v19  ;;  %v5033_v10 = vrot.slane %v5026_v60, %v9920_v19  ;;  %v5061_v60 = vrot.slane %v4244_v54, 4 }
 0x684   :  { %v5007_v50 = vadd.f32 %v5005_v37, %v4244_v54  ;;  %v5035_v2 = vadd.f32 %v5033_v10, %v5015_v52 }
 0x686   :  { %v8212_v23 = vmul.f32 -1.442695, %v5007_v50  ;;  %v8213_v62 = vmul.f32 -1.442695, %v5035_v2 }
 0x688   :  { %9286 = vpow2.f32 %v8212_v23 }
 0x689   :  { %9288 = vpow2.f32 %v8213_v62 }
 0x692   :  { %v9287_v55 = vpop.eup %9286 }
 0x693   :  { %v5011_v44 = vadd.f32 1.0, %v9287_v55  ;;  %v9289_v50 = vpop.eup %9288 }
 0x694   :  { %v5039_v47 = vadd.f32 1.0, %v9289_v50  ;;  %v10951_v50 = vld [vmem:[#allocation11 + $0x1b0] ss:$24 sps:$4 sm:$0xff]  }
 0x695   :  { %9290 = vrcp.f32 %v5011_v44 }
 0x696   :  { %9292 = vrcp.f32 %v5039_v47  ;;  %v10961_v47 = vld [vmem:[#allocation11 + $0x1e4] ss:$24 sps:$4 sm:$0xff]  }
 0x69f   :  { %v9291_v37 = vpop.eup %9290 }
 0x6a0   :  { %v9293_v38 = vpop.eup %9292 }
 0x6a1   :  { %v5065_v10 = vsub.f32 1.0, %v9293_v38  ;;  %v5067_v62 = vmul.f32 %v9293_v38, %v10614_v13  ;;  %v10841_v13 = vld [vmem:[#allocation11] ss:$24 sps:$4 sm:$0xff]  }
 0x6a2   :  { %v10980_v38 = vld [vmem:[#allocation11 + $0x218] ss:$24 sps:$4 sm:$0xff]  }
 0x6a3   :  { %11579 = vst [vmem:[#allocation39_spill] sm:$0xff] %v10980_v38 }
 0x6ba   :  { %v4982_v0 = vpop.f32.mrb[32].mxu1 }
 0x6bb   :  { %v4983_v58 = vadd.f32 %v4982_v0, %v4855_v11  ;;  %v4984_v31 = vpop.f32.mrb[33].mxu1  ;;  %v10937_v0 = vld [vmem:[#allocation11 + $0x184] ss:$24 sps:$4 sm:$0xff]  }
 0x6bc   :  { %v4985_v8 = vadd.f32 %v4984_v31, %v4859_v43  ;;  %v4986_v16 = vpop.f32.mrb[34].mxu1  ;;  %v10941_v31 = vld [vmem:[#allocation11 + $0x18c] ss:$24 sps:$4 sm:$0xff]  }
 0x6bd   :  { %v4987_v5 = vpop.f32.mrb[35].mxu1  ;;  %11572 = vst [vmem:[#allocation32_spill] sm:$0xff] %v10941_v31  ;;  %v10949_v16 = vld [vmem:[#allocation11 + $0x1b4] ss:$24 sps:$4 sm:$0xff]  }
 0x6be   :  { %v5044_v59 = vcombine.low %v4983_v58, %v4985_v8  ;;  %v10939_v58 = vld [vmem:[#allocation11 + $0x180] ss:$24 sps:$4 sm:$0xff]   ;;  %v10953_v5 = vld [vmem:[#allocation11 + $0x1bc] ss:$24 sps:$4 sm:$0xff]  }
 0x6bf   :  { %v10944_v8 = vld [vmem:[#allocation11 + $0x188] ss:$24 sps:$4 sm:$0xff]   ;;  %11574 = vst [vmem:[#allocation34_spill] sm:$0xff] %v10953_v5 }
 0x6c0   :  { %v5051_v39 = vrot.slane %v5044_v59, %v9920_v19  ;;  %11573 = vst [vmem:[#allocation33_spill] sm:$0xff] %v10944_v8  ;;  %v10956_v59 = vld [vmem:[#allocation11 + $0x1b8] ss:$24 sps:$4 sm:$0xff]  }
 0x6c1   :  { %11575 = vst [vmem:[#allocation35_spill] sm:$0xff] %v10956_v59 }
 0x6c2   :  { %v5058_v22 = vrot.slane %v5051_v39, %v9920_v19  ;;  %v10963_v39 = vld [vmem:[#allocation11 + $0x1e0] ss:$24 sps:$4 sm:$0xff]  }
 0x6c4   :  { %v5060_v27 = vmul.f32 %v9291_v37, %v5058_v22  ;;  %v10965_v22 = vld [vmem:[#allocation11 + $0x1ec] ss:$24 sps:$4 sm:$0xff]   ;;  %v10968_v37 = vld [vmem:[#allocation11 + $0x1e8] ss:$24 sps:$4 sm:$0xff]  }
 0x6c5   :  { %11576 = vst [vmem:[#allocation36_spill] sm:$0xff] %v10965_v22  ;;  %11577 = vst [vmem:[#allocation37_spill] sm:$0xff] %v10968_v37 }
 0x6c6   :  { %v5063_v23 = vadd.f32 %v5061_v60, %v5060_v27  ;;  %v10973_v27 = vld [vmem:[#allocation11 + $0x214] ss:$24 sps:$4 sm:$0xff]   ;;  %v10975_v60 = vld [vmem:[#allocation11 + $0x210] ss:$24 sps:$4 sm:$0xff]  }
 0x6c8   :  { %9294 = vtanh.f32 %v5063_v23  ;;  %v10977_v23 = vld [vmem:[#allocation11 + $0x21c] ss:$24 sps:$4 sm:$0xff]  }
 0x6c9   :  { %11578 = vst [vmem:[#allocation38_spill] sm:$0xff] %v10977_v23 }
 0x6d2   :  { %v9295_v52 = vpop.eup %9294 }
 0x6d3   :  { %v5066_v2 = vmul.f32 %v9295_v52, %v5065_v10  ;;  %v10984_v10 = vld [vmem:[#allocation11 + $0x240] ss:$24 sps:$4 sm:$0xff]   ;;  %v10986_v52 = vld [vmem:[#allocation11 + $0x244] ss:$24 sps:$4 sm:$0xff]  }
 0x6d5   :  { %v10801_v55 = vadd.f32 %v5067_v62, %v5066_v2  ;;  %v10989_v2 = vld [vmem:[#allocation11 + $0x248] ss:$24 sps:$4 sm:$0xff]   ;;  %v10991_v62 = vld [vmem:[#allocation11 + $0x24c] ss:$24 sps:$4 sm:$0xff]  }
 0x6d6   :  { %11580 = vst [vmem:[#allocation40_spill] sm:$0xff] %v10989_v2  ;;  %11581 = vst [vmem:[#allocation43_spill] sm:$0xff] %v10991_v62 }
 0x6d7   :  { %5070 = vst.msk [vmem:[#allocation12 + $0x4] ss:$8 sm:$0x3] %vm9633_vm0, %v10801_v55  ;;  %v5084_v44 = vrot.slane %v10801_v55, %v9671_v42  ;;  %v5080_v54 = vrot.slane %v10801_v55, %v9684_v14 }
 0x6d9   :  { %v5088_v11 = vpack.c.bf16 %v5084_v44, %v5084_v44  ;;  %v5087_v43 = vpack.c.bf16 %v5080_v54, %v5080_v54  ;;  %v10993_v44 = vld [vmem:[#allocation11 + $0x274] ss:$24 sps:$4 sm:$0xff]  }
 0x6da   :  { %v10996_v54 = vld [vmem:[#allocation11 + $0x27c] ss:$24 sps:$4 sm:$0xff]  }
 0x6db   :  { %5729 = vmatprep.mubr.bf16.mxu0 %v5088_v11  ;;  %5770 = vmatprep.mubr.bf16.mxu1 %v5088_v11  ;;  %11582 = vst [vmem:[#allocation41_spill] sm:$0xff] %v10996_v54 }
 0x6dc   :  { %5730 = vmatmul.mubr.bf16.vlgmr.msra.gmra.mrb[36].mxu0 %v5087_v43  ;;  %5771 = vmatmul.mubr.bf16.vlgmr.msra.gmra.mrb[36].mxu1 %v5087_v43 }
 0x6dd   :  { %5780 = vmatpush1.bf16.msra.mxu0 %v10623_v21  ;;  %5811 = vmatprep.mubr.bf16.mxu0 %v5088_v11  ;;  %v10843_v21 = vld [vmem:[#allocation11 + $0x4] ss:$24 sps:$4 sm:$0xff]   ;;  %v11000_v11 = vld [vmem:[#allocation11 + $0x270] ss:$24 sps:$4 sm:$0xff]  }
 0x6de   :  { %5781 = vmatprep.subr.bf16.mxu0 %v10627_v6  ;;  %v10845_v6 = vld [vmem:[#allocation11 + $0x8] ss:$24 sps:$4 sm:$0xff]   ;;  %6528 = vmatprep.subr.bf16.mxu1 %v10843_v21 }
 0x6df   :  { %11557 = vst [vmem:[#allocation49_spill] sm:$0xff] %v10845_v6  ;;  %6529 = vmatpush1.bf16.msra.mxu1 %v10841_v13 }
 0x6e1   :  { %5782 = vmatpush1.bf16.msra.mxu0 %v10632_v48  ;;  %v10847_v48 = vld [vmem:[#allocation11 + $0xc] ss:$24 sps:$4 sm:$0xff]  }
 0x6e2   :  { %5783 = vmatprep.subr.bf16.mxu0 %v10635_v3  ;;  %v10849_v3 = vld [vmem:[#allocation11 + $0x34] ss:$24 sps:$4 sm:$0xff]  }
 0x6e3   :  { %6530 = vmatprep.subr.bf16.mxu1 %v10849_v3 }
 0x6e5   :  { %5784 = vmatpush1.bf16.msra.mxu0 %v10640_v51  ;;  %v10852_v51 = vld [vmem:[#allocation11 + $0x3c] ss:$24 sps:$4 sm:$0xff]  }
 0x6e6   :  { %5785 = vmatprep.subr.bf16.mxu0 %v10643_v61  ;;  %11558 = vst [vmem:[#allocation50_spill] sm:$0xff] %v10852_v51  ;;  %v10856_v61 = vld [vmem:[#allocation11 + $0x30] ss:$24 sps:$4 sm:$0xff]  }
 0x6e7   :  { %6531 = vmatpush1.bf16.msra.mxu1 %v10856_v61 }
 0x6e9   :  { %5786 = vmatpush1.bf16.msra.mxu0 %v10648_v25  ;;  %v10860_v25 = vld [vmem:[#allocation11 + $0x38] ss:$24 sps:$4 sm:$0xff]  }
 0x6ea   :  { %5787 = vmatprep.subr.bf16.mxu0 %v10651_v17  ;;  %11559 = vst [vmem:[#allocation19_spill] sm:$0xff] %v10860_v25  ;;  %v10862_v17 = vld [vmem:[#allocation11 + $0x64] ss:$24 sps:$4 sm:$0xff]  }
 0x6eb   :  { %6532 = vmatprep.subr.bf16.mxu1 %v10862_v17 }
 0x6ed   :  { %5788 = vmatpush1.bf16.msra.mxu0 %v10656_v63  ;;  %v10865_v63 = vld [vmem:[#allocation11 + $0x6c] ss:$24 sps:$4 sm:$0xff]  }
 0x6ee   :  { %5789 = vmatprep.subr.bf16.mxu0 %v10659_v7  ;;  %11560 = vst [vmem:[#allocation20_spill] sm:$0xff] %v10865_v63  ;;  %v10868_v7 = vld [vmem:[#allocation11 + $0x60] ss:$24 sps:$4 sm:$0xff]  }
 0x6ef   :  { %6533 = vmatpush1.bf16.msra.mxu1 %v10868_v7 }
 0x6f1   :  { %5790 = vmatpush1.bf16.msra.mxu0 %v10664_v53  ;;  %v10872_v53 = vld [vmem:[#allocation11 + $0x68] ss:$24 sps:$4 sm:$0xff]  }
 0x6f2   :  { %5791 = vmatprep.subr.bf16.mxu0 %v10667_v1  ;;  %11561 = vst [vmem:[#allocation21_spill] sm:$0xff] %v10872_v53  ;;  %v10874_v1 = vld [vmem:[#allocation11 + $0x94] ss:$24 sps:$4 sm:$0xff]  }
 0x6f3   :  { %6534 = vmatprep.subr.bf16.mxu1 %v10874_v1 }
 0x6f5   :  { %5792 = vmatpush1.bf16.msra.mxu0 %v10672_v9  ;;  %v10877_v9 = vld [vmem:[#allocation11 + $0x9c] ss:$24 sps:$4 sm:$0xff]  }
 0x6f6   :  { %5793 = vmatprep.subr.bf16.mxu0 %v10675_v20  ;;  %11562 = vst [vmem:[#allocation22_spill] sm:$0xff] %v10877_v9  ;;  %v10880_v20 = vld [vmem:[#allocation11 + $0x90] ss:$24 sps:$4 sm:$0xff]  }
 0x6f7   :  { %6535 = vmatpush1.bf16.msra.mxu1 %v10880_v20 }
 0x6f9   :  { %5794 = vmatpush1.bf16.msra.mxu0 %v10680_v40  ;;  %v10884_v40 = vld [vmem:[#allocation11 + $0x98] ss:$24 sps:$4 sm:$0xff]  }
 0x6fa   :  { %5795 = vmatprep.subr.bf16.mxu0 %v10683_v32  ;;  %11563 = vst [vmem:[#allocation23_spill] sm:$0xff] %v10884_v40  ;;  %v10886_v32 = vld [vmem:[#allocation11 + $0xc4] ss:$24 sps:$4 sm:$0xff]  }
 0x6fb   :  { %6536 = vmatprep.subr.bf16.mxu1 %v10886_v32 }
 0x6fd   :  { %5796 = vmatpush1.bf16.msra.mxu0 %v10688_v4  ;;  %v10889_v4 = vld [vmem:[#allocation11 + $0xcc] ss:$24 sps:$4 sm:$0xff]  }
 0x6fe   :  { %5797 = vmatprep.subr.bf16.mxu0 %v10691_v18  ;;  %11564 = vst [vmem:[#allocation24_spill] sm:$0xff] %v10889_v4  ;;  %v10892_v18 = vld [vmem:[#allocation11 + $0xc0] ss:$24 sps:$4 sm:$0xff]  }
 0x6ff   :  { %6537 = vmatpush1.bf16.msra.mxu1 %v10892_v18 }
 0x701   :  { %5798 = vmatpush1.bf16.msra.mxu0 %v10696_v24  ;;  %v10896_v24 = vld [vmem:[#allocation11 + $0xc8] ss:$24 sps:$4 sm:$0xff]  }
 0x702   :  { %5799 = vmatprep.subr.bf16.mxu0 %v10699_v46  ;;  %11565 = vst [vmem:[#allocation25_spill] sm:$0xff] %v10896_v24  ;;  %v10898_v46 = vld [vmem:[#allocation11 + $0xf4] ss:$24 sps:$4 sm:$0xff]  }
 0x703   :  { %6538 = vmatprep.subr.bf16.mxu1 %v10898_v46 }
 0x705   :  { %5800 = vmatpush1.bf16.msra.mxu0 %v10704_v36  ;;  %v10901_v36 = vld [vmem:[#allocation11 + $0xfc] ss:$24 sps:$4 sm:$0xff]  }
 0x706   :  { %5801 = vmatprep.subr.bf16.mxu0 %v10707_v34  ;;  %11566 = vst [vmem:[#allocation26_spill] sm:$0xff] %v10901_v36  ;;  %v10904_v34 = vld [vmem:[#allocation11 + $0xf0] ss:$24 sps:$4 sm:$0xff]  }
 0x707   :  { %6539 = vmatpush1.bf16.msra.mxu1 %v10904_v34 }
 0x709   :  { %5802 = vmatpush1.bf16.msra.mxu0 %v10712_v56  ;;  %v10908_v56 = vld [vmem:[#allocation11 + $0xf8] ss:$24 sps:$4 sm:$0xff]  }
 0x70a   :  { %5803 = vmatprep.subr.bf16.mxu0 %v10715_v35  ;;  %11567 = vst [vmem:[#allocation27_spill] sm:$0xff] %v10908_v56  ;;  %v10910_v35 = vld [vmem:[#allocation11 + $0x124] ss:$24 sps:$4 sm:$0xff]  }
 0x70b   :  { %6540 = vmatprep.subr.bf16.mxu1 %v10910_v35 }
 0x70d   :  { %5804 = vmatpush1.bf16.msra.mxu0 %v10720_v57  ;;  %v10913_v57 = vld [vmem:[#allocation11 + $0x12c] ss:$24 sps:$4 sm:$0xff]  }
 0x70e   :  { %5805 = vmatprep.subr.bf16.mxu0 %v10723_v29  ;;  %11568 = vst [vmem:[#allocation28_spill] sm:$0xff] %v10913_v57  ;;  %v10916_v29 = vld [vmem:[#allocation11 + $0x120] ss:$24 sps:$4 sm:$0xff]  }
 0x70f   :  { %6541 = vmatpush1.bf16.msra.mxu1 %v10916_v29 }
 0x711   :  { %5806 = vmatpush1.bf16.msra.mxu0 %v10728_v41  ;;  %v10920_v41 = vld [vmem:[#allocation11 + $0x128] ss:$24 sps:$4 sm:$0xff]  }
 0x712   :  { %5807 = vmatprep.subr.bf16.mxu0 %v10731_v15  ;;  %11569 = vst [vmem:[#allocation29_spill] sm:$0xff] %v10920_v41  ;;  %v10922_v15 = vld [vmem:[#allocation11 + $0x154] ss:$24 sps:$4 sm:$0xff]  }
 0x713   :  { %6542 = vmatprep.subr.bf16.mxu1 %v10922_v15 }
 0x715   :  { %5808 = vmatpush1.bf16.msra.mxu0 %v10736_v12  ;;  %v10925_v12 = vld [vmem:[#allocation11 + $0x15c] ss:$24 sps:$4 sm:$0xff]  }
 0x716   :  { %5809 = vmatprep.subr.bf16.mxu0 %v10739_v33  ;;  %11570 = vst [vmem:[#allocation30_spill] sm:$0xff] %v10925_v12  ;;  %v10928_v33 = vld [vmem:[#allocation11 + $0x150] ss:$24 sps:$4 sm:$0xff]  }
 0x717   :  { %6543 = vmatpush1.bf16.msra.mxu1 %v10928_v33 }
 0x718   :  { %6544 = vmatprep.subr.bf16.mxu1 %v10937_v0 }
 0x719   :  { %5810 = vmatpush1.bf16.msra.mxu0 %v10744_v26  ;;  %v10932_v26 = vld [vmem:[#allocation11 + $0x158] ss:$24 sps:$4 sm:$0xff]  }
 0x71a   :  { %6569 = vmatprep.subr.bf16.mxu0 %v10847_v48  ;;  %11571 = vst [vmem:[#allocation31_spill] sm:$0xff] %v10932_v26 }
 0x71b   :  { %6545 = vmatpush1.bf16.msra.mxu1 %v10939_v58 }
 0x71c   :  { %5812 = vmatmul.mubr.bf16.vlgmr.msra.gmra.mrb[40].mxu0 %v5087_v43  ;;  %6546 = vmatprep.subr.bf16.mxu1 %v10949_v16  ;;  %v11004_v43 = vld [vmem:[#allocation11 + $0x278] ss:$24 sps:$4 sm:$0xff]  }
 0x71d   :  { %6570 = vmatpush1.bf16.msra.mxu0 %v10845_v6  ;;  %11583 = vst [vmem:[#allocation42_spill] sm:$0xff] %v11004_v43 }
 0x71e   :  { %6571 = vmatprep.subr.bf16.mxu0 %v10852_v51 }
 0x71f   :  { %6547 = vmatpush1.bf16.msra.mxu1 %v10951_v50 }
 0x720   :  { %6548 = vmatprep.subr.bf16.mxu1 %v10961_v47 }
 0x721   :  { %6572 = vmatpush1.bf16.msra.mxu0 %v10860_v25  ;;  %v5074_v25 = vld [vmem:[#allocation3 + $0x5] ss:$8 sm:$0x30] }
 0x722   :  { %6573 = vmatprep.subr.bf16.mxu0 %v10865_v63 }
 0x723   :  { %6549 = vmatpush1.bf16.msra.mxu1 %v10963_v39 }
 0x724   :  { %6550 = vmatprep.subr.bf16.mxu1 %v10973_v27 }
 0x725   :  { %6574 = vmatpush1.bf16.msra.mxu0 %v10872_v53 }
 0x726   :  { %6575 = vmatprep.subr.bf16.mxu0 %v10877_v9 }
 0x727   :  { %6551 = vmatpush1.bf16.msra.mxu1 %v10975_v60 }
 0x728   :  { %6552 = vmatprep.subr.bf16.mxu1 %v10986_v52 }
 0x729   :  { %6576 = vmatpush1.bf16.msra.mxu0 %v10884_v40 }
 0x72a   :  { %6577 = vmatprep.subr.bf16.mxu0 %v10889_v4 }
 0x72b   :  { %6553 = vmatpush1.bf16.msra.mxu1 %v10984_v10 }
 0x72c   :  { %6554 = vmatprep.subr.bf16.mxu1 %v10993_v44 }
 0x72d   :  { %6578 = vmatpush1.bf16.msra.mxu0 %v10896_v24 }
 0x72e   :  { %6579 = vmatprep.subr.bf16.mxu0 %v10901_v36 }
 0x72f   :  { %6555 = vmatpush1.bf16.msra.mxu1 %v11000_v11 }
 0x731   :  { %6580 = vmatpush1.bf16.msra.mxu0 %v10908_v56 }
 0x732   :  { %6581 = vmatprep.subr.bf16.mxu0 %v10913_v57 }
 0x735   :  { %6582 = vmatpush1.bf16.msra.mxu0 %v10920_v41 }
 0x736   :  { %6583 = vmatprep.subr.bf16.mxu0 %v10925_v12 }
 0x739   :  { %6584 = vmatpush1.bf16.msra.mxu0 %v10932_v26 }
 0x73a   :  { %6585 = vmatprep.subr.bf16.mxu0 %v10941_v31 }
 0x73d   :  { %6586 = vmatpush1.bf16.msra.mxu0 %v10944_v8  ;;  %v11589_v8 = vld [vmem:[#allocation18_spill] sm:$0xff] }
 0x73e   :  { %6587 = vmatprep.subr.bf16.mxu0 %v10953_v5 }
 0x741   :  { %6588 = vmatpush1.bf16.msra.mxu0 %v10956_v59  ;;  %v11028_v59 = vld [vmem:[#allocation11 + $0x2d8] ss:$24 sps:$4 sm:$0xff]  }
 0x742   :  { %6589 = vmatprep.subr.bf16.mxu0 %v10965_v22  ;;  %v11021_v22 = vld [vmem:[#allocation11 + $0x2dc] ss:$24 sps:$4 sm:$0xff]   ;;  %11587 = vst [vmem:[#allocation47_spill] sm:$0xff] %v11028_v59 }
 0x743   :  { %11586 = vst [vmem:[#allocation46_spill] sm:$0xff] %v11021_v22 }
 0x745   :  { %6590 = vmatpush1.bf16.msra.mxu0 %v10968_v37  ;;  %v11012_v37 = vld [vmem:[#allocation11 + $0x2a0] ss:$24 sps:$4 sm:$0xff]  }
 0x746   :  { %6591 = vmatprep.subr.bf16.mxu0 %v10977_v23  ;;  %v11009_v23 = vld [vmem:[#allocation11 + $0x2ac] ss:$24 sps:$4 sm:$0xff]  }
 0x747   :  { %11584 = vst [vmem:[#allocation44_spill] sm:$0xff] %v11009_v23 }
 0x749   :  { %6592 = vmatpush1.bf16.msra.mxu0 %v10980_v38  ;;  %v11006_v38 = vld [vmem:[#allocation11 + $0x2a4] ss:$24 sps:$4 sm:$0xff]  }
 0x74a   :  { %6593 = vmatprep.subr.bf16.mxu0 %v10991_v62  ;;  %6556 = vmatprep.subr.bf16.mxu1 %v11006_v38  ;;  %v11016_v62 = vld [vmem:[#allocation11 + $0x2a8] ss:$24 sps:$4 sm:$0xff]  }
 0x74b   :  { %11585 = vst [vmem:[#allocation45_spill] sm:$0xff] %v11016_v62  ;;  %6557 = vmatpush1.bf16.msra.mxu1 %v11012_v37 }
 0x74d   :  { %6594 = vmatpush1.bf16.msra.mxu0 %v10989_v2  ;;  %v11018_v2 = vld [vmem:[#allocation11 + $0x2d4] ss:$24 sps:$4 sm:$0xff]  }
 0x74e   :  { %6595 = vmatprep.subr.bf16.mxu0 %v10996_v54  ;;  %v11024_v54 = vld [vmem:[#allocation11 + $0x2d0] ss:$24 sps:$4 sm:$0xff]   ;;  %6558 = vmatprep.subr.bf16.mxu1 %v11018_v2 }
 0x74f   :  { %6559 = vmatpush1.bf16.msra.mxu1 %v11024_v54 }
 0x751   :  { %6596 = vmatpush1.bf16.msra.mxu0 %v11004_v43  ;;  %v11033_v43 = vld [vmem:[#allocation11 + $0x14] ss:$24 sps:$4 sm:$0xff]  }
 0x752   :  { %6597 = vmatprep.subr.bf16.mxu0 %v11009_v23  ;;  %11588 = vst [vmem:[#allocation48_spill] sm:$0xff] %v11033_v43  ;;  %6610 = vmatprep.subr.bf16.mxu1 %v11033_v43 }
 0x755   :  { %6598 = vmatpush1.bf16.msra.mxu0 %v11016_v62  ;;  %v5185_v62 = vld [vmem:[%s11316_s6] sm:$0x3f] }
 0x756   :  { %6599 = vmatprep.subr.bf16.mxu0 %v11021_v22  ;;  %v5670_v23 = vrot.slane %v5185_v62, %v9684_v14  ;;  %v5678_v5 = vrot.slane %v5185_v62, %v11555_v49  ;;  %v5674_v22 = vrot.slane %v5185_v62, %v9671_v42  ;;  %v5682_v31 = vrot.slane %v5185_v62, %v11589_v8  ;;  %v5073_v8 = vld [vmem:[#allocation3 + $0x5] ss:$8 sm:$0xf] }
 0x757   :  { %v5075_v6 = vor.u32 %v5074_v25, %v5073_v8 }
 0x759   :  { %6600 = vmatpush1.bf16.msra.mxu0 %v11028_v59 }
 0x75a   :  { %7359 = vmatprep.subr.bf16.mxu0 %v10843_v21 }
 0x7af   :  { %v5731_v26 = vpop.f32.mrb[36].mxu0  ;;  %v5772_v59 = vpop.f32.mrb[36].mxu1 }
 0x7b0   :  { %v5732_v12 = vadd.f32 %v5731_v26, %v5670_v23  ;;  %v5773_v41 = vadd.f32 %v5772_v59, %v5678_v5  ;;  %v5733_v57 = vpop.f32.mrb[37].mxu0  ;;  %v5774_v21 = vpop.f32.mrb[37].mxu1 }
 0x7b1   :  { %v5734_v56 = vadd.f32 %v5733_v57, %v5674_v22  ;;  %v5775_v36 = vadd.f32 %v5774_v21, %v5682_v31  ;;  %v5735_v24 = vpop.f32.mrb[38].mxu0  ;;  %v5776_v4 = vpop.f32.mrb[38].mxu1 }
 0x7b2   :  { %v5736_v40 = vpop.f32.mrb[39].mxu0  ;;  %v5777_v9 = vpop.f32.mrb[39].mxu1  ;;  %v5846_v24 = vrot.slane %v5075_v6, 2 }
 0x7b3   :  { %v5822_v53 = vcombine.low %v5732_v12, %v5734_v56  ;;  %v5850_v63 = vcombine.low %v5773_v41, %v5775_v36  ;;  %v5690_v56 = vrot.slane %v5185_v62, %v9910_v30 }
 0x7b5   :  { %v5829_v49 = vrot.slane %v5822_v53, %v9920_v19  ;;  %v5857_v26 = vrot.slane %v5850_v63, %v9920_v19  ;;  %v5686_v53 = vrot.slane %v5185_v62, %v9907_v28 }
 0x7b7   :  { %v5836_v51 = vrot.slane %v5829_v49, %v9920_v19  ;;  %v5864_v57 = vrot.slane %v5857_v26, %v9920_v19  ;;  %v5892_v26 = vrot.slane %v5075_v6, 4 }
 0x7b9   :  { %v5838_v43 = vadd.f32 %v5836_v51, %v5075_v6  ;;  %v5866_v4 = vadd.f32 %v5864_v57, %v5846_v24 }
 0x7bb   :  { %v8310_v5 = vmul.f32 -1.442695, %v5838_v43  ;;  %v8311_v40 = vmul.f32 -1.442695, %v5866_v4 }
 0x7bd   :  { %9296 = vpow2.f32 %v8310_v5 }
 0x7be   :  { %9298 = vpow2.f32 %v8311_v40 }
 0x7c7   :  { %v9297_v9 = vpop.eup %9296 }
 0x7c8   :  { %v5842_v36 = vadd.f32 1.0, %v9297_v9  ;;  %v9299_v12 = vpop.eup %9298 }
 0x7c9   :  { %v5870_v59 = vadd.f32 1.0, %v9299_v12  ;;  %v11087_v12 = vld [vmem:[#allocation11 + $0xa0] ss:$24 sps:$4 sm:$0xff]  }
 0x7ca   :  { %9300 = vrcp.f32 %v5842_v36 }
 0x7cb   :  { %9302 = vrcp.f32 %v5870_v59  ;;  %v11600_v59 = vld [vmem:[#allocation26_spill] sm:$0xff] }
 0x7d4   :  { %v9301_v43 = vpop.eup %9300 }
 0x7d5   :  { %v9303_v62 = vpop.eup %9302 }
 0x7d6   :  { %v5896_v57 = vsub.f32 1.0, %v9303_v62  ;;  %v5898_v40 = vmul.f32 %v9303_v62, %v10801_v55  ;;  %v11071_v55 = vld [vmem:[#allocation11 + $0x40] ss:$24 sps:$4 sm:$0xff]   ;;  %v11607_v62 = vld [vmem:[#allocation33_spill] sm:$0xff] }
 0x7ef   :  { %v5813_v49 = vpop.f32.mrb[40].mxu0 }
 0x7f0   :  { %v5814_v25 = vadd.f32 %v5813_v49, %v5686_v53  ;;  %v5815_v51 = vpop.f32.mrb[41].mxu0 }
 0x7f1   :  { %v5816_v41 = vadd.f32 %v5815_v51, %v5690_v56  ;;  %v5817_v63 = vpop.f32.mrb[42].mxu0  ;;  %v11062_v56 = vld [vmem:[#allocation11 + $0x10] ss:$24 sps:$4 sm:$0xff]   ;;  %v11074_v51 = vld [vmem:[#allocation11 + $0x74] ss:$24 sps:$4 sm:$0xff]  }
 0x7f2   :  { %v5818_v31 = vpop.f32.mrb[43].mxu0  ;;  %v11082_v63 = vld [vmem:[#allocation11 + $0xa4] ss:$24 sps:$4 sm:$0xff]  }
 0x7f3   :  { %v5875_v8 = vcombine.low %v5814_v25, %v5816_v41  ;;  %v11066_v25 = vld [vmem:[#allocation11 + $0x44] ss:$24 sps:$4 sm:$0xff]   ;;  %v11079_v41 = vld [vmem:[#allocation11 + $0x70] ss:$24 sps:$4 sm:$0xff]  }
 0x7f4   :  { %v11594_v31 = vld [vmem:[#allocation20_spill] sm:$0xff] }
 0x7f5   :  { %v5882_v22 = vrot.slane %v5875_v8, %v9920_v19  ;;  %v11597_v8 = vld [vmem:[#allocation23_spill] sm:$0xff] }
 0x7f7   :  { %v5889_v23 = vrot.slane %v5882_v22, %v9920_v19  ;;  %v11601_v22 = vld [vmem:[#allocation27_spill] sm:$0xff] }
 0x7f9   :  { %v5891_v21 = vmul.f32 %v9301_v43, %v5889_v23  ;;  %v11602_v23 = vld [vmem:[#allocation28_spill] sm:$0xff]  ;;  %v11603_v43 = vld [vmem:[#allocation29_spill] sm:$0xff] }
 0x7fb   :  { %v5894_v5 = vadd.f32 %v5892_v26, %v5891_v21  ;;  %v11604_v21 = vld [vmem:[#allocation30_spill] sm:$0xff]  ;;  %v11605_v26 = vld [vmem:[#allocation31_spill] sm:$0xff] }
 0x7fd   :  { %9304 = vtanh.f32 %v5894_v5  ;;  %v11606_v5 = vld [vmem:[#allocation32_spill] sm:$0xff] }
 0x807   :  { %v9305_v24 = vpop.eup %9304 }
 0x808   :  { %v5897_v4 = vmul.f32 %v9305_v24, %v5896_v57  ;;  %v11608_v57 = vld [vmem:[#allocation34_spill] sm:$0xff]  ;;  %v11609_v24 = vld [vmem:[#allocation35_spill] sm:$0xff] }
 0x80a   :  { %v11053_v9 = vadd.f32 %v5898_v40, %v5897_v4  ;;  %v11610_v4 = vld [vmem:[#allocation36_spill] sm:$0xff]  ;;  %v11611_v40 = vld [vmem:[#allocation37_spill] sm:$0xff] }
 0x80c   :  { %5901 = vst.msk [vmem:[#allocation12 + $0x5] ss:$8 sm:$0x3] %vm9633_vm0, %v11053_v9  ;;  %v5915_v36 = vrot.slane %v11053_v9, %v9671_v42  ;;  %v5911_v6 = vrot.slane %v11053_v9, %v9684_v14 }
 0x80e   :  { %v5919_v53 = vpack.c.bf16 %v5915_v36, %v5915_v36  ;;  %v11064_v49 = vpack.c.bf16 %v5911_v6, %v5911_v6  ;;  %v11612_v36 = vld [vmem:[#allocation38_spill] sm:$0xff]  ;;  %v11613_v6 = vld [vmem:[#allocation39_spill] sm:$0xff] }
 0x810   :  { %6560 = vmatprep.mubr.bf16.mxu1 %v5919_v53  ;;  %6601 = vmatprep.mubr.bf16.mxu0 %v5919_v53 }
 0x811   :  { %6561 = vmatmul.mubr.bf16.vlgmr.msra.gmra.mrb[40].mxu1 %v11064_v49  ;;  %6602 = vmatmul.mubr.bf16.vlgmr.msra.gmra.mrb[44].mxu0 %v11064_v49 }
 0x812   :  { %6611 = vmatpush1.bf16.msra.mxu1 %v11062_v56  ;;  %6642 = vmatprep.mubr.bf16.mxu1 %v5919_v53  ;;  %v11614_v53 = vld [vmem:[#allocation43_spill] sm:$0xff] }
 0x813   :  { %6612 = vmatprep.subr.bf16.mxu1 %v11066_v25  ;;  %7360 = vmatpush1.bf16.msra.mxu0 %v10841_v13  ;;  %v11090_v13 = vld [vmem:[#allocation11 + $0xd4] ss:$24 sps:$4 sm:$0xff]  }
 0x814   :  { %7361 = vmatprep.subr.bf16.mxu0 %v10849_v3  ;;  %v11095_v3 = vld [vmem:[#allocation11 + $0xd0] ss:$24 sps:$4 sm:$0xff]  }
 0x816   :  { %6613 = vmatpush1.bf16.msra.mxu1 %v11071_v55 }
 0x817   :  { %6614 = vmatprep.subr.bf16.mxu1 %v11074_v51  ;;  %7362 = vmatpush1.bf16.msra.mxu0 %v10856_v61  ;;  %v11098_v61 = vld [vmem:[#allocation11 + $0x104] ss:$24 sps:$4 sm:$0xff]  }
 0x818   :  { %7363 = vmatprep.subr.bf16.mxu0 %v10862_v17  ;;  %v11103_v17 = vld [vmem:[#allocation11 + $0x100] ss:$24 sps:$4 sm:$0xff]  }
 0x81a   :  { %6615 = vmatpush1.bf16.msra.mxu1 %v11079_v41 }
 0x81b   :  { %6616 = vmatprep.subr.bf16.mxu1 %v11082_v63  ;;  %7364 = vmatpush1.bf16.msra.mxu0 %v10868_v7  ;;  %v11106_v7 = vld [vmem:[#allocation11 + $0x134] ss:$24 sps:$4 sm:$0xff]  }
 0x81c   :  { %7365 = vmatprep.subr.bf16.mxu0 %v10874_v1  ;;  %v11111_v1 = vld [vmem:[#allocation11 + $0x130] ss:$24 sps:$4 sm:$0xff]  }
 0x81e   :  { %6617 = vmatpush1.bf16.msra.mxu1 %v11087_v12 }
 0x81f   :  { %6618 = vmatprep.subr.bf16.mxu1 %v11090_v13  ;;  %7366 = vmatpush1.bf16.msra.mxu0 %v10880_v20  ;;  %v11114_v20 = vld [vmem:[#allocation11 + $0x164] ss:$24 sps:$4 sm:$0xff]  }
 0x820   :  { %7367 = vmatprep.subr.bf16.mxu0 %v10886_v32  ;;  %v11119_v32 = vld [vmem:[#allocation11 + $0x160] ss:$24 sps:$4 sm:$0xff]  }
 0x822   :  { %6619 = vmatpush1.bf16.msra.mxu1 %v11095_v3 }
 0x823   :  { %6620 = vmatprep.subr.bf16.mxu1 %v11098_v61  ;;  %7368 = vmatpush1.bf16.msra.mxu0 %v10892_v18  ;;  %v11122_v18 = vld [vmem:[#allocation11 + $0x194] ss:$24 sps:$4 sm:$0xff]  }
 0x824   :  { %7369 = vmatprep.subr.bf16.mxu0 %v10898_v46  ;;  %v11127_v46 = vld [vmem:[#allocation11 + $0x190] ss:$24 sps:$4 sm:$0xff]  }
 0x826   :  { %6621 = vmatpush1.bf16.msra.mxu1 %v11103_v17 }
 0x827   :  { %6622 = vmatprep.subr.bf16.mxu1 %v11106_v7  ;;  %7370 = vmatpush1.bf16.msra.mxu0 %v10904_v34  ;;  %v11130_v34 = vld [vmem:[#allocation11 + $0x1c4] ss:$24 sps:$4 sm:$0xff]  }
 0x828   :  { %7371 = vmatprep.subr.bf16.mxu0 %v10910_v35  ;;  %v11135_v35 = vld [vmem:[#allocation11 + $0x1c0] ss:$24 sps:$4 sm:$0xff]  }
 0x82a   :  { %6623 = vmatpush1.bf16.msra.mxu1 %v11111_v1 }
 0x82b   :  { %6624 = vmatprep.subr.bf16.mxu1 %v11114_v20  ;;  %7372 = vmatpush1.bf16.msra.mxu0 %v10916_v29  ;;  %v11138_v29 = vld [vmem:[#allocation11 + $0x1f4] ss:$24 sps:$4 sm:$0xff]  }
 0x82c   :  { %7373 = vmatprep.subr.bf16.mxu0 %v10922_v15  ;;  %v11143_v15 = vld [vmem:[#allocation11 + $0x1f0] ss:$24 sps:$4 sm:$0xff]  }
 0x82e   :  { %6625 = vmatpush1.bf16.msra.mxu1 %v11119_v32 }
 0x82f   :  { %6626 = vmatprep.subr.bf16.mxu1 %v11122_v18  ;;  %7374 = vmatpush1.bf16.msra.mxu0 %v10928_v33  ;;  %v11146_v33 = vld [vmem:[#allocation11 + $0x224] ss:$24 sps:$4 sm:$0xff]  }
 0x830   :  { %7375 = vmatprep.subr.bf16.mxu0 %v10937_v0  ;;  %v11151_v0 = vld [vmem:[#allocation11 + $0x220] ss:$24 sps:$4 sm:$0xff]  }
 0x832   :  { %6627 = vmatpush1.bf16.msra.mxu1 %v11127_v46 }
 0x833   :  { %6628 = vmatprep.subr.bf16.mxu1 %v11130_v34  ;;  %7376 = vmatpush1.bf16.msra.mxu0 %v10939_v58  ;;  %v11154_v58 = vld [vmem:[#allocation11 + $0x254] ss:$24 sps:$4 sm:$0xff]  }
 0x834   :  { %7377 = vmatprep.subr.bf16.mxu0 %v10949_v16  ;;  %v11159_v16 = vld [vmem:[#allocation11 + $0x250] ss:$24 sps:$4 sm:$0xff]  }
 0x836   :  { %6629 = vmatpush1.bf16.msra.mxu1 %v11135_v35 }
 0x837   :  { %6630 = vmatprep.subr.bf16.mxu1 %v11138_v29  ;;  %7378 = vmatpush1.bf16.msra.mxu0 %v10951_v50  ;;  %v11162_v50 = vld [vmem:[#allocation11 + $0x284] ss:$24 sps:$4 sm:$0xff]  }
 0x838   :  { %7379 = vmatprep.subr.bf16.mxu0 %v10961_v47  ;;  %v11167_v47 = vld [vmem:[#allocation11 + $0x280] ss:$24 sps:$4 sm:$0xff]  }
 0x83a   :  { %6631 = vmatpush1.bf16.msra.mxu1 %v11143_v15 }
 0x83b   :  { %6632 = vmatprep.subr.bf16.mxu1 %v11146_v33  ;;  %7380 = vmatpush1.bf16.msra.mxu0 %v10963_v39  ;;  %v11170_v39 = vld [vmem:[#allocation11 + $0x2b4] ss:$24 sps:$4 sm:$0xff]  }
 0x83c   :  { %7381 = vmatprep.subr.bf16.mxu0 %v10973_v27  ;;  %v11175_v27 = vld [vmem:[#allocation11 + $0x2b0] ss:$24 sps:$4 sm:$0xff]  }
 0x83e   :  { %6633 = vmatpush1.bf16.msra.mxu1 %v11151_v0 }
 0x83f   :  { %6634 = vmatprep.subr.bf16.mxu1 %v11154_v58  ;;  %7382 = vmatpush1.bf16.msra.mxu0 %v10975_v60  ;;  %v11178_v60 = vld [vmem:[#allocation11 + $0x2e4] ss:$24 sps:$4 sm:$0xff]  }
 0x840   :  { %7383 = vmatprep.subr.bf16.mxu0 %v10986_v52  ;;  %v11183_v52 = vld [vmem:[#allocation11 + $0x2e0] ss:$24 sps:$4 sm:$0xff]  }
 0x842   :  { %6635 = vmatpush1.bf16.msra.mxu1 %v11159_v16 }
 0x843   :  { %6636 = vmatprep.subr.bf16.mxu1 %v11162_v50  ;;  %7384 = vmatpush1.bf16.msra.mxu0 %v10984_v10  ;;  %v11590_v10 = vld [vmem:[#allocation48_spill] sm:$0xff] }
 0x844   :  { %7385 = vmatprep.subr.bf16.mxu0 %v10993_v44  ;;  %v11592_v44 = vld [vmem:[#allocation50_spill] sm:$0xff] }
 0x846   :  { %6637 = vmatpush1.bf16.msra.mxu1 %v11167_v47 }
 0x847   :  { %6638 = vmatprep.subr.bf16.mxu1 %v11170_v39  ;;  %7386 = vmatpush1.bf16.msra.mxu0 %v11000_v11  ;;  %v11593_v11 = vld [vmem:[#allocation19_spill] sm:$0xff] }
 0x848   :  { %7387 = vmatprep.subr.bf16.mxu0 %v11006_v38  ;;  %v11591_v38 = vld [vmem:[#allocation49_spill] sm:$0xff] }
 0x84a   :  { %6639 = vmatpush1.bf16.msra.mxu1 %v11175_v27 }
 0x84b   :  { %6640 = vmatprep.subr.bf16.mxu1 %v11178_v60  ;;  %7388 = vmatpush1.bf16.msra.mxu0 %v11012_v37  ;;  %v11595_v37 = vld [vmem:[#allocation21_spill] sm:$0xff] }
 0x84c   :  { %7389 = vmatprep.subr.bf16.mxu0 %v11018_v2  ;;  %v11596_v2 = vld [vmem:[#allocation22_spill] sm:$0xff] }
 0x84e   :  { %6641 = vmatpush1.bf16.msra.mxu1 %v11183_v52 }
 0x84f   :  { %7400 = vmatprep.subr.bf16.mxu1 %v10847_v48  ;;  %7390 = vmatpush1.bf16.msra.mxu0 %v11024_v54  ;;  %v11598_v48 = vld [vmem:[#allocation24_spill] sm:$0xff]  ;;  %v11599_v54 = vld [vmem:[#allocation25_spill] sm:$0xff] }
 0x850   :  { %7441 = vmatprep.subr.bf16.mxu0 %v11590_v10  ;;  %v11616_v10 = vld [vmem:[#allocation41_spill] sm:$0xff] }
 0x851   :  { %6643 = vmatmul.mubr.bf16.vlgmr.msra.gmra.mrb[44].mxu1 %v11064_v49  ;;  %v11615_v49 = vld [vmem:[#allocation40_spill] sm:$0xff] }
 0x852   :  { %7401 = vmatpush1.bf16.msra.mxu1 %v11591_v38  ;;  %v11617_v38 = vld [vmem:[#allocation42_spill] sm:$0xff] }
 0x853   :  { %7402 = vmatprep.subr.bf16.mxu1 %v11592_v44  ;;  %v11618_v44 = vld [vmem:[#allocation44_spill] sm:$0xff] }
 0x856   :  { %7403 = vmatpush1.bf16.msra.mxu1 %v11593_v11  ;;  %v11619_v11 = vld [vmem:[#allocation45_spill] sm:$0xff] }
 0x857   :  { %7404 = vmatprep.subr.bf16.mxu1 %v11594_v31  ;;  %v11620_v31 = vld [vmem:[#allocation46_spill] sm:$0xff] }
 0x85a   :  { %7405 = vmatpush1.bf16.msra.mxu1 %v11595_v37  ;;  %v11621_v37 = vld [vmem:[#allocation47_spill] sm:$0xff] }
 0x85b   :  { %7406 = vmatprep.subr.bf16.mxu1 %v11596_v2  ;;  %v6016_v2 = vld [vmem:[%s11316_s6] sm:$0x3f] }
 0x85e   :  { %7407 = vmatpush1.bf16.msra.mxu1 %v11597_v8  ;;  %v6501_v8 = vrot.slane %v6016_v2, %v9684_v14 }
 0x85f   :  { %7408 = vmatprep.subr.bf16.mxu1 %v11598_v48  ;;  %v11622_v48 = vld [vmem:[#allocation17_spill] sm:$0xff] }
 0x862   :  { %7409 = vmatpush1.bf16.msra.mxu1 %v11599_v54  ;;  %v6509_v54 = vrot.slane %v6016_v2, %v11622_v48 }
 0x863   :  { %7410 = vmatprep.subr.bf16.mxu1 %v11600_v59  ;;  %v6505_v59 = vrot.slane %v6016_v2, %v9671_v42 }
 0x866   :  { %7411 = vmatpush1.bf16.msra.mxu1 %v11601_v22  ;;  %v11623_v22 = vld [vmem:[#allocation18_spill] sm:$0xff] }
 0x867   :  { %7412 = vmatprep.subr.bf16.mxu1 %v11602_v23  ;;  %v6513_v23 = vrot.slane %v6016_v2, %v11623_v22 }
 0x86a   :  { %7413 = vmatpush1.bf16.msra.mxu1 %v11603_v43 }
 0x86b   :  { %7414 = vmatprep.subr.bf16.mxu1 %v11604_v21 }
 0x86e   :  { %7415 = vmatpush1.bf16.msra.mxu1 %v11605_v26 }
 0x86f   :  { %7416 = vmatprep.subr.bf16.mxu1 %v11606_v5 }
 0x872   :  { %7417 = vmatpush1.bf16.msra.mxu1 %v11607_v62 }
 0x873   :  { %7418 = vmatprep.subr.bf16.mxu1 %v11608_v57 }
 0x876   :  { %7419 = vmatpush1.bf16.msra.mxu1 %v11609_v24 }
 0x877   :  { %7420 = vmatprep.subr.bf16.mxu1 %v11610_v4 }
 0x87a   :  { %7421 = vmatpush1.bf16.msra.mxu1 %v11611_v40 }
 0x87b   :  { %7422 = vmatprep.subr.bf16.mxu1 %v11612_v36 }
 0x87e   :  { %7423 = vmatpush1.bf16.msra.mxu1 %v11613_v6 }
 0x87f   :  { %7424 = vmatprep.subr.bf16.mxu1 %v11614_v53 }
 0x882   :  { %7425 = vmatpush1.bf16.msra.mxu1 %v11615_v49 }
 0x883   :  { %7426 = vmatprep.subr.bf16.mxu1 %v11616_v10 }
 0x886   :  { %7427 = vmatpush1.bf16.msra.mxu1 %v11617_v38 }
 0x887   :  { %7428 = vmatprep.subr.bf16.mxu1 %v11618_v44  ;;  %v5905_v44 = vld [vmem:[#allocation3 + $0x6] ss:$8 sm:$0x30] }
 0x88a   :  { %7429 = vmatpush1.bf16.msra.mxu1 %v11619_v11 }
 0x88b   :  { %7430 = vmatprep.subr.bf16.mxu1 %v11620_v31  ;;  %v5904_v31 = vld [vmem:[#allocation3 + $0x6] ss:$8 sm:$0xf] }
 0x88e   :  { %7431 = vmatpush1.bf16.msra.mxu1 %v11621_v37  ;;  %v5906_v37 = vor.u32 %v5905_v44, %v5904_v31 }
 0x8e4   :  { %v6562_v43 = vpop.f32.mrb[40].mxu1  ;;  %v6603_v21 = vpop.f32.mrb[44].mxu0 }
 0x8e5   :  { %v6563_v26 = vadd.f32 %v6562_v43, %v6501_v8  ;;  %v6604_v5 = vadd.f32 %v6603_v21, %v6509_v54  ;;  %v6564_v62 = vpop.f32.mrb[41].mxu1  ;;  %v6605_v57 = vpop.f32.mrb[45].mxu0 }
 0x8e6   :  { %v6565_v24 = vadd.f32 %v6564_v62, %v6505_v59  ;;  %v6606_v4 = vadd.f32 %v6605_v57, %v6513_v23  ;;  %v6566_v40 = vpop.f32.mrb[42].mxu1  ;;  %v6607_v36 = vpop.f32.mrb[46].mxu0  ;;  %v6677_v23 = vrot.slane %v5906_v37, 2  ;;  %v6521_v57 = vrot.slane %v6016_v2, %v9910_v30 }
 0x8e7   :  { %v6567_v6 = vpop.f32.mrb[43].mxu1  ;;  %v6608_v53 = vpop.f32.mrb[47].mxu0 }
 0x8e8   :  { %v6653_v49 = vcombine.low %v6563_v26, %v6565_v24  ;;  %v6681_v10 = vcombine.low %v6604_v5, %v6606_v4  ;;  %v6517_v5 = vrot.slane %v6016_v2, %v9907_v28 }
 0x8ea   :  { %v6660_v38 = vrot.slane %v6653_v49, %v9920_v19  ;;  %v6688_v8 = vrot.slane %v6681_v10, %v9920_v19 }
 0x8ec   :  { %v6667_v11 = vrot.slane %v6660_v38, %v9920_v19  ;;  %v6695_v59 = vrot.slane %v6688_v8, %v9920_v19  ;;  %v6723_v8 = vrot.slane %v5906_v37, 4 }
 0x8ee   :  { %v6669_v22 = vadd.f32 %v6667_v11, %v5906_v37  ;;  %v6697_v43 = vadd.f32 %v6695_v59, %v6677_v23 }
 0x8f0   :  { %v8408_v54 = vmul.f32 -1.442695, %v6669_v22  ;;  %v8409_v21 = vmul.f32 -1.442695, %v6697_v43 }
 0x8f2   :  { %9306 = vpow2.f32 %v8408_v54 }
 0x8f3   :  { %9308 = vpow2.f32 %v8409_v21 }
 0x8fc   :  { %v9307_v62 = vpop.eup %9306 }
 0x8fd   :  { %v6673_v26 = vadd.f32 1.0, %v9307_v62  ;;  %v9309_v22 = vpop.eup %9308 }
 0x8fe   :  { %v6701_v10 = vadd.f32 1.0, %v9309_v22 }
 0x8ff   :  { %9310 = vrcp.f32 %v6673_v26 }
 0x900   :  { %9312 = vrcp.f32 %v6701_v10 }
 0x909   :  { %v9311_v11 = vpop.eup %9310 }
 0x90a   :  { %v9313_v2 = vpop.eup %9312 }
 0x90b   :  { %v6727_v59 = vsub.f32 1.0, %v9313_v2  ;;  %v6729_v21 = vmul.f32 %v9313_v2, %v11053_v9  ;;  %v6847_v9 = vld [vmem:[%s11316_s6] sm:$0x3f]  ;;  %s9484_s6 = smov [#allocation12]  }
 0x90c   :  { %s7571_s15 = sshll.u32 %s9484_s6, 4  ;;  %s7572_s15 = int_to_ptr.vmem [resolvable:$true] %s7571_s15 }
 0x90d   :  { %s9445_s16 = scalar_lea.vmem %s7572_s15, 256  ;;  %p9450_p0 = scmp.lt.s32.totalorder %s7572_s15, %s7572_s15 }
 0x90e   :  { %p9446_p13 = scmp.ne.s32.totalorder %s7572_s15, %s9445_s16  ;;  %p9451_p1 = scmp.lt.s32.totalorder %s9445_s16, %s9445_s16 }
 0x910   :  { %p9452_p2 = por %p9451_p1, %p9450_p0 }
 0x912   :  { %p9453_p3 = pnand %p9452_p2, %p9446_p13 }
 0x924   :  { %v6644_v24 = vpop.f32.mrb[44].mxu1 }
 0x925   :  { %v6645_v4 = vadd.f32 %v6644_v24, %v6517_v5  ;;  %v6646_v40 = vpop.f32.mrb[45].mxu1  ;;  %v7352_v24 = vrot.slane %v6847_v9, %v9910_v30 }
 0x926   :  { %v6647_v36 = vadd.f32 %v6646_v40, %v6521_v57  ;;  %v6648_v6 = vpop.f32.mrb[46].mxu1 }
 0x927   :  { %v6649_v53 = vpop.f32.mrb[47].mxu1 }
 0x928   :  { %v6706_v49 = vcombine.low %v6645_v4, %v6647_v36 }
 0x92a   :  { %v6713_v38 = vrot.slane %v6706_v49, %v9920_v19 }
 0x92c   :  { %v6720_v44 = vrot.slane %v6713_v38, %v9920_v19 }
 0x92e   :  { %v6722_v31 = vmul.f32 %v9311_v11, %v6720_v44 }
 0x930   :  { %v6725_v54 = vadd.f32 %v6723_v8, %v6722_v31 }
 0x932   :  { %9314 = vtanh.f32 %v6725_v54 }
 0x93c   :  { %v9315_v23 = vpop.eup %9314 }
 0x93d   :  { %v6728_v43 = vmul.f32 %v9315_v23, %v6727_v59 }
 0x93f   :  { %v11240_v62 = vadd.f32 %v6729_v21, %v6728_v43 }
 0x941   :  { %6732 = vst.msk [vmem:[#allocation12 + $0x6] ss:$8 sm:$0x3] %vm9633_vm0, %v11240_v62  ;;  %v6746_v26 = vrot.slane %v11240_v62, %v9671_v42  ;;  %v6742_v37 = vrot.slane %v11240_v62, %v9684_v14 }
 0x943   :  { %v6750_v5 = vpack.c.bf16 %v6746_v26, %v6746_v26  ;;  %v6749_v57 = vpack.c.bf16 %v6742_v37, %v6742_v37 }
 0x945   :  { %7391 = vmatprep.mubr.bf16.mxu0 %v6750_v5  ;;  %7432 = vmatprep.mubr.bf16.mxu1 %v6750_v5 }
 0x946   :  { %7392 = vmatmul.mubr.bf16.vlgmr.msra.gmra.mrb[48].mxu0 %v6749_v57  ;;  %7433 = vmatmul.mubr.bf16.vlgmr.msra.gmra.mrb[48].mxu1 %v6749_v57 }
 0x947   :  { %7442 = vmatpush1.bf16.msra.mxu0 %v11062_v56  ;;  %7473 = vmatprep.mubr.bf16.mxu0 %v6750_v5  ;;  %v7332_v56 = vrot.slane %v6847_v9, %v9684_v14 }
 0x948   :  { %7443 = vmatprep.subr.bf16.mxu0 %v11066_v25  ;;  %v7340_v25 = vrot.slane %v6847_v9, %v11622_v48  ;;  %v7348_v48 = vrot.slane %v6847_v9, %v9907_v28 }
 0x94b   :  { %7444 = vmatpush1.bf16.msra.mxu0 %v11071_v55  ;;  %v7336_v55 = vrot.slane %v6847_v9, %v9671_v42 }
 0x94c   :  { %7445 = vmatprep.subr.bf16.mxu0 %v11074_v51  ;;  %v11624_v51 = vld [vmem:[#allocation18_spill] sm:$0xff] }
 0x94f   :  { %7446 = vmatpush1.bf16.msra.mxu0 %v11079_v41  ;;  %v7344_v41 = vrot.slane %v6847_v9, %v11624_v51 }
 0x950   :  { %7447 = vmatprep.subr.bf16.mxu0 %v11082_v63 }
 0x953   :  { %7448 = vmatpush1.bf16.msra.mxu0 %v11087_v12 }
 0x954   :  { %7449 = vmatprep.subr.bf16.mxu0 %v11090_v13 }
 0x957   :  { %7450 = vmatpush1.bf16.msra.mxu0 %v11095_v3 }
 0x958   :  { %7451 = vmatprep.subr.bf16.mxu0 %v11098_v61 }
 0x95b   :  { %7452 = vmatpush1.bf16.msra.mxu0 %v11103_v17 }
 0x95c   :  { %7453 = vmatprep.subr.bf16.mxu0 %v11106_v7 }
 0x95f   :  { %7454 = vmatpush1.bf16.msra.mxu0 %v11111_v1 }
 0x960   :  { %7455 = vmatprep.subr.bf16.mxu0 %v11114_v20 }
 0x963   :  { %7456 = vmatpush1.bf16.msra.mxu0 %v11119_v32 }
 0x964   :  { %7457 = vmatprep.subr.bf16.mxu0 %v11122_v18 }
 0x967   :  { %7458 = vmatpush1.bf16.msra.mxu0 %v11127_v46 }
 0x968   :  { %7459 = vmatprep.subr.bf16.mxu0 %v11130_v34 }
 0x96b   :  { %7460 = vmatpush1.bf16.msra.mxu0 %v11135_v35 }
 0x96c   :  { %7461 = vmatprep.subr.bf16.mxu0 %v11138_v29  ;;  %v6736_v29 = vld [vmem:[#allocation3 + $0x7] ss:$8 sm:$0x30] }
 0x96f   :  { %7462 = vmatpush1.bf16.msra.mxu0 %v11143_v15  ;;  %v6735_v15 = vld [vmem:[#allocation3 + $0x7] ss:$8 sm:$0xf] }
 0x970   :  { %7463 = vmatprep.subr.bf16.mxu0 %v11146_v33  ;;  %v6737_v33 = vor.u32 %v6736_v29, %v6735_v15 }
 0x972   :  { %v7554_v28 = vrot.slane %v6737_v33, 4 }
 0x973   :  { %7464 = vmatpush1.bf16.msra.mxu0 %v11151_v0 }
 0x974   :  { %7465 = vmatprep.subr.bf16.mxu0 %v11154_v58 }
 0x977   :  { %7466 = vmatpush1.bf16.msra.mxu0 %v11159_v16 }
 0x978   :  { %7467 = vmatprep.subr.bf16.mxu0 %v11162_v50 }
 0x97b   :  { %7468 = vmatpush1.bf16.msra.mxu0 %v11167_v47  ;;  %v7508_v47 = vrot.slane %v6737_v33, 2 }
 0x97c   :  { %7469 = vmatprep.subr.bf16.mxu0 %v11170_v39 }
 0x97f   :  { %7470 = vmatpush1.bf16.msra.mxu0 %v11175_v27 }
 0x980   :  { %7471 = vmatprep.subr.bf16.mxu0 %v11178_v60 }
 0x983   :  { %7472 = vmatpush1.bf16.msra.mxu0 %v11183_v52 }
 0x986   :  { %7474 = vmatmul.mubr.bf16.vlgmr.msra.gmra.mrb[52].mxu0 %v6749_v57 }
 0xa19   :  { %v7393_v63 = vpop.f32.mrb[48].mxu0  ;;  %v7434_v12 = vpop.f32.mrb[48].mxu1 }
 0xa1a   :  { %v7394_v13 = vadd.f32 %v7393_v63, %v7332_v56  ;;  %v7435_v3 = vadd.f32 %v7434_v12, %v7340_v25  ;;  %v7395_v61 = vpop.f32.mrb[49].mxu0  ;;  %v7436_v17 = vpop.f32.mrb[49].mxu1 }
 0xa1b   :  { %v7396_v7 = vadd.f32 %v7395_v61, %v7336_v55  ;;  %v7437_v1 = vadd.f32 %v7436_v17, %v7344_v41  ;;  %v7397_v20 = vpop.f32.mrb[50].mxu0  ;;  %v7438_v32 = vpop.f32.mrb[50].mxu1 }
 0xa1c   :  { %v7398_v18 = vpop.f32.mrb[51].mxu0  ;;  %v7439_v46 = vpop.f32.mrb[51].mxu1 }
 0xa1d   :  { %v7484_v34 = vcombine.low %v7394_v13, %v7396_v7  ;;  %v7512_v14 = vcombine.low %v7435_v3, %v7437_v1 }
 0xa1f   :  { %v7491_v35 = vrot.slane %v7484_v34, %v9920_v19  ;;  %v7519_v58 = vrot.slane %v7512_v14, %v9920_v19 }
 0xa21   :  { %v7498_v42 = vrot.slane %v7491_v35, %v9920_v19  ;;  %v7526_v50 = vrot.slane %v7519_v58, %v9920_v19 }
 0xa23   :  { %v7500_v0 = vadd.f32 %v7498_v42, %v6737_v33  ;;  %v7528_v39 = vadd.f32 %v7526_v50, %v7508_v47 }
 0xa25   :  { %v8506_v16 = vmul.f32 -1.442695, %v7500_v0  ;;  %v8507_v27 = vmul.f32 -1.442695, %v7528_v39 }
 0xa27   :  { %9316 = vpow2.f32 %v8506_v16 }
 0xa28   :  { %9318 = vpow2.f32 %v8507_v27 }
 0xa31   :  { %v9317_v60 = vpop.eup %9316 }
 0xa32   :  { %v7504_v52 = vadd.f32 1.0, %v9317_v60  ;;  %v9319_v53 = vpop.eup %9318 }
 0xa33   :  { %v7532_v38 = vadd.f32 1.0, %v9319_v53 }
 0xa34   :  { %9320 = vrcp.f32 %v7504_v52 }
 0xa35   :  { %9322 = vrcp.f32 %v7532_v38 }
 0xa3e   :  { %v9321_v31 = vpop.eup %9320 }
 0xa3f   :  { %v9323_v30 = vpop.eup %9322 }
 0xa40   :  { %v7558_v2 = vsub.f32 1.0, %v9323_v30  ;;  %v7560_v23 = vmul.f32 %v9323_v30, %v11240_v62 }
 0xa59   :  { %v7475_v4 = vpop.f32.mrb[52].mxu0 }
 0xa5a   :  { %v7476_v40 = vadd.f32 %v7475_v4, %v7348_v48  ;;  %v7477_v36 = vpop.f32.mrb[53].mxu0 }
 0xa5b   :  { %v7478_v6 = vadd.f32 %v7477_v36, %v7352_v24  ;;  %v7479_v22 = vpop.f32.mrb[54].mxu0 }
 0xa5c   :  { %v7480_v49 = vpop.f32.mrb[55].mxu0 }
 0xa5d   :  { %v7537_v10 = vcombine.low %v7476_v40, %v7478_v6 }
 0xa5f   :  { %v7544_v44 = vrot.slane %v7537_v10, %v9920_v19 }
 0xa61   :  { %v7551_v11 = vrot.slane %v7544_v44, %v9920_v19 }
 0xa63   :  { %v7553_v8 = vmul.f32 %v9321_v31, %v7551_v11 }
 0xa65   :  { %v7556_v54 = vadd.f32 %v7554_v28, %v7553_v8 }
 0xa67   :  { %9324 = vtanh.f32 %v7556_v54 }
 0xa71   :  { %v9325_v59 = vpop.eup %9324 }
 0xa72   :  { %v7559_v43 = vmul.f32 %v9325_v59, %v7558_v2 }
 0xa74   :  { %v7561_v21 = vadd.f32 %v7560_v23, %v7559_v43 }
 0xa76   :  { %7563 = vst.msk [vmem:[#allocation12 + $0x7] ss:$8 sm:$0x3] %vm9633_vm0, %v7561_v21 }
 0xa77   :  { %9456 = shalt.err (!%p9453_p3)
}
 0xa78   :  { %s9457_s12 = scalar_lea.hbm %s11317_s7, 256 }
 0xa79   :  { %p9458_p4 = scmp.ne.s32.totalorder %s11317_s7, %s9457_s12  ;;  %p9461_p5 = scmp.lt.u32.totalorder %s9457_s12, %s11317_s7 }
 0xa7b   :  { %p9463_p6 = pnand %p9461_p5, %p9458_p4 }
 0xa7d   :  { %9466 = shalt.err (!%p9463_p6)
}
 0xa7e   :  { %7574 = dma.vmem_to_hbm [thread:$0]  %s7572_s15, 256, %s11317_s7, [#allocation8]  }
 0xa7f   :  { %9473 = dma.done.wait [#allocation8], 256  }
 0xa80   :  { %9474 = vsyncadd [#allocation8], 4294967040 }
 0xa81   :  { %7578 = vsyncpa [#allocation7], 1 }
 0xa82   :  { %7579 = vsyncpa [#allocation10], 1 }
 0xa83   :  { %7580 = vsyncpa [#allocation8], 1 }

</bundles_post_ra>
